<compile_context>
chip_gen: v7x
topology: tpu7x:2x2x1
jax: 0.10.0
libtpu: 0.0.40
codegen_flags: <defaults>
</compile_context>

<pallas_src>
import functools
import math

import jax
import jax.numpy as jnp
from jax import lax
from jax.experimental import pallas as pl
from jax.experimental.pallas import tpu as pltpu

_INT32_MIN = int(jnp.iinfo(jnp.int32).min)


def _pick_row_block(n):
    # MXU-native M row block (256 on v6e/v7x, 128 on v5e); 128 is a safe
    # default that divides the demo N.  Fall back for tiny N.
    for rb in (256, 128, 64, 32, 16, 8):
        if n % rb == 0:
            return rb
    return n


def _pick_strip(n, rb):
    # Keep strip*N <~ 8k elements so the live (strip, N) i32/f32 arrays of the
    # top-k stay inside the vreg file (no spills).
    for ts in (32, 16, 8):
        if rb % ts == 0 and ts * n <= 8192:
            return ts
    return 8 if rb % 8 == 0 else rb


def _padded_bytes(rows, cols, itemsize):
    sub = 16 if itemsize == 2 else 8
    r = -(-rows // sub) * sub
    c = -(-cols // 128) * 128
    return r * c * itemsize


def _vmem_limit_bytes(n, d, rb, c, qs, batch):
    scratch = (_padded_bytes(n, d, 4)      # xn  f32 staging
               + _padded_bytes(n, d, 2)    # xnb bf16 MXU feed
               + _padded_bytes(rb, n, 4)   # per-block similarity
               + _padded_bytes(n, n, 2)    # bf16 adjacency W
               + _padded_bytes(n, c, 4))   # node features
    io = 2 * (_padded_bytes(qs, d, 4) + _padded_bytes(batch, d, 4)
              + _padded_bytes(qs, 1, 4) + 2 * _padded_bytes(1, batch, 4))
    need = 2 * (scratch + io) + (4 << 20)
    try:
        cap = int(getattr(pltpu.get_tpu_info(), "vmem_capacity_bytes", 64 << 20))
    except Exception:                       # pragma: no cover - conservative fallback
        cap = 64 << 20                      # v7x-sized fallback
    return min(max(need, 32 << 20), int(cap * 0.9))


def _fused_kernel(mem_ref, x_ref, labels_ref, conf_ref, pred_ref,
                  xn_ref, xnb_ref, sim_ref, w_ref, feat_ref, *,
                  k, num_cls, n_iters, row_block, strip):
    qs, _ = mem_ref.shape
    batch = x_ref.shape[0]
    n = qs + batch
    rb = row_block

    # --- 0. assemble the row-normalized node matrix (bf16 MXU feed) ---------
    # memory rows arrive pre-normalized from the host (done once per queue
    # update); only the `batch` new rows are normalized here.
    xb = x_ref[...]                                               # (batch, D) f32
    inv = lax.rsqrt(jnp.sum(xb * xb, axis=-1, keepdims=True) + 1e-12)
    xn_ref[pl.ds(0, qs), :] = mem_ref[...]
    xn_ref[pl.ds(qs, batch), :] = xb * inv
    xnb_ref[...] = xn_ref[...].astype(jnp.bfloat16)               # one aligned cast

    # --- 1+2. fused cosine similarity + top-k, per MXU row block ------------
    # Pack (similarity, column) into one sortable int32 key (float bits mapped
    # to a monotone integer order, low bits traded for n-1-col) so a SINGLE
    # cross-lane max per k step yields both the max and its column.
    idx_bits = max(1, (n - 1).bit_length())
    idx_mask = (1 << idx_bits) - 1
    neg = jnp.int32(_INT32_MIN)
    col_ids = lax.broadcasted_iota(jnp.int32, (strip, n), 1)      # hoisted
    row_loc = lax.broadcasted_iota(jnp.int32, (strip, n), 0)      # hoisted
    rhs = xnb_ref[...]                                            # (n, D) bf16

    for b in range(n // rb):                                      # static, unrolled
        r0 = b * rb
        # (rb, D) x (n, D)^T on the MXU, f32 accumulate, into a small scratch.
        sim_ref[...] = lax.dot_general(
            xnb_ref[pl.ds(r0, rb), :], rhs,
            (((1,), (1,)), ((), ())), preferred_element_type=jnp.float32)

        for s in range(rb // strip):                              # static, unrolled
            rl = s * strip
            sim_s = sim_ref[pl.ds(rl, strip), :]                  # (strip, n) f32
            bits = pltpu.bitcast(sim_s, jnp.int32)
            keyv = jnp.where(bits >= 0, bits, neg - bits)         # float-order ints
            keyv = (keyv & jnp.int32(~idx_mask)) | (jnp.int32(n - 1) - col_ids)
            keyv = jnp.where(col_ids == row_loc + (r0 + rl), neg, keyv)  # no self-sim
            w_s = jnp.zeros((strip, n), jnp.float32)
            for _ in range(k):                                    # k small & static
                best = jnp.max(keyv, axis=-1, keepdims=True)      # one XLU reduce
                col_best = jnp.int32(n - 1) - (best & jnp.int32(idx_mask))
                hit = (col_ids == col_best) & (best > neg)
                w_s = jnp.where(hit, sim_s, w_s)
                keyv = jnp.where(hit, neg, keyv)
            # only the selected weights leave the strip, already as bf16
            w_ref[pl.ds(r0 + rl, strip), :] = w_s.astype(jnp.bfloat16)

    # --- 3. node features: one_hot(memory_label) for queue rows, zeros for
    #        incoming batch rows (derived from row position, no HBM concat). --
    cls_q = lax.broadcasted_iota(jnp.int32, (qs, num_cls), 1)
    feat_ref[pl.ds(0, qs), :] = (labels_ref[...] == cls_q).astype(jnp.float32)
    feat_ref[pl.ds(qs, batch), :] = jnp.zeros((batch, num_cls), jnp.float32)
    feat = feat_ref[...]

    # --- 4. graph propagation -------------------------------------------------
    # TODO(synk): the torch forward calls an external trained GNN `model(data)`
    # three times; that model has no in-module definition, so this uses the KNN
    # edge weights directly (out[i] = sum_j W[i, j] * feat[j]) followed by a
    # row softmax, iterated n_iters times (mirrors edge_index/edge_attr
    # aggregation semantics).  num_cls is left unpadded; pad to 128 and mask
    # padded columns to -inf before the softmax only if classes ever grow.
    for _ in range(n_iters):
        fb16 = feat.astype(jnp.bfloat16)
        outs = []
        for bb in range(n // rb):                                 # row-blocked
            h = jnp.dot(w_ref[pl.ds(bb * rb, rb), :], fb16,
                        preferred_element_type=jnp.float32)       # (rb, C)
            h = h - jnp.max(h, axis=-1, keepdims=True)
            e = jnp.exp(h)
            outs.append(e * pl.reciprocal(jnp.sum(e, axis=-1, keepdims=True),
                                          approx=True))
        feat = outs[0] if len(outs) == 1 else jnp.concatenate(outs, axis=0)

    # --- 5. confidence / prediction for the last `batch` rows, lane-dense ----
    fbT = feat[n - batch:, :].T                                   # (C, batch)
    cmax = jnp.max(fbT, axis=0, keepdims=True)                    # (1, batch)
    conf_ref[...] = cmax
    r_ids = lax.broadcasted_iota(jnp.int32, fbT.shape, 0)
    cand = jnp.where(fbT == cmax, r_ids, jnp.int32(num_cls))
    pred_ref[...] = jnp.min(cand, axis=0, keepdims=True)          # first max index


def knn_propagate(memory_n, x, labels, *, k, num_cls, n_iters=3):
    qs, d = memory_n.shape
    batch = x.shape[0]
    n = qs + batch
    assert qs % 8 == 0 and n % 8 == 0, \
        "queue_size and queue_size+batch must be multiples of 8 (sublane tile)"
    rb = _pick_row_block(n)
    strip = _pick_strip(n, rb)

    kernel = functools.partial(_fused_kernel, k=k, num_cls=num_cls,
                               n_iters=n_iters, row_block=rb, strip=strip)
    return pl.pallas_call(
        kernel,
        out_shape=(jax.ShapeDtypeStruct((1, batch), jnp.float32),
                   jax.ShapeDtypeStruct((1, batch), jnp.int32)),
        grid=(1,),
        in_specs=[pl.BlockSpec((qs, d), lambda i: (0, 0)),        # normalized queue
                  pl.BlockSpec((batch, d), lambda i: (0, 0)),     # new batch rows
                  pl.BlockSpec((qs, 1), lambda i: (0, 0))],       # queue labels
        out_specs=(pl.BlockSpec((1, batch), lambda i: (0, 0)),
                   pl.BlockSpec((1, batch), lambda i: (0, 0))),
        scratch_shapes=[
            pltpu.VMEM((n, d), jnp.float32),      # staging: normalized samples
            pltpu.VMEM((n, d), jnp.bfloat16),     # MXU feed
            pltpu.VMEM((rb, n), jnp.float32),     # per-block similarity strip
            pltpu.VMEM((n, n), jnp.bfloat16),     # KNN adjacency W (bf16 only)
            pltpu.VMEM((n, num_cls), jnp.float32),  # node features
        ],
        compiler_params=pltpu.CompilerParams(
            dimension_semantics=("arbitrary",),
            vmem_limit_bytes=_vmem_limit_bytes(n, d, rb, num_cls, qs, batch)),
    )(memory_n, x, labels)


# ----------------------------------------------------------------------------
# Module wrapper (parameter init mirrors MomentumQueue.__init__)
# ----------------------------------------------------------------------------
class MomentumQueuePallas:
    def __init__(self, feature_dim, queue_size, temperature, k, classes,
                 eps_ball=1.1, seed=1234):
        self.queue_size = queue_size
        self.index = 0
        self.temperature = temperature   # parity with torch module; unused in forward()
        self.k = k
        self.classes = classes
        self.eps_ball = eps_ball         # parity with torch module; unused in forward()
        stdv = 1.0 / math.sqrt(feature_dim / 3)
        key = jax.random.PRNGKey(seed)
        # torch.rand(Q, D) * 2*stdv - stdv  ==  U(-stdv, stdv)
        self.memory = jax.random.uniform(
            key, (queue_size, feature_dim),
            minval=-stdv, maxval=stdv, dtype=jnp.float32)
        self.memory_label = jnp.zeros((queue_size,), jnp.int32)
        self._refresh_cached()

    def _refresh_cached(self):
        # Pre-normalize the queue ONCE (cosine similarity re-normalizes anyway)
        # so forward() never touches queue_size-sized VPU/EUP work or copies.
        m = self.memory
        inv = lax.rsqrt(jnp.sum(m * m, axis=-1, keepdims=True) + 1e-12)
        self.memory_n = m * inv
        self.memory_label2d = self.memory_label.astype(jnp.int32)[:, None]

    def update_queue(self, k_all, k_label_all):
        # parity with the torch ring-buffer update (normalize + index_copy_)
        k_all = k_all.astype(jnp.float32)
        k_all = k_all * lax.rsqrt(jnp.sum(k_all * k_all, axis=-1, keepdims=True) + 1e-12)
        m = k_all.shape[0]
        ids = (jnp.arange(m) + self.index) % self.queue_size
        self.memory = self.memory.at[ids].set(k_all)
        self.memory_label = self.memory_label.at[ids].set(k_label_all.astype(jnp.int32))
        self.index = (self.index + m) % self.queue_size
        self._refresh_cached()

    def forward(self, x, num_cls):
        conf, pred = knn_propagate(self.memory_n, x.astype(jnp.float32),
                                   self.memory_label2d,
                                   k=self.k, num_cls=num_cls, n_iters=3)
        # == (confidence[-x.size(0):], predict[-x.size(0):]) of the reference
        return conf[0], pred[0]


if __name__ == "__main__":
    feature_dim = 32
    queue_size = 120
    batch = 8          # N = queue_size + batch = 128 -> one MXU row block
    k = 5
    num_cls = 16
    temperature = 0.07

    mq = MomentumQueuePallas(feature_dim, queue_size, temperature,
                             k, classes=num_cls)

    key = jax.random.PRNGKey(0)
    x = jax.random.normal(key, (batch, feature_dim), dtype=jnp.float32)

    confidence, predict = mq.forward(x, num_cls)
    jax.block_until_ready((confidence, predict))

    assert confidence.shape == (batch,)
    assert predict.shape == (batch,)
    assert bool(jnp.all(jnp.isfinite(confidence)))
    assert bool(jnp.all((predict >= 0) & (predict < num_cls)))
    print("KERNEL_OK")
</pallas_src>

<mosaic_0001>
module attributes {stable_mosaic.version = 11 : i64} {
  func.func @_fused_kernel(%arg0: i32, %arg1: memref<120x32xf32, #tpu.memory_space<vmem>>, %arg2: memref<8x32xf32, #tpu.memory_space<vmem>>, %arg3: memref<120x1xi32, #tpu.memory_space<vmem>>, %arg4: memref<1x8xf32, #tpu.memory_space<vmem>>, %arg5: memref<1x8xi32, #tpu.memory_space<vmem>>, %arg6: memref<128x32xf32, #tpu.memory_space<vmem>>, %arg7: memref<128x32xbf16, #tpu.memory_space<vmem>>, %arg8: memref<128x128xf32, #tpu.memory_space<vmem>>, %arg9: memref<128x128xbf16, #tpu.memory_space<vmem>>, %arg10: memref<128x16xf32, #tpu.memory_space<vmem>>) attributes {dimension_semantics = [#tpu.dimension_semantics<arbitrary>], iteration_bounds = array<i64: 1>, scalar_prefetch = 0 : i64, scratch_operands = 5 : i64, tpu.core_type = #tpu.core_type<tc>, window_params = [{pipeline_mode = #tpu.pipeline_mode<synchronous>, transform_indices = @transform_0, window_bounds = array<i64: 120, 32>}, {pipeline_mode = #tpu.pipeline_mode<synchronous>, transform_indices = @transform_1, window_bounds = array<i64: 8, 32>}, {pipeline_mode = #tpu.pipeline_mode<synchronous>, transform_indices = @transform_2, window_bounds = array<i64: 120, 1>}, {pipeline_mode = #tpu.pipeline_mode<synchronous>, transform_indices = @transform_3, window_bounds = array<i64: 1, 8>}, {pipeline_mode = #tpu.pipeline_mode<synchronous>, transform_indices = @transform_4, window_bounds = array<i64: 1, 8>}]} {
    %c0 = arith.constant 0 : index
    %c0_0 = arith.constant 0 : index
    %0 = vector.load %arg2[%c0, %c0_0] : memref<8x32xf32, #tpu.memory_space<vmem>>, vector<8x32xf32>
    %1 = arith.mulf %0, %0 : vector<8x32xf32>
    %cst = arith.constant dense<0.000000e+00> : vector<8xf32>
    %2 = vector.multi_reduction <add>, %1, %cst [1] : vector<8x32xf32> to vector<8xf32>
    %3 = vector.shape_cast %2 : vector<8xf32> to vector<8x1xf32>
    %cst_1 = arith.constant 9.99999996E-13 : f32
    %4 = vector.broadcast %cst_1 : f32 to vector<8x1xf32>
    %5 = arith.addf %3, %4 : vector<8x1xf32>
    %6 = math.rsqrt %5 : vector<8x1xf32>
    %c0_2 = arith.constant 0 : index
    %c0_3 = arith.constant 0 : index
    %7 = vector.load %arg1[%c0_2, %c0_3] : memref<120x32xf32, #tpu.memory_space<vmem>>, vector<120x32xf32>
    %c0_4 = arith.constant 0 : index
    %c0_5 = arith.constant 0 : index
    %8 = vector.load %arg6[%c0_4, %c0_5] : memref<128x32xf32, #tpu.memory_space<vmem>>, vector<120x32xf32>
    tpu.vector_store %arg6[%c0_4, %c0_5], %7 {strides = array<i32>} : memref<128x32xf32, #tpu.memory_space<vmem>>, vector<120x32xf32>,
    %9 = vector.broadcast %6 : vector<8x1xf32> to vector<8x32xf32>
    %10 = arith.mulf %0, %9 : vector<8x32xf32>
    %c120 = arith.constant 120 : index
    %c0_6 = arith.constant 0 : index
    %11 = vector.load %arg6[%c120, %c0_6] : memref<128x32xf32, #tpu.memory_space<vmem>>, vector<8x32xf32>
    tpu.vector_store %arg6[%c120, %c0_6], %10 {strides = array<i32>} : memref<128x32xf32, #tpu.memory_space<vmem>>, vector<8x32xf32>,
    %c0_7 = arith.constant 0 : index
    %c0_8 = arith.constant 0 : index
    %12 = vector.load %arg6[%c0_7, %c0_8] : memref<128x32xf32, #tpu.memory_space<vmem>>, vector<128x32xf32>
    %13 = arith.truncf %12 : vector<128x32xf32> to vector<128x32xbf16>
    %c0_9 = arith.constant 0 : index
    %c0_10 = arith.constant 0 : index
    %14 = vector.load %arg7[%c0_9, %c0_10] : memref<128x32xbf16, #tpu.memory_space<vmem>>, vector<128x32xbf16>
    tpu.vector_store %arg7[%c0_9, %c0_10], %13 {strides = array<i32>} : memref<128x32xbf16, #tpu.memory_space<vmem>>, vector<128x32xbf16>,
    %15 = tpu.iota {dimensions = array<i32: 1>} : vector<32x128xi32>
    %16 = tpu.iota {dimensions = array<i32: 0>} : vector<32x128xi32>
    %c0_11 = arith.constant 0 : index
    %c0_12 = arith.constant 0 : index
    %17 = vector.load %arg7[%c0_11, %c0_12] : memref<128x32xbf16, #tpu.memory_space<vmem>>, vector<128x32xbf16>
    %c0_13 = arith.constant 0 : index
    %c0_14 = arith.constant 0 : index
    %18 = vector.load %arg7[%c0_13, %c0_14] : memref<128x32xbf16, #tpu.memory_space<vmem>>, vector<128x32xbf16>
    %cst_15 = arith.constant dense<0.000000e+00> : vector<128x128xf32>
    %19 = tpu.matmul %18, %17, %cst_15 {dimension_numbers = #tpu.dot_dimension_numbers<[1], [1], [0], [0], [0, 0, 1, 0], [], []>} : vector<128x32xbf16>, vector<128x32xbf16>, vector<128x128xf32> -> vector<128x128xf32>
    %c0_16 = arith.constant 0 : index
    %c0_17 = arith.constant 0 : index
    %20 = vector.load %arg8[%c0_16, %c0_17] : memref<128x128xf32, #tpu.memory_space<vmem>>, vector<128x128xf32>
    tpu.vector_store %arg8[%c0_16, %c0_17], %19 {strides = array<i32>} : memref<128x128xf32, #tpu.memory_space<vmem>>, vector<128x128xf32>,
    %c0_18 = arith.constant 0 : index
    %c0_19 = arith.constant 0 : index
    %21 = vector.load %arg8[%c0_18, %c0_19] : memref<128x128xf32, #tpu.memory_space<vmem>>, vector<32x128xf32>
    %22 = tpu.bitcast %21 : vector<32x128xf32> -> vector<32x128xi32>
    %c0_i32 = arith.constant 0 : i32
    %23 = vector.broadcast %c0_i32 : i32 to vector<32x128xi32>
    %24 = arith.cmpi sge, %22, %23 : vector<32x128xi32>
    %c-2147483648_i32 = arith.constant -2147483648 : i32
    %25 = vector.broadcast %c-2147483648_i32 : i32 to vector<32x128xi32>
    %26 = arith.subi %25, %22 : vector<32x128xi32>
    %27 = arith.select %24, %22, %26 : vector<32x128xi1>, vector<32x128xi32>
    %c-128_i32 = arith.constant -128 : i32
    %28 = vector.broadcast %c-128_i32 : i32 to vector<32x128xi32>
    %29 = arith.andi %27, %28 : vector<32x128xi32>
    %c127_i32 = arith.constant 127 : i32
    %30 = vector.broadcast %c127_i32 : i32 to vector<32x128xi32>
    %31 = arith.subi %30, %15 : vector<32x128xi32>
    %32 = arith.ori %29, %31 : vector<32x128xi32>
    %c0_i32_20 = arith.constant 0 : i32
    %33 = vector.broadcast %c0_i32_20 : i32 to vector<32x128xi32>
    %34 = arith.addi %16, %33 : vector<32x128xi32>
    %35 = arith.cmpi eq, %15, %34 : vector<32x128xi32>
    %c-2147483648_i32_21 = arith.constant -2147483648 : i32
    %36 = vector.broadcast %c-2147483648_i32_21 : i32 to vector<32x128xi32>
    %37 = arith.select %35, %36, %32 : vector<32x128xi1>, vector<32x128xi32>
    %cst_22 = arith.constant 0.000000e+00 : f32
    %38 = vector.broadcast %cst_22 : f32 to vector<32x128xf32>
    %cst_23 = arith.constant dense<-2147483648> : vector<32xi32>
    %39 = vector.multi_reduction <maxsi>, %37, %cst_23 [1] : vector<32x128xi32> to vector<32xi32>
    %40 = vector.shape_cast %39 : vector<32xi32> to vector<32x1xi32>
    %c127_i32_24 = arith.constant 127 : i32
    %41 = vector.broadcast %c127_i32_24 : i32 to vector<32x1xi32>
    %42 = arith.andi %40, %41 : vector<32x1xi32>
    %c127_i32_25 = arith.constant 127 : i32
    %43 = vector.broadcast %c127_i32_25 : i32 to vector<32x1xi32>
    %44 = arith.subi %43, %42 : vector<32x1xi32>
    %45 = vector.broadcast %44 : vector<32x1xi32> to vector<32x128xi32>
    %46 = arith.cmpi eq, %15, %45 : vector<32x128xi32>
    %c-2147483648_i32_26 = arith.constant -2147483648 : i32
    %47 = vector.broadcast %c-2147483648_i32_26 : i32 to vector<32x1xi32>
    %48 = arith.cmpi sgt, %40, %47 : vector<32x1xi32>
    %49 = vector.broadcast %48 : vector<32x1xi1> to vector<32x128xi1>
    %50 = arith.andi %46, %49 : vector<32x128xi1>
    %51 = arith.select %50, %21, %38 : vector<32x128xi1>, vector<32x128xf32>
    %c-2147483648_i32_27 = arith.constant -2147483648 : i32
    %52 = vector.broadcast %c-2147483648_i32_27 : i32 to vector<32x128xi32>
    %53 = arith.select %50, %52, %37 : vector<32x128xi1>, vector<32x128xi32>
    %cst_28 = arith.constant dense<-2147483648> : vector<32xi32>
    %54 = vector.multi_reduction <maxsi>, %53, %cst_28 [1] : vector<32x128xi32> to vector<32xi32>
    %55 = vector.shape_cast %54 : vector<32xi32> to vector<32x1xi32>
    %c127_i32_29 = arith.constant 127 : i32
    %56 = vector.broadcast %c127_i32_29 : i32 to vector<32x1xi32>
    %57 = arith.andi %55, %56 : vector<32x1xi32>
    %c127_i32_30 = arith.constant 127 : i32
    %58 = vector.broadcast %c127_i32_30 : i32 to vector<32x1xi32>
    %59 = arith.subi %58, %57 : vector<32x1xi32>
    %60 = vector.broadcast %59 : vector<32x1xi32> to vector<32x128xi32>
    %61 = arith.cmpi eq, %15, %60 : vector<32x128xi32>
    %c-2147483648_i32_31 = arith.constant -2147483648 : i32
    %62 = vector.broadcast %c-2147483648_i32_31 : i32 to vector<32x1xi32>
    %63 = arith.cmpi sgt, %55, %62 : vector<32x1xi32>
    %64 = vector.broadcast %63 : vector<32x1xi1> to vector<32x128xi1>
    %65 = arith.andi %61, %64 : vector<32x128xi1>
    %66 = arith.select %65, %21, %51 : vector<32x128xi1>, vector<32x128xf32>
    %c-2147483648_i32_32 = arith.constant -2147483648 : i32
    %67 = vector.broadcast %c-2147483648_i32_32 : i32 to vector<32x128xi32>
    %68 = arith.select %65, %67, %53 : vector<32x128xi1>, vector<32x128xi32>
    %cst_33 = arith.constant dense<-2147483648> : vector<32xi32>
    %69 = vector.multi_reduction <maxsi>, %68, %cst_33 [1] : vector<32x128xi32> to vector<32xi32>
    %70 = vector.shape_cast %69 : vector<32xi32> to vector<32x1xi32>
    %c127_i32_34 = arith.constant 127 : i32
    %71 = vector.broadcast %c127_i32_34 : i32 to vector<32x1xi32>
    %72 = arith.andi %70, %71 : vector<32x1xi32>
    %c127_i32_35 = arith.constant 127 : i32
    %73 = vector.broadcast %c127_i32_35 : i32 to vector<32x1xi32>
    %74 = arith.subi %73, %72 : vector<32x1xi32>
    %75 = vector.broadcast %74 : vector<32x1xi32> to vector<32x128xi32>
    %76 = arith.cmpi eq, %15, %75 : vector<32x128xi32>
    %c-2147483648_i32_36 = arith.constant -2147483648 : i32
    %77 = vector.broadcast %c-2147483648_i32_36 : i32 to vector<32x1xi32>
    %78 = arith.cmpi sgt, %70, %77 : vector<32x1xi32>
    %79 = vector.broadcast %78 : vector<32x1xi1> to vector<32x128xi1>
    %80 = arith.andi %76, %79 : vector<32x128xi1>
    %81 = arith.select %80, %21, %66 : vector<32x128xi1>, vector<32x128xf32>
    %c-2147483648_i32_37 = arith.constant -2147483648 : i32
    %82 = vector.broadcast %c-2147483648_i32_37 : i32 to vector<32x128xi32>
    %83 = arith.select %80, %82, %68 : vector<32x128xi1>, vector<32x128xi32>
    %cst_38 = arith.constant dense<-2147483648> : vector<32xi32>
    %84 = vector.multi_reduction <maxsi>, %83, %cst_38 [1] : vector<32x128xi32> to vector<32xi32>
    %85 = vector.shape_cast %84 : vector<32xi32> to vector<32x1xi32>
    %c127_i32_39 = arith.constant 127 : i32
    %86 = vector.broadcast %c127_i32_39 : i32 to vector<32x1xi32>
    %87 = arith.andi %85, %86 : vector<32x1xi32>
    %c127_i32_40 = arith.constant 127 : i32
    %88 = vector.broadcast %c127_i32_40 : i32 to vector<32x1xi32>
    %89 = arith.subi %88, %87 : vector<32x1xi32>
    %90 = vector.broadcast %89 : vector<32x1xi32> to vector<32x128xi32>
    %91 = arith.cmpi eq, %15, %90 : vector<32x128xi32>
    %c-2147483648_i32_41 = arith.constant -2147483648 : i32
    %92 = vector.broadcast %c-2147483648_i32_41 : i32 to vector<32x1xi32>
    %93 = arith.cmpi sgt, %85, %92 : vector<32x1xi32>
    %94 = vector.broadcast %93 : vector<32x1xi1> to vector<32x128xi1>
    %95 = arith.andi %91, %94 : vector<32x128xi1>
    %96 = arith.select %95, %21, %81 : vector<32x128xi1>, vector<32x128xf32>
    %c-2147483648_i32_42 = arith.constant -2147483648 : i32
    %97 = vector.broadcast %c-2147483648_i32_42 : i32 to vector<32x128xi32>
    %98 = arith.select %95, %97, %83 : vector<32x128xi1>, vector<32x128xi32>
    %cst_43 = arith.constant dense<-2147483648> : vector<32xi32>
    %99 = vector.multi_reduction <maxsi>, %98, %cst_43 [1] : vector<32x128xi32> to vector<32xi32>
    %100 = vector.shape_cast %99 : vector<32xi32> to vector<32x1xi32>
    %c127_i32_44 = arith.constant 127 : i32
    %101 = vector.broadcast %c127_i32_44 : i32 to vector<32x1xi32>
    %102 = arith.andi %100, %101 : vector<32x1xi32>
    %c127_i32_45 = arith.constant 127 : i32
    %103 = vector.broadcast %c127_i32_45 : i32 to vector<32x1xi32>
    %104 = arith.subi %103, %102 : vector<32x1xi32>
    %105 = vector.broadcast %104 : vector<32x1xi32> to vector<32x128xi32>
    %106 = arith.cmpi eq, %15, %105 : vector<32x128xi32>
    %c-2147483648_i32_46 = arith.constant -2147483648 : i32
    %107 = vector.broadcast %c-2147483648_i32_46 : i32 to vector<32x1xi32>
    %108 = arith.cmpi sgt, %100, %107 : vector<32x1xi32>
    %109 = vector.broadcast %108 : vector<32x1xi1> to vector<32x128xi1>
    %110 = arith.andi %106, %109 : vector<32x128xi1>
    %111 = arith.select %110, %21, %96 : vector<32x128xi1>, vector<32x128xf32>
    %112 = arith.truncf %111 : vector<32x128xf32> to vector<32x128xbf16>
    %c0_47 = arith.constant 0 : index
    %c0_48 = arith.constant 0 : index
    %113 = vector.load %arg9[%c0_47, %c0_48] : memref<128x128xbf16, #tpu.memory_space<vmem>>, vector<32x128xbf16>
    tpu.vector_store %arg9[%c0_47, %c0_48], %112 {strides = array<i32>} : memref<128x128xbf16, #tpu.memory_space<vmem>>, vector<32x128xbf16>,
    %c32 = arith.constant 32 : index
    %c0_49 = arith.constant 0 : index
    %114 = vector.load %arg8[%c32, %c0_49] : memref<128x128xf32, #tpu.memory_space<vmem>>, vector<32x128xf32>
    %115 = tpu.bitcast %114 : vector<32x128xf32> -> vector<32x128xi32>
    %c0_i32_50 = arith.constant 0 : i32
    %116 = vector.broadcast %c0_i32_50 : i32 to vector<32x128xi32>
    %117 = arith.cmpi sge, %115, %116 : vector<32x128xi32>
    %c-2147483648_i32_51 = arith.constant -2147483648 : i32
    %118 = vector.broadcast %c-2147483648_i32_51 : i32 to vector<32x128xi32>
    %119 = arith.subi %118, %115 : vector<32x128xi32>
    %120 = arith.select %117, %115, %119 : vector<32x128xi1>, vector<32x128xi32>
    %c-128_i32_52 = arith.constant -128 : i32
    %121 = vector.broadcast %c-128_i32_52 : i32 to vector<32x128xi32>
    %122 = arith.andi %120, %121 : vector<32x128xi32>
    %c127_i32_53 = arith.constant 127 : i32
    %123 = vector.broadcast %c127_i32_53 : i32 to vector<32x128xi32>
    %124 = arith.subi %123, %15 : vector<32x128xi32>
    %125 = arith.ori %122, %124 : vector<32x128xi32>
    %c32_i32 = arith.constant 32 : i32
    %126 = vector.broadcast %c32_i32 : i32 to vector<32x128xi32>
    %127 = arith.addi %16, %126 : vector<32x128xi32>
    %128 = arith.cmpi eq, %15, %127 : vector<32x128xi32>
    %c-2147483648_i32_54 = arith.constant -2147483648 : i32
    %129 = vector.broadcast %c-2147483648_i32_54 : i32 to vector<32x128xi32>
    %130 = arith.select %128, %129, %125 : vector<32x128xi1>, vector<32x128xi32>
    %cst_55 = arith.constant 0.000000e+00 : f32
    %131 = vector.broadcast %cst_55 : f32 to vector<32x128xf32>
    %cst_56 = arith.constant dense<-2147483648> : vector<32xi32>
    %132 = vector.multi_reduction <maxsi>, %130, %cst_56 [1] : vector<32x128xi32> to vector<32xi32>
    %133 = vector.shape_cast %132 : vector<32xi32> to vector<32x1xi32>
    %c127_i32_57 = arith.constant 127 : i32
    %134 = vector.broadcast %c127_i32_57 : i32 to vector<32x1xi32>
    %135 = arith.andi %133, %134 : vector<32x1xi32>
    %c127_i32_58 = arith.constant 127 : i32
    %136 = vector.broadcast %c127_i32_58 : i32 to vector<32x1xi32>
    %137 = arith.subi %136, %135 : vector<32x1xi32>
    %138 = vector.broadcast %137 : vector<32x1xi32> to vector<32x128xi32>
    %139 = arith.cmpi eq, %15, %138 : vector<32x128xi32>
    %c-2147483648_i32_59 = arith.constant -2147483648 : i32
    %140 = vector.broadcast %c-2147483648_i32_59 : i32 to vector<32x1xi32>
    %141 = arith.cmpi sgt, %133, %140 : vector<32x1xi32>
    %142 = vector.broadcast %141 : vector<32x1xi1> to vector<32x128xi1>
    %143 = arith.andi %139, %142 : vector<32x128xi1>
    %144 = arith.select %143, %114, %131 : vector<32x128xi1>, vector<32x128xf32>
    %c-2147483648_i32_60 = arith.constant -2147483648 : i32
    %145 = vector.broadcast %c-2147483648_i32_60 : i32 to vector<32x128xi32>
    %146 = arith.select %143, %145, %130 : vector<32x128xi1>, vector<32x128xi32>
    %cst_61 = arith.constant dense<-2147483648> : vector<32xi32>
    %147 = vector.multi_reduction <maxsi>, %146, %cst_61 [1] : vector<32x128xi32> to vector<32xi32>
    %148 = vector.shape_cast %147 : vector<32xi32> to vector<32x1xi32>
    %c127_i32_62 = arith.constant 127 : i32
    %149 = vector.broadcast %c127_i32_62 : i32 to vector<32x1xi32>
    %150 = arith.andi %148, %149 : vector<32x1xi32>
    %c127_i32_63 = arith.constant 127 : i32
    %151 = vector.broadcast %c127_i32_63 : i32 to vector<32x1xi32>
    %152 = arith.subi %151, %150 : vector<32x1xi32>
    %153 = vector.broadcast %152 : vector<32x1xi32> to vector<32x128xi32>
    %154 = arith.cmpi eq, %15, %153 : vector<32x128xi32>
    %c-2147483648_i32_64 = arith.constant -2147483648 : i32
    %155 = vector.broadcast %c-2147483648_i32_64 : i32 to vector<32x1xi32>
    %156 = arith.cmpi sgt, %148, %155 : vector<32x1xi32>
    %157 = vector.broadcast %156 : vector<32x1xi1> to vector<32x128xi1>
    %158 = arith.andi %154, %157 : vector<32x128xi1>
    %159 = arith.select %158, %114, %144 : vector<32x128xi1>, vector<32x128xf32>
    %c-2147483648_i32_65 = arith.constant -2147483648 : i32
    %160 = vector.broadcast %c-2147483648_i32_65 : i32 to vector<32x128xi32>
    %161 = arith.select %158, %160, %146 : vector<32x128xi1>, vector<32x128xi32>
    %cst_66 = arith.constant dense<-2147483648> : vector<32xi32>
    %162 = vector.multi_reduction <maxsi>, %161, %cst_66 [1] : vector<32x128xi32> to vector<32xi32>
    %163 = vector.shape_cast %162 : vector<32xi32> to vector<32x1xi32>
    %c127_i32_67 = arith.constant 127 : i32
    %164 = vector.broadcast %c127_i32_67 : i32 to vector<32x1xi32>
    %165 = arith.andi %163, %164 : vector<32x1xi32>
    %c127_i32_68 = arith.constant 127 : i32
    %166 = vector.broadcast %c127_i32_68 : i32 to vector<32x1xi32>
    %167 = arith.subi %166, %165 : vector<32x1xi32>
    %168 = vector.broadcast %167 : vector<32x1xi32> to vector<32x128xi32>
    %169 = arith.cmpi eq, %15, %168 : vector<32x128xi32>
    %c-2147483648_i32_69 = arith.constant -2147483648 : i32
    %170 = vector.broadcast %c-2147483648_i32_69 : i32 to vector<32x1xi32>
    %171 = arith.cmpi sgt, %163, %170 : vector<32x1xi32>
    %172 = vector.broadcast %171 : vector<32x1xi1> to vector<32x128xi1>
    %173 = arith.andi %169, %172 : vector<32x128xi1>
    %174 = arith.select %173, %114, %159 : vector<32x128xi1>, vector<32x128xf32>
    %c-2147483648_i32_70 = arith.constant -2147483648 : i32
    %175 = vector.broadcast %c-2147483648_i32_70 : i32 to vector<32x128xi32>
    %176 = arith.select %173, %175, %161 : vector<32x128xi1>, vector<32x128xi32>
    %cst_71 = arith.constant dense<-2147483648> : vector<32xi32>
    %177 = vector.multi_reduction <maxsi>, %176, %cst_71 [1] : vector<32x128xi32> to vector<32xi32>
    %178 = vector.shape_cast %177 : vector<32xi32> to vector<32x1xi32>
    %c127_i32_72 = arith.constant 127 : i32
    %179 = vector.broadcast %c127_i32_72 : i32 to vector<32x1xi32>
    %180 = arith.andi %178, %179 : vector<32x1xi32>
    %c127_i32_73 = arith.constant 127 : i32
    %181 = vector.broadcast %c127_i32_73 : i32 to vector<32x1xi32>
    %182 = arith.subi %181, %180 : vector<32x1xi32>
    %183 = vector.broadcast %182 : vector<32x1xi32> to vector<32x128xi32>
    %184 = arith.cmpi eq, %15, %183 : vector<32x128xi32>
    %c-2147483648_i32_74 = arith.constant -2147483648 : i32
    %185 = vector.broadcast %c-2147483648_i32_74 : i32 to vector<32x1xi32>
    %186 = arith.cmpi sgt, %178, %185 : vector<32x1xi32>
    %187 = vector.broadcast %186 : vector<32x1xi1> to vector<32x128xi1>
    %188 = arith.andi %184, %187 : vector<32x128xi1>
    %189 = arith.select %188, %114, %174 : vector<32x128xi1>, vector<32x128xf32>
    %c-2147483648_i32_75 = arith.constant -2147483648 : i32
    %190 = vector.broadcast %c-2147483648_i32_75 : i32 to vector<32x128xi32>
    %191 = arith.select %188, %190, %176 : vector<32x128xi1>, vector<32x128xi32>
    %cst_76 = arith.constant dense<-2147483648> : vector<32xi32>
    %192 = vector.multi_reduction <maxsi>, %191, %cst_76 [1] : vector<32x128xi32> to vector<32xi32>
    %193 = vector.shape_cast %192 : vector<32xi32> to vector<32x1xi32>
    %c127_i32_77 = arith.constant 127 : i32
    %194 = vector.broadcast %c127_i32_77 : i32 to vector<32x1xi32>
    %195 = arith.andi %193, %194 : vector<32x1xi32>
    %c127_i32_78 = arith.constant 127 : i32
    %196 = vector.broadcast %c127_i32_78 : i32 to vector<32x1xi32>
    %197 = arith.subi %196, %195 : vector<32x1xi32>
    %198 = vector.broadcast %197 : vector<32x1xi32> to vector<32x128xi32>
    %199 = arith.cmpi eq, %15, %198 : vector<32x128xi32>
    %c-2147483648_i32_79 = arith.constant -2147483648 : i32
    %200 = vector.broadcast %c-2147483648_i32_79 : i32 to vector<32x1xi32>
    %201 = arith.cmpi sgt, %193, %200 : vector<32x1xi32>
    %202 = vector.broadcast %201 : vector<32x1xi1> to vector<32x128xi1>
    %203 = arith.andi %199, %202 : vector<32x128xi1>
    %204 = arith.select %203, %114, %189 : vector<32x128xi1>, vector<32x128xf32>
    %205 = arith.truncf %204 : vector<32x128xf32> to vector<32x128xbf16>
    %c32_80 = arith.constant 32 : index
    %c0_81 = arith.constant 0 : index
    %206 = vector.load %arg9[%c32_80, %c0_81] : memref<128x128xbf16, #tpu.memory_space<vmem>>, vector<32x128xbf16>
    tpu.vector_store %arg9[%c32_80, %c0_81], %205 {strides = array<i32>} : memref<128x128xbf16, #tpu.memory_space<vmem>>, vector<32x128xbf16>,
    %c64 = arith.constant 64 : index
    %c0_82 = arith.constant 0 : index
    %207 = vector.load %arg8[%c64, %c0_82] : memref<128x128xf32, #tpu.memory_space<vmem>>, vector<32x128xf32>
    %208 = tpu.bitcast %207 : vector<32x128xf32> -> vector<32x128xi32>
    %c0_i32_83 = arith.constant 0 : i32
    %209 = vector.broadcast %c0_i32_83 : i32 to vector<32x128xi32>
    %210 = arith.cmpi sge, %208, %209 : vector<32x128xi32>
    %c-2147483648_i32_84 = arith.constant -2147483648 : i32
    %211 = vector.broadcast %c-2147483648_i32_84 : i32 to vector<32x128xi32>
    %212 = arith.subi %211, %208 : vector<32x128xi32>
    %213 = arith.select %210, %208, %212 : vector<32x128xi1>, vector<32x128xi32>
    %c-128_i32_85 = arith.constant -128 : i32
    %214 = vector.broadcast %c-128_i32_85 : i32 to vector<32x128xi32>
    %215 = arith.andi %213, %214 : vector<32x128xi32>
    %c127_i32_86 = arith.constant 127 : i32
    %216 = vector.broadcast %c127_i32_86 : i32 to vector<32x128xi32>
    %217 = arith.subi %216, %15 : vector<32x128xi32>
    %218 = arith.ori %215, %217 : vector<32x128xi32>
    %c64_i32 = arith.constant 64 : i32
    %219 = vector.broadcast %c64_i32 : i32 to vector<32x128xi32>
    %220 = arith.addi %16, %219 : vector<32x128xi32>
    %221 = arith.cmpi eq, %15, %220 : vector<32x128xi32>
    %c-2147483648_i32_87 = arith.constant -2147483648 : i32
    %222 = vector.broadcast %c-2147483648_i32_87 : i32 to vector<32x128xi32>
    %223 = arith.select %221, %222, %218 : vector<32x128xi1>, vector<32x128xi32>
    %cst_88 = arith.constant 0.000000e+00 : f32
    %224 = vector.broadcast %cst_88 : f32 to vector<32x128xf32>
    %cst_89 = arith.constant dense<-2147483648> : vector<32xi32>
    %225 = vector.multi_reduction <maxsi>, %223, %cst_89 [1] : vector<32x128xi32> to vector<32xi32>
    %226 = vector.shape_cast %225 : vector<32xi32> to vector<32x1xi32>
    %c127_i32_90 = arith.constant 127 : i32
    %227 = vector.broadcast %c127_i32_90 : i32 to vector<32x1xi32>
    %228 = arith.andi %226, %227 : vector<32x1xi32>
    %c127_i32_91 = arith.constant 127 : i32
    %229 = vector.broadcast %c127_i32_91 : i32 to vector<32x1xi32>
    %230 = arith.subi %229, %228 : vector<32x1xi32>
    %231 = vector.broadcast %230 : vector<32x1xi32> to vector<32x128xi32>
    %232 = arith.cmpi eq, %15, %231 : vector<32x128xi32>
    %c-2147483648_i32_92 = arith.constant -2147483648 : i32
    %233 = vector.broadcast %c-2147483648_i32_92 : i32 to vector<32x1xi32>
    %234 = arith.cmpi sgt, %226, %233 : vector<32x1xi32>
    %235 = vector.broadcast %234 : vector<32x1xi1> to vector<32x128xi1>
    %236 = arith.andi %232, %235 : vector<32x128xi1>
    %237 = arith.select %236, %207, %224 : vector<32x128xi1>, vector<32x128xf32>
    %c-2147483648_i32_93 = arith.constant -2147483648 : i32
    %238 = vector.broadcast %c-2147483648_i32_93 : i32 to vector<32x128xi32>
    %239 = arith.select %236, %238, %223 : vector<32x128xi1>, vector<32x128xi32>
    %cst_94 = arith.constant dense<-2147483648> : vector<32xi32>
    %240 = vector.multi_reduction <maxsi>, %239, %cst_94 [1] : vector<32x128xi32> to vector<32xi32>
    %241 = vector.shape_cast %240 : vector<32xi32> to vector<32x1xi32>
    %c127_i32_95 = arith.constant 127 : i32
    %242 = vector.broadcast %c127_i32_95 : i32 to vector<32x1xi32>
    %243 = arith.andi %241, %242 : vector<32x1xi32>
    %c127_i32_96 = arith.constant 127 : i32
    %244 = vector.broadcast %c127_i32_96 : i32 to vector<32x1xi32>
    %245 = arith.subi %244, %243 : vector<32x1xi32>
    %246 = vector.broadcast %245 : vector<32x1xi32> to vector<32x128xi32>
    %247 = arith.cmpi eq, %15, %246 : vector<32x128xi32>
    %c-2147483648_i32_97 = arith.constant -2147483648 : i32
    %248 = vector.broadcast %c-2147483648_i32_97 : i32 to vector<32x1xi32>
    %249 = arith.cmpi sgt, %241, %248 : vector<32x1xi32>
    %250 = vector.broadcast %249 : vector<32x1xi1> to vector<32x128xi1>
    %251 = arith.andi %247, %250 : vector<32x128xi1>
    %252 = arith.select %251, %207, %237 : vector<32x128xi1>, vector<32x128xf32>
    %c-2147483648_i32_98 = arith.constant -2147483648 : i32
    %253 = vector.broadcast %c-2147483648_i32_98 : i32 to vector<32x128xi32>
    %254 = arith.select %251, %253, %239 : vector<32x128xi1>, vector<32x128xi32>
    %cst_99 = arith.constant dense<-2147483648> : vector<32xi32>
    %255 = vector.multi_reduction <maxsi>, %254, %cst_99 [1] : vector<32x128xi32> to vector<32xi32>
    %256 = vector.shape_cast %255 : vector<32xi32> to vector<32x1xi32>
    %c127_i32_100 = arith.constant 127 : i32
    %257 = vector.broadcast %c127_i32_100 : i32 to vector<32x1xi32>
    %258 = arith.andi %256, %257 : vector<32x1xi32>
    %c127_i32_101 = arith.constant 127 : i32
    %259 = vector.broadcast %c127_i32_101 : i32 to vector<32x1xi32>
    %260 = arith.subi %259, %258 : vector<32x1xi32>
    %261 = vector.broadcast %260 : vector<32x1xi32> to vector<32x128xi32>
    %262 = arith.cmpi eq, %15, %261 : vector<32x128xi32>
    %c-2147483648_i32_102 = arith.constant -2147483648 : i32
    %263 = vector.broadcast %c-2147483648_i32_102 : i32 to vector<32x1xi32>
    %264 = arith.cmpi sgt, %256, %263 : vector<32x1xi32>
    %265 = vector.broadcast %264 : vector<32x1xi1> to vector<32x128xi1>
    %266 = arith.andi %262, %265 : vector<32x128xi1>
    %267 = arith.select %266, %207, %252 : vector<32x128xi1>, vector<32x128xf32>
    %c-2147483648_i32_103 = arith.constant -2147483648 : i32
    %268 = vector.broadcast %c-2147483648_i32_103 : i32 to vector<32x128xi32>
    %269 = arith.select %266, %268, %254 : vector<32x128xi1>, vector<32x128xi32>
    %cst_104 = arith.constant dense<-2147483648> : vector<32xi32>
    %270 = vector.multi_reduction <maxsi>, %269, %cst_104 [1] : vector<32x128xi32> to vector<32xi32>
    %271 = vector.shape_cast %270 : vector<32xi32> to vector<32x1xi32>
    %c127_i32_105 = arith.constant 127 : i32
    %272 = vector.broadcast %c127_i32_105 : i32 to vector<32x1xi32>
    %273 = arith.andi %271, %272 : vector<32x1xi32>
    %c127_i32_106 = arith.constant 127 : i32
    %274 = vector.broadcast %c127_i32_106 : i32 to vector<32x1xi32>
    %275 = arith.subi %274, %273 : vector<32x1xi32>
    %276 = vector.broadcast %275 : vector<32x1xi32> to vector<32x128xi32>
    %277 = arith.cmpi eq, %15, %276 : vector<32x128xi32>
    %c-2147483648_i32_107 = arith.constant -2147483648 : i32
    %278 = vector.broadcast %c-2147483648_i32_107 : i32 to vector<32x1xi32>
    %279 = arith.cmpi sgt, %271, %278 : vector<32x1xi32>
    %280 = vector.broadcast %279 : vector<32x1xi1> to vector<32x128xi1>
    %281 = arith.andi %277, %280 : vector<32x128xi1>
    %282 = arith.select %281, %207, %267 : vector<32x128xi1>, vector<32x128xf32>
    %c-2147483648_i32_108 = arith.constant -2147483648 : i32
    %283 = vector.broadcast %c-2147483648_i32_108 : i32 to vector<32x128xi32>
    %284 = arith.select %281, %283, %269 : vector<32x128xi1>, vector<32x128xi32>
    %cst_109 = arith.constant dense<-2147483648> : vector<32xi32>
    %285 = vector.multi_reduction <maxsi>, %284, %cst_109 [1] : vector<32x128xi32> to vector<32xi32>
    %286 = vector.shape_cast %285 : vector<32xi32> to vector<32x1xi32>
    %c127_i32_110 = arith.constant 127 : i32
    %287 = vector.broadcast %c127_i32_110 : i32 to vector<32x1xi32>
    %288 = arith.andi %286, %287 : vector<32x1xi32>
    %c127_i32_111 = arith.constant 127 : i32
    %289 = vector.broadcast %c127_i32_111 : i32 to vector<32x1xi32>
    %290 = arith.subi %289, %288 : vector<32x1xi32>
    %291 = vector.broadcast %290 : vector<32x1xi32> to vector<32x128xi32>
    %292 = arith.cmpi eq, %15, %291 : vector<32x128xi32>
    %c-2147483648_i32_112 = arith.constant -2147483648 : i32
    %293 = vector.broadcast %c-2147483648_i32_112 : i32 to vector<32x1xi32>
    %294 = arith.cmpi sgt, %286, %293 : vector<32x1xi32>
    %295 = vector.broadcast %294 : vector<32x1xi1> to vector<32x128xi1>
    %296 = arith.andi %292, %295 : vector<32x128xi1>
    %297 = arith.select %296, %207, %282 : vector<32x128xi1>, vector<32x128xf32>
    %298 = arith.truncf %297 : vector<32x128xf32> to vector<32x128xbf16>
    %c64_113 = arith.constant 64 : index
    %c0_114 = arith.constant 0 : index
    %299 = vector.load %arg9[%c64_113, %c0_114] : memref<128x128xbf16, #tpu.memory_space<vmem>>, vector<32x128xbf16>
    tpu.vector_store %arg9[%c64_113, %c0_114], %298 {strides = array<i32>} : memref<128x128xbf16, #tpu.memory_space<vmem>>, vector<32x128xbf16>,
    %c96 = arith.constant 96 : index
    %c0_115 = arith.constant 0 : index
    %300 = vector.load %arg8[%c96, %c0_115] : memref<128x128xf32, #tpu.memory_space<vmem>>, vector<32x128xf32>
    %301 = tpu.bitcast %300 : vector<32x128xf32> -> vector<32x128xi32>
    %c0_i32_116 = arith.constant 0 : i32
    %302 = vector.broadcast %c0_i32_116 : i32 to vector<32x128xi32>
    %303 = arith.cmpi sge, %301, %302 : vector<32x128xi32>
    %c-2147483648_i32_117 = arith.constant -2147483648 : i32
    %304 = vector.broadcast %c-2147483648_i32_117 : i32 to vector<32x128xi32>
    %305 = arith.subi %304, %301 : vector<32x128xi32>
    %306 = arith.select %303, %301, %305 : vector<32x128xi1>, vector<32x128xi32>
    %c-128_i32_118 = arith.constant -128 : i32
    %307 = vector.broadcast %c-128_i32_118 : i32 to vector<32x128xi32>
    %308 = arith.andi %306, %307 : vector<32x128xi32>
    %c127_i32_119 = arith.constant 127 : i32
    %309 = vector.broadcast %c127_i32_119 : i32 to vector<32x128xi32>
    %310 = arith.subi %309, %15 : vector<32x128xi32>
    %311 = arith.ori %308, %310 : vector<32x128xi32>
    %c96_i32 = arith.constant 96 : i32
    %312 = vector.broadcast %c96_i32 : i32 to vector<32x128xi32>
    %313 = arith.addi %16, %312 : vector<32x128xi32>
    %314 = arith.cmpi eq, %15, %313 : vector<32x128xi32>
    %c-2147483648_i32_120 = arith.constant -2147483648 : i32
    %315 = vector.broadcast %c-2147483648_i32_120 : i32 to vector<32x128xi32>
    %316 = arith.select %314, %315, %311 : vector<32x128xi1>, vector<32x128xi32>
    %cst_121 = arith.constant 0.000000e+00 : f32
    %317 = vector.broadcast %cst_121 : f32 to vector<32x128xf32>
    %cst_122 = arith.constant dense<-2147483648> : vector<32xi32>
    %318 = vector.multi_reduction <maxsi>, %316, %cst_122 [1] : vector<32x128xi32> to vector<32xi32>
    %319 = vector.shape_cast %318 : vector<32xi32> to vector<32x1xi32>
    %c127_i32_123 = arith.constant 127 : i32
    %320 = vector.broadcast %c127_i32_123 : i32 to vector<32x1xi32>
    %321 = arith.andi %319, %320 : vector<32x1xi32>
    %c127_i32_124 = arith.constant 127 : i32
    %322 = vector.broadcast %c127_i32_124 : i32 to vector<32x1xi32>
    %323 = arith.subi %322, %321 : vector<32x1xi32>
    %324 = vector.broadcast %323 : vector<32x1xi32> to vector<32x128xi32>
    %325 = arith.cmpi eq, %15, %324 : vector<32x128xi32>
    %c-2147483648_i32_125 = arith.constant -2147483648 : i32
    %326 = vector.broadcast %c-2147483648_i32_125 : i32 to vector<32x1xi32>
    %327 = arith.cmpi sgt, %319, %326 : vector<32x1xi32>
    %328 = vector.broadcast %327 : vector<32x1xi1> to vector<32x128xi1>
    %329 = arith.andi %325, %328 : vector<32x128xi1>
    %330 = arith.select %329, %300, %317 : vector<32x128xi1>, vector<32x128xf32>
    %c-2147483648_i32_126 = arith.constant -2147483648 : i32
    %331 = vector.broadcast %c-2147483648_i32_126 : i32 to vector<32x128xi32>
    %332 = arith.select %329, %331, %316 : vector<32x128xi1>, vector<32x128xi32>
    %cst_127 = arith.constant dense<-2147483648> : vector<32xi32>
    %333 = vector.multi_reduction <maxsi>, %332, %cst_127 [1] : vector<32x128xi32> to vector<32xi32>
    %334 = vector.shape_cast %333 : vector<32xi32> to vector<32x1xi32>
    %c127_i32_128 = arith.constant 127 : i32
    %335 = vector.broadcast %c127_i32_128 : i32 to vector<32x1xi32>
    %336 = arith.andi %334, %335 : vector<32x1xi32>
    %c127_i32_129 = arith.constant 127 : i32
    %337 = vector.broadcast %c127_i32_129 : i32 to vector<32x1xi32>
    %338 = arith.subi %337, %336 : vector<32x1xi32>
    %339 = vector.broadcast %338 : vector<32x1xi32> to vector<32x128xi32>
    %340 = arith.cmpi eq, %15, %339 : vector<32x128xi32>
    %c-2147483648_i32_130 = arith.constant -2147483648 : i32
    %341 = vector.broadcast %c-2147483648_i32_130 : i32 to vector<32x1xi32>
    %342 = arith.cmpi sgt, %334, %341 : vector<32x1xi32>
    %343 = vector.broadcast %342 : vector<32x1xi1> to vector<32x128xi1>
    %344 = arith.andi %340, %343 : vector<32x128xi1>
    %345 = arith.select %344, %300, %330 : vector<32x128xi1>, vector<32x128xf32>
    %c-2147483648_i32_131 = arith.constant -2147483648 : i32
    %346 = vector.broadcast %c-2147483648_i32_131 : i32 to vector<32x128xi32>
    %347 = arith.select %344, %346, %332 : vector<32x128xi1>, vector<32x128xi32>
    %cst_132 = arith.constant dense<-2147483648> : vector<32xi32>
    %348 = vector.multi_reduction <maxsi>, %347, %cst_132 [1] : vector<32x128xi32> to vector<32xi32>
    %349 = vector.shape_cast %348 : vector<32xi32> to vector<32x1xi32>
    %c127_i32_133 = arith.constant 127 : i32
    %350 = vector.broadcast %c127_i32_133 : i32 to vector<32x1xi32>
    %351 = arith.andi %349, %350 : vector<32x1xi32>
    %c127_i32_134 = arith.constant 127 : i32
    %352 = vector.broadcast %c127_i32_134 : i32 to vector<32x1xi32>
    %353 = arith.subi %352, %351 : vector<32x1xi32>
    %354 = vector.broadcast %353 : vector<32x1xi32> to vector<32x128xi32>
    %355 = arith.cmpi eq, %15, %354 : vector<32x128xi32>
    %c-2147483648_i32_135 = arith.constant -2147483648 : i32
    %356 = vector.broadcast %c-2147483648_i32_135 : i32 to vector<32x1xi32>
    %357 = arith.cmpi sgt, %349, %356 : vector<32x1xi32>
    %358 = vector.broadcast %357 : vector<32x1xi1> to vector<32x128xi1>
    %359 = arith.andi %355, %358 : vector<32x128xi1>
    %360 = arith.select %359, %300, %345 : vector<32x128xi1>, vector<32x128xf32>
    %c-2147483648_i32_136 = arith.constant -2147483648 : i32
    %361 = vector.broadcast %c-2147483648_i32_136 : i32 to vector<32x128xi32>
    %362 = arith.select %359, %361, %347 : vector<32x128xi1>, vector<32x128xi32>
    %cst_137 = arith.constant dense<-2147483648> : vector<32xi32>
    %363 = vector.multi_reduction <maxsi>, %362, %cst_137 [1] : vector<32x128xi32> to vector<32xi32>
    %364 = vector.shape_cast %363 : vector<32xi32> to vector<32x1xi32>
    %c127_i32_138 = arith.constant 127 : i32
    %365 = vector.broadcast %c127_i32_138 : i32 to vector<32x1xi32>
    %366 = arith.andi %364, %365 : vector<32x1xi32>
    %c127_i32_139 = arith.constant 127 : i32
    %367 = vector.broadcast %c127_i32_139 : i32 to vector<32x1xi32>
    %368 = arith.subi %367, %366 : vector<32x1xi32>
    %369 = vector.broadcast %368 : vector<32x1xi32> to vector<32x128xi32>
    %370 = arith.cmpi eq, %15, %369 : vector<32x128xi32>
    %c-2147483648_i32_140 = arith.constant -2147483648 : i32
    %371 = vector.broadcast %c-2147483648_i32_140 : i32 to vector<32x1xi32>
    %372 = arith.cmpi sgt, %364, %371 : vector<32x1xi32>
    %373 = vector.broadcast %372 : vector<32x1xi1> to vector<32x128xi1>
    %374 = arith.andi %370, %373 : vector<32x128xi1>
    %375 = arith.select %374, %300, %360 : vector<32x128xi1>, vector<32x128xf32>
    %c-2147483648_i32_141 = arith.constant -2147483648 : i32
    %376 = vector.broadcast %c-2147483648_i32_141 : i32 to vector<32x128xi32>
    %377 = arith.select %374, %376, %362 : vector<32x128xi1>, vector<32x128xi32>
    %cst_142 = arith.constant dense<-2147483648> : vector<32xi32>
    %378 = vector.multi_reduction <maxsi>, %377, %cst_142 [1] : vector<32x128xi32> to vector<32xi32>
    %379 = vector.shape_cast %378 : vector<32xi32> to vector<32x1xi32>
    %c127_i32_143 = arith.constant 127 : i32
    %380 = vector.broadcast %c127_i32_143 : i32 to vector<32x1xi32>
    %381 = arith.andi %379, %380 : vector<32x1xi32>
    %c127_i32_144 = arith.constant 127 : i32
    %382 = vector.broadcast %c127_i32_144 : i32 to vector<32x1xi32>
    %383 = arith.subi %382, %381 : vector<32x1xi32>
    %384 = vector.broadcast %383 : vector<32x1xi32> to vector<32x128xi32>
    %385 = arith.cmpi eq, %15, %384 : vector<32x128xi32>
    %c-2147483648_i32_145 = arith.constant -2147483648 : i32
    %386 = vector.broadcast %c-2147483648_i32_145 : i32 to vector<32x1xi32>
    %387 = arith.cmpi sgt, %379, %386 : vector<32x1xi32>
    %388 = vector.broadcast %387 : vector<32x1xi1> to vector<32x128xi1>
    %389 = arith.andi %385, %388 : vector<32x128xi1>
    %390 = arith.select %389, %300, %375 : vector<32x128xi1>, vector<32x128xf32>
    %391 = arith.truncf %390 : vector<32x128xf32> to vector<32x128xbf16>
    %c96_146 = arith.constant 96 : index
    %c0_147 = arith.constant 0 : index
    %392 = vector.load %arg9[%c96_146, %c0_147] : memref<128x128xbf16, #tpu.memory_space<vmem>>, vector<32x128xbf16>
    tpu.vector_store %arg9[%c96_146, %c0_147], %391 {strides = array<i32>} : memref<128x128xbf16, #tpu.memory_space<vmem>>, vector<32x128xbf16>,
    %393 = tpu.iota {dimensions = array<i32: 1>} : vector<120x16xi32>
    %c0_148 = arith.constant 0 : index
    %c0_149 = arith.constant 0 : index
    %394 = vector.load %arg3[%c0_148, %c0_149] : memref<120x1xi32, #tpu.memory_space<vmem>>, vector<120x1xi32>
    %395 = vector.broadcast %394 : vector<120x1xi32> to vector<120x16xi32>
    %396 = arith.cmpi eq, %395, %393 : vector<120x16xi32>
    %397 = arith.extui %396 : vector<120x16xi1> to vector<120x16xi32>
    %398 = arith.sitofp %397 : vector<120x16xi32> to vector<120x16xf32>
    %c0_150 = arith.constant 0 : index
    %c0_151 = arith.constant 0 : index
    %399 = vector.load %arg10[%c0_150, %c0_151] : memref<128x16xf32, #tpu.memory_space<vmem>>, vector<120x16xf32>
    tpu.vector_store %arg10[%c0_150, %c0_151], %398 {strides = array<i32>} : memref<128x16xf32, #tpu.memory_space<vmem>>, vector<120x16xf32>,
    %cst_152 = arith.constant 0.000000e+00 : f32
    %400 = vector.broadcast %cst_152 : f32 to vector<8x16xf32>
    %c120_153 = arith.constant 120 : index
    %c0_154 = arith.constant 0 : index
    %401 = vector.load %arg10[%c120_153, %c0_154] : memref<128x16xf32, #tpu.memory_space<vmem>>, vector<8x16xf32>
    tpu.vector_store %arg10[%c120_153, %c0_154], %400 {strides = array<i32>} : memref<128x16xf32, #tpu.memory_space<vmem>>, vector<8x16xf32>,
    %c0_155 = arith.constant 0 : index
    %c0_156 = arith.constant 0 : index
    %402 = vector.load %arg10[%c0_155, %c0_156] : memref<128x16xf32, #tpu.memory_space<vmem>>, vector<128x16xf32>
    %403 = arith.truncf %402 : vector<128x16xf32> to vector<128x16xbf16>
    %c0_157 = arith.constant 0 : index
    %c0_158 = arith.constant 0 : index
    %404 = vector.load %arg9[%c0_157, %c0_158] : memref<128x128xbf16, #tpu.memory_space<vmem>>, vector<128x128xbf16>
    %cst_159 = arith.constant dense<0.000000e+00> : vector<128x16xf32>
    %405 = tpu.matmul %404, %403, %cst_159 {dimension_numbers = #tpu.dot_dimension_numbers<[1], [0], [0], [1], [0, 0, 1, 1], [], []>} : vector<128x128xbf16>, vector<128x16xbf16>, vector<128x16xf32> -> vector<128x16xf32>
    %cst_160 = arith.constant dense<0xFF800000> : vector<128xf32>
    %406 = vector.multi_reduction <maximumf>, %405, %cst_160 [1] : vector<128x16xf32> to vector<128xf32>
    %407 = vector.shape_cast %406 : vector<128xf32> to vector<128x1xf32>
    %408 = vector.broadcast %407 : vector<128x1xf32> to vector<128x16xf32>
    %409 = arith.subf %405, %408 : vector<128x16xf32>
    %410 = math.exp %409 : vector<128x16xf32>
    %cst_161 = arith.constant dense<0.000000e+00> : vector<128xf32>
    %411 = vector.multi_reduction <add>, %410, %cst_161 [1] : vector<128x16xf32> to vector<128xf32>
    %412 = vector.shape_cast %411 : vector<128xf32> to vector<128x1xf32>
    %413 = tpu.reciprocal %412 {approx = true} : vector<128x1xf32> -> vector<128x1xf32>
    %414 = vector.broadcast %413 : vector<128x1xf32> to vector<128x16xf32>
    %415 = arith.mulf %410, %414 : vector<128x16xf32>
    %416 = arith.truncf %415 : vector<128x16xf32> to vector<128x16xbf16>
    %c0_162 = arith.constant 0 : index
    %c0_163 = arith.constant 0 : index
    %417 = vector.load %arg9[%c0_162, %c0_163] : memref<128x128xbf16, #tpu.memory_space<vmem>>, vector<128x128xbf16>
    %cst_164 = arith.constant dense<0.000000e+00> : vector<128x16xf32>
    %418 = tpu.matmul %417, %416, %cst_164 {dimension_numbers = #tpu.dot_dimension_numbers<[1], [0], [0], [1], [0, 0, 1, 1], [], []>} : vector<128x128xbf16>, vector<128x16xbf16>, vector<128x16xf32> -> vector<128x16xf32>
    %cst_165 = arith.constant dense<0xFF800000> : vector<128xf32>
    %419 = vector.multi_reduction <maximumf>, %418, %cst_165 [1] : vector<128x16xf32> to vector<128xf32>
    %420 = vector.shape_cast %419 : vector<128xf32> to vector<128x1xf32>
    %421 = vector.broadcast %420 : vector<128x1xf32> to vector<128x16xf32>
    %422 = arith.subf %418, %421 : vector<128x16xf32>
    %423 = math.exp %422 : vector<128x16xf32>
    %cst_166 = arith.constant dense<0.000000e+00> : vector<128xf32>
    %424 = vector.multi_reduction <add>, %423, %cst_166 [1] : vector<128x16xf32> to vector<128xf32>
    %425 = vector.shape_cast %424 : vector<128xf32> to vector<128x1xf32>
    %426 = tpu.reciprocal %425 {approx = true} : vector<128x1xf32> -> vector<128x1xf32>
    %427 = vector.broadcast %426 : vector<128x1xf32> to vector<128x16xf32>
    %428 = arith.mulf %423, %427 : vector<128x16xf32>
    %429 = arith.truncf %428 : vector<128x16xf32> to vector<128x16xbf16>
    %c0_167 = arith.constant 0 : index
    %c0_168 = arith.constant 0 : index
    %430 = vector.load %arg9[%c0_167, %c0_168] : memref<128x128xbf16, #tpu.memory_space<vmem>>, vector<128x128xbf16>
    %cst_169 = arith.constant dense<0.000000e+00> : vector<128x16xf32>
    %431 = tpu.matmul %430, %429, %cst_169 {dimension_numbers = #tpu.dot_dimension_numbers<[1], [0], [0], [1], [0, 0, 1, 1], [], []>} : vector<128x128xbf16>, vector<128x16xbf16>, vector<128x16xf32> -> vector<128x16xf32>
    %cst_170 = arith.constant dense<0xFF800000> : vector<128xf32>
    %432 = vector.multi_reduction <maximumf>, %431, %cst_170 [1] : vector<128x16xf32> to vector<128xf32>
    %433 = vector.shape_cast %432 : vector<128xf32> to vector<128x1xf32>
    %434 = vector.broadcast %433 : vector<128x1xf32> to vector<128x16xf32>
    %435 = arith.subf %431, %434 : vector<128x16xf32>
    %436 = math.exp %435 : vector<128x16xf32>
    %cst_171 = arith.constant dense<0.000000e+00> : vector<128xf32>
    %437 = vector.multi_reduction <add>, %436, %cst_171 [1] : vector<128x16xf32> to vector<128xf32>
    %438 = vector.shape_cast %437 : vector<128xf32> to vector<128x1xf32>
    %439 = tpu.reciprocal %438 {approx = true} : vector<128x1xf32> -> vector<128x1xf32>
    %440 = vector.broadcast %439 : vector<128x1xf32> to vector<128x16xf32>
    %441 = arith.mulf %436, %440 : vector<128x16xf32>
    %442 = vector.extract_strided_slice %441 {offsets = [120, 0], sizes = [8, 16], strides = [1, 1]} : vector<128x16xf32> to vector<8x16xf32>
    %443 = tpu.transpose %442, [1, 0] : vector<8x16xf32> -> vector<16x8xf32>
    %cst_172 = arith.constant dense<0xFF800000> : vector<8xf32>
    %444 = vector.multi_reduction <maximumf>, %443, %cst_172 [0] : vector<16x8xf32> to vector<8xf32>
    %445 = vector.shape_cast %444 : vector<8xf32> to vector<1x8xf32>
    %c0_173 = arith.constant 0 : index
    %c0_174 = arith.constant 0 : index
    %446 = vector.load %arg4[%c0_173, %c0_174] : memref<1x8xf32, #tpu.memory_space<vmem>>, vector<1x8xf32>
    tpu.vector_store %arg4[%c0_173, %c0_174], %445 {strides = array<i32>} : memref<1x8xf32, #tpu.memory_space<vmem>>, vector<1x8xf32>,
    %447 = tpu.iota {dimensions = array<i32: 0>} : vector<16x8xi32>
    %448 = vector.broadcast %445 : vector<1x8xf32> to vector<16x8xf32>
    %449 = arith.cmpf oeq, %443, %448 : vector<16x8xf32>
    %c16_i32 = arith.constant 16 : i32
    %450 = vector.broadcast %c16_i32 : i32 to vector<16x8xi32>
    %451 = arith.select %449, %447, %450 : vector<16x8xi1>, vector<16x8xi32>
    %cst_175 = arith.constant dense<2147483647> : vector<8xi32>
    %452 = vector.multi_reduction <minsi>, %451, %cst_175 [0] : vector<16x8xi32> to vector<8xi32>
    %453 = vector.shape_cast %452 : vector<8xi32> to vector<1x8xi32>
    %c0_176 = arith.constant 0 : index
    %c0_177 = arith.constant 0 : index
    %454 = vector.load %arg5[%c0_176, %c0_177] : memref<1x8xi32, #tpu.memory_space<vmem>>, vector<1x8xi32>
    tpu.vector_store %arg5[%c0_176, %c0_177], %453 {strides = array<i32>} : memref<1x8xi32, #tpu.memory_space<vmem>>, vector<1x8xi32>,
    return
  }
  func.func @transform_0(%arg0: i32) -> (i32, i32) {
    %c0_i32 = arith.constant 0 : i32
    %c0_i32_0 = arith.constant 0 : i32
    %c0_i32_1 = arith.constant 0 : i32
    return %c0_i32, %c0_i32_0 : i32, i32
  }
  func.func @transform_1(%arg0: i32) -> (i32, i32) {
    %c0_i32 = arith.constant 0 : i32
    %c0_i32_0 = arith.constant 0 : i32
    %c0_i32_1 = arith.constant 0 : i32
    return %c0_i32, %c0_i32_0 : i32, i32
  }
  func.func @transform_2(%arg0: i32) -> (i32, i32) {
    %c0_i32 = arith.constant 0 : i32
    %c0_i32_0 = arith.constant 0 : i32
    %c0_i32_1 = arith.constant 0 : i32
    return %c0_i32, %c0_i32_0 : i32, i32
  }
  func.func @transform_3(%arg0: i32) -> (i32, i32) {
    %c0_i32 = arith.constant 0 : i32
    %c0_i32_0 = arith.constant 0 : i32
    %c0_i32_1 = arith.constant 0 : i32
    return %c0_i32, %c0_i32_0 : i32, i32
  }
  func.func @transform_4(%arg0: i32) -> (i32, i32) {
    %c0_i32 = arith.constant 0 : i32
    %c0_i32_0 = arith.constant 0 : i32
    %c0_i32_1 = arith.constant 0 : i32
    return %c0_i32, %c0_i32_0 : i32, i32
  }
}

</mosaic_0001>

<bundles_post_ra>
// kernel: tpu_custom_call.1
= control target key start
LH: loop header
LB: loop body
LE: loop exit
PB: predicated region body
PF: predicated region fallthrough
CT: control target
= control target key end

     0   :  { %10 = vsyncpa [#allocation8], 0  ;;  %vm21_vm0 = vcmask 261120   ;;  %s6323_s0 = inlined_call_operand.vmem [shape: f32[120,32], index: 0, kind: input, shape index: {}]   ;;  %s6324_s1 = inlined_call_operand.vmem [shape: f32[8,32], index: 1, kind: input, shape index: {}]   ;;  %s6325_s2 = inlined_call_operand.vmem [shape: s32[120,1], index: 2, kind: input, shape index: {}]   ;;  %s6326_s3 = inlined_call_operand.hbm [shape: f32[1,8], index: 3, kind: output, shape index: {0}]   ;;  %s6327_s4 = inlined_call_operand.hbm [shape: s32[1,8], index: 4, kind: output, shape index: {1}]  }
   0x1   :  { %v3598_v0 = vld [vmem:[%s6324_s1] sm:$0xff]  ;;  %v28_v2 = vld [vmem:[%s6323_s0 + $0x8] sm:$0xff]  ;;  %v29_v4 = vld [vmem:[%s6323_s0 + $0x10] sm:$0xff] }
   0x2   :  { %v27_v1 = vld [vmem:[%s6323_s0] sm:$0xff]  ;;  %v20_v3 = vmul.f32 %v3598_v0, %v3598_v0  ;;  %43 = vst.msk [vmem:[#allocation2 + $0x8] sm:$0xff] %vm21_vm0, %v28_v2  ;;  %v30_v5 = vld [vmem:[%s6323_s0 + $0x18] sm:$0xff]  ;;  %44 = vst.msk [vmem:[#allocation2 + $0x10] sm:$0xff] %vm21_vm0, %v29_v4 }
   0x3   :  { %42 = vst.msk [vmem:[#allocation2] sm:$0xff] %vm21_vm0, %v27_v1  ;;  %v31_v6 = vld [vmem:[%s6323_s0 + $0x20] sm:$0xff]  ;;  %45 = vst.msk [vmem:[#allocation2 + $0x18] sm:$0xff] %vm21_vm0, %v30_v5  ;;  %v32_v7 = vld [vmem:[%s6323_s0 + $0x28] sm:$0xff] }
   0x4   :  { %46 = vst.msk [vmem:[#allocation2 + $0x20] sm:$0xff] %vm21_vm0, %v31_v6  ;;  %v33_v8 = vld [vmem:[%s6323_s0 + $0x30] sm:$0xff]  ;;  %v34_v9 = vld [vmem:[%s6323_s0 + $0x38] sm:$0xff]  ;;  %v22_v10 = vsel %vm21_vm0, %v20_v3, 0.0  ;;  %47 = vst.msk [vmem:[#allocation2 + $0x28] sm:$0xff] %vm21_vm0, %v32_v7 }
   0x5   :  { %48 = vst.msk [vmem:[#allocation2 + $0x30] sm:$0xff] %vm21_vm0, %v33_v8  ;;  %49 = vst.msk [vmem:[#allocation2 + $0x38] sm:$0xff] %vm21_vm0, %v34_v9 }
   0x6   :  { %11 = vsyncpa [#allocation10], 0  ;;  %23 = vadd.xlane.f32.xlu0 %v22_v10  ;;  %v35_v13 = vld [vmem:[%s6323_s0 + $0x40] sm:$0xff]  ;;  %v36_v24 = vld [vmem:[%s6323_s0 + $0x48] sm:$0xff]  ;;  %v91_v62 = vlaneseq }
   0x7   :  { %50 = vst.msk [vmem:[#allocation2 + $0x40] sm:$0xff] %vm21_vm0, %v35_v13  ;;  %51 = vst.msk [vmem:[#allocation2 + $0x48] sm:$0xff] %vm21_vm0, %v36_v24  ;;  %v37_v25 = vld [vmem:[%s6323_s0 + $0x50] sm:$0xff]  ;;  %v38_v26 = vld [vmem:[%s6323_s0 + $0x58] sm:$0xff] }
   0x8   :  { %52 = vst.msk [vmem:[#allocation2 + $0x50] sm:$0xff] %vm21_vm0, %v37_v25  ;;  %53 = vst.msk [vmem:[#allocation2 + $0x58] sm:$0xff] %vm21_vm0, %v38_v26  ;;  %v39_v35 = vld [vmem:[%s6323_s0 + $0x60] sm:$0xff]  ;;  %v40_v38 = vld [vmem:[%s6323_s0 + $0x68] sm:$0xff]  ;;  %v3697_v63 = vshrl.u32 %v91_v62, 7 }
   0x9   :  { %v60_v12 = vld [vmem:[#allocation2 + $0x8] sm:$0xff]  ;;  %v61_v15 = vld [vmem:[#allocation2 + $0x10] sm:$0xff]  ;;  %54 = vst.msk [vmem:[#allocation2 + $0x60] sm:$0xff] %vm21_vm0, %v39_v35  ;;  %55 = vst.msk [vmem:[#allocation2 + $0x68] sm:$0xff] %vm21_vm0, %v40_v38 }
   0xa   :  { %v59_v11 = vld [vmem:[#allocation2] sm:$0xff]  ;;  %v62_v16 = vld [vmem:[#allocation2 + $0x18] sm:$0xff]  ;;  %v41_v41 = vld [vmem:[%s6323_s0 + $0x70] sm:$0xff]  ;;  %6423 = vst [vmem:[#allocation13_spill] sm:$0xff] %v3697_v63  ;;  %v3702_v1 = vadd.s32 16, %v3697_v63  ;;  %v3705_v2 = vadd.s32 24, %v3697_v63 }
   0xb   :  { %v75_v14 = vpack.c.bf16 %v60_v12, %v59_v11  ;;  %v63_v17 = vld [vmem:[#allocation2 + $0x20] sm:$0xff]  ;;  %v76_v18 = vpack.c.bf16 %v62_v16, %v61_v15  ;;  %v64_v19 = vld [vmem:[#allocation2 + $0x28] sm:$0xff]  ;;  %56 = vst.msk [vmem:[#allocation2 + $0x70] sm:$0xff] %vm21_vm0, %v41_v41  ;;  %v3719_v6 = vadd.s32 8, %v3697_v63  ;;  %v3730_v10 = vadd.s32 32, %v3697_v63 }
   0xc   :  { %v65_v20 = vld [vmem:[#allocation2 + $0x30] sm:$0xff]  ;;  %v66_v21 = vld [vmem:[#allocation2 + $0x38] sm:$0xff]  ;;  %v77_v22 = vpack.c.bf16 %v64_v19, %v63_v17  ;;  %v3754_v24 = vadd.s32 32, %v3705_v2 }
   0xd   :  { %83 = vst.msk [vmem:[#allocation3] sm:$0xff] %vm21_vm0, %v75_v14  ;;  %v78_v23 = vpack.c.bf16 %v66_v21, %v65_v20  ;;  %84 = vst.msk [vmem:[#allocation3 + $0x8] sm:$0xff] %vm21_vm0, %v76_v18  ;;  %v3738_v14 = vadd.s32 32, %v3702_v1  ;;  %v3747_v20 = vadd.s32 32, %v3719_v6 }
   0xe   :  { %85 = vst.msk [vmem:[#allocation3 + $0x10] sm:$0xff] %vm21_vm0, %v77_v22  ;;  %v67_v27 = vld [vmem:[#allocation2 + $0x40] sm:$0xff]  ;;  %v68_v31 = vld [vmem:[#allocation2 + $0x48] sm:$0xff]  ;;  %6424 = vst [vmem:[#allocation14_spill] sm:$0xff] %v3719_v6 }
   0xf   :  { %86 = vst.msk [vmem:[#allocation3 + $0x18] sm:$0xff] %vm21_vm0, %v78_v23  ;;  %v79_v32 = vpack.c.bf16 %v68_v31, %v67_v27  ;;  %v69_v33 = vld [vmem:[#allocation2 + $0x50] sm:$0xff]  ;;  %v70_v34 = vld [vmem:[#allocation2 + $0x58] sm:$0xff]  ;;  %v3760_v27 = vadd.s32 64, %v3697_v63  ;;  %v3771_v31 = vadd.s32 64, %v3719_v6 }
  0x10   :  { %v80_v37 = vpack.c.bf16 %v70_v34, %v69_v33  ;;  %v71_v40 = vld [vmem:[#allocation2 + $0x60] sm:$0xff]  ;;  %v72_v43 = vld [vmem:[#allocation2 + $0x68] sm:$0xff] }
  0x11   :  { %87 = vst.msk [vmem:[#allocation3 + $0x20] sm:$0xff] %vm21_vm0, %v79_v32  ;;  %v81_v45 = vpack.c.bf16 %v72_v43, %v71_v40  ;;  %v3774_v32 = vadd.s32 64, %v3702_v1 }
  0x12   :  { %88 = vst.msk [vmem:[#allocation3 + $0x28] sm:$0xff] %vm21_vm0, %v80_v37  ;;  %v73_v57 = vld [vmem:[#allocation2 + $0x70] sm:$0xff] }
  0x13   :  { %89 = vst.msk [vmem:[#allocation3 + $0x30] sm:$0xff] %vm21_vm0, %v81_v45 }
  0x14   :  { %v98_v28 = vld [vmem:[#allocation3] sm:$0xff]  ;;  %v99_v30 = vld [vmem:[#allocation3 + $0x8] sm:$0xff] }
  0x15   :  { %3370 = vmatprep.subr.msk.bf16.mxu0 %vm21_vm0, %v98_v28  ;;  %v107_v29 = vsel %vm21_vm0, %v98_v28, 0  ;;  %3242 = vmatprep.mubr.msk.bf16.mxu0 %vm21_vm0, %v98_v28  ;;  %v110_v36 = vsel %vm21_vm0, %v99_v30, 0  ;;  %v100_v39 = vld [vmem:[#allocation3 + $0x10] sm:$0xff] }
  0x16   :  { %3227 = vmatpush3.bf16.xpose.msra.mxu0 %v107_v29  ;;  %v113_v42 = vsel %vm21_vm0, %v100_v39, 0  ;;  %v101_v44 = vld [vmem:[#allocation3 + $0x18] sm:$0xff] }
  0x17   :  { %3371 = vmatprep.subr.msk.bf16.mxu0 %vm21_vm0, %v99_v30  ;;  %v116_v46 = vsel %vm21_vm0, %v101_v44, 0 }
  0x18   :  { %v102_v47 = vld [vmem:[#allocation3 + $0x20] sm:$0xff] }
  0x19   :  { %v119_v48 = vsel %vm21_vm0, %v102_v47, 0  ;;  %v103_v49 = vld [vmem:[#allocation3 + $0x28] sm:$0xff] }
  0x1a   :  { %v122_v50 = vsel %vm21_vm0, %v103_v49, 0  ;;  %v104_v51 = vld [vmem:[#allocation3 + $0x30] sm:$0xff] }
  0x1b   :  { %v125_v52 = vsel %vm21_vm0, %v104_v51, 0 }
  0x1e   :  { %3229 = vmatpush3.bf16.xpose.msra.mxu0 %v110_v36  ;;  %v3788_v36 = vadd.s32 64, %v3705_v2 }
  0x1f   :  { %3372 = vmatprep.subr.msk.bf16.mxu0 %vm21_vm0, %v100_v39 }
  0x26   :  { %3231 = vmatpush3.bf16.xpose.msra.mxu0 %v113_v42 }
  0x27   :  { %3373 = vmatprep.subr.msk.bf16.mxu0 %vm21_vm0, %v101_v44 }
  0x2e   :  { %3233 = vmatpush3.bf16.xpose.msra.mxu0 %v116_v46 }
  0x2f   :  { %3374 = vmatprep.subr.msk.bf16.mxu0 %vm21_vm0, %v102_v47 }
  0x36   :  { %3235 = vmatpush3.bf16.xpose.msra.mxu0 %v119_v48 }
  0x37   :  { %3375 = vmatprep.subr.msk.bf16.mxu0 %vm21_vm0, %v103_v49 }
  0x3e   :  { %3237 = vmatpush3.bf16.xpose.msra.mxu0 %v122_v50 }
  0x3f   :  { %3376 = vmatprep.subr.msk.bf16.mxu0 %vm21_vm0, %v104_v51 }
  0x46   :  { %3239 = vmatpush3.bf16.xpose.msra.mxu0 %v125_v52  ;;  %v3822_v52 = vadd.s32 96, %v3697_v63 }
  0x93   :  { %v24_v53 = vpop.xlane.xlu0 %23 }
  0x94   :  { %v25_v54 = vadd.f32 1e-12, %v24_v53 }
  0x96   :  { %3384 = vrsqrt.f32 %v25_v54 }
  0xa0   :  { %v3385_v55 = vpop.eup %3384 }
  0xa1   :  { %v57_v56 = vmul.f32 %v3385_v55, %v3598_v0  ;;  %v3699_v0 = vand.u32 127, %v91_v62 }
  0xa3   :  { %58 = vst.msk [vmem:[#allocation2 + $0x78] sm:$0xff] %vm21_vm0, %v57_v56  ;;  %v3710_v4 = vsub.s32 127, %v3699_v0  ;;  %vm274_vm1 = vcmp.eq.s32.totalorder %v3699_v0, %v3702_v1  ;;  %vm272_vm2 = vcmp.eq.s32.totalorder %v3699_v0, %v3697_v63  ;;  %vm275_vm5 = vcmp.eq.s32.totalorder %v3699_v0, %v3705_v2 }
  0xa4   :  { %vm273_vm8 = vcmp.eq.s32.totalorder %v3699_v0, %v3719_v6  ;;  %vm772_vm9 = vcmp.eq.s32.totalorder %v3699_v0, %v3730_v10  ;;  %vm774_vm10 = vcmp.eq.s32.totalorder %v3699_v0, %v3738_v14  ;;  %vm773_vm11 = vcmp.eq.s32.totalorder %v3699_v0, %v3747_v20 }
  0xa5   :  { %vm775_vm14 = vcmp.eq.s32.totalorder %v3699_v0, %v3754_v24 }
  0xaa   :  { %v74_v58 = vld [vmem:[#allocation2 + $0x78] sm:$0xff] }
  0xab   :  { %v82_v59 = vpack.c.bf16 %v74_v58, %v73_v57 }
  0xad   :  { %90 = vst.msk [vmem:[#allocation3 + $0x38] sm:$0xff] %vm21_vm0, %v82_v59  ;;  %v3838_v59 = vadd.s32 96, %v3702_v1 }
  0xb4   :  { %v105_v60 = vld [vmem:[#allocation3 + $0x38] sm:$0xff] }
  0xb5   :  { %3377 = vmatprep.subr.msk.bf16.mxu0 %vm21_vm0, %v105_v60  ;;  %v128_v61 = vsel %vm21_vm0, %v105_v60, 0 }
  0xb6   :  { %3241 = vmatpush3.bf16.xpose.msra.mxu0 %v128_v61 }
  0xbd   :  { %3243 = vmatmul.mubr.msk.bf16.vlgmr.msra.gmra.mrb[0].mxu0 %vm21_vm0, %v99_v30 }
  0xbe   :  { %3246 = vmatprep.mubr.msk.bf16.mxu0 %vm21_vm0, %v100_v39 }
  0xc5   :  { %3247 = vmatmul.mubr.msk.bf16.gmra.mrb[4].mxu0 %vm21_vm0, %v101_v44 }
  0xc6   :  { %3250 = vmatprep.mubr.msk.bf16.mxu0 %vm21_vm0, %v102_v47 }
  0xcd   :  { %3251 = vmatmul.mubr.msk.bf16.gmra.mrb[8].mxu0 %vm21_vm0, %v103_v49 }
  0xce   :  { %3254 = vmatprep.mubr.msk.bf16.mxu0 %vm21_vm0, %v104_v51 }
  0xd5   :  { %3255 = vmatmul.mubr.msk.bf16.gmra.mrb[12].mxu0 %vm21_vm0, %v105_v60 }
 0x190   :  { %v3707_v3 = vpop.f32.mrb[0].mxu0 }
 0x191   :  { %v3714_v5 = vpop.f32.mrb[1].mxu0  ;;  %vm253_vm3 = vcmp.ge.s32.totalorder %v3707_v3, 0  ;;  %v257_v7 = vsub.s32 2147483648, %v3707_v3 }
 0x192   :  { %v3723_v8 = vpop.f32.mrb[2].mxu0  ;;  %vm251_vm4 = vcmp.ge.s32.totalorder %v3714_v5, 0  ;;  %v255_v9 = vsub.s32 2147483648, %v3714_v5 }
 0x193   :  { %v3732_v11 = vpop.f32.mrb[3].mxu0  ;;  %vm254_vm6 = vcmp.ge.s32.totalorder %v3723_v8, 0  ;;  %v258_v12 = vsub.s32 2147483648, %v3723_v8  ;;  %v261_v13 = vsel %vm253_vm3, %v3707_v3, %v257_v7  ;;  %vm1273_vm3 = vcmp.eq.s32.totalorder %v3699_v0, %v3771_v31 }
 0x194   :  { %v259_v15 = vsel %vm251_vm4, %v3714_v5, %v255_v9  ;;  %vm252_vm7 = vcmp.ge.s32.totalorder %v3732_v11, 0  ;;  %v256_v16 = vsub.s32 2147483648, %v3732_v11  ;;  %v265_v17 = vand.u32 4294967168, %v261_v13 }
 0x195   :  { %v263_v18 = vand.u32 4294967168, %v259_v15  ;;  %v262_v19 = vsel %vm254_vm6, %v3723_v8, %v258_v12  ;;  %vm1275_vm6 = vcmp.eq.s32.totalorder %v3699_v0, %v3788_v36  ;;  %v1771_v36 = vadd.s32 96, %v3705_v2 }
 0x196   :  { %v260_v21 = vsel %vm252_vm7, %v3732_v11, %v256_v16  ;;  %v266_v22 = vand.u32 4294967168, %v262_v19  ;;  %v270_v23 = vor.u32 %v3710_v4, %v265_v17 }
 0x197   :  { %v268_v25 = vor.u32 %v3710_v4, %v263_v18  ;;  %v264_v26 = vand.u32 4294967168, %v260_v21 }
 0x198   :  { %v3762_v28 = vpop.f32.mrb[4].mxu0  ;;  %v271_v29 = vor.u32 %v3710_v4, %v266_v22  ;;  %v3768_v30 = vsel %vm274_vm1, 2147483648, %v270_v23  ;;  %vm1272_vm1 = vcmp.eq.s32.totalorder %v3699_v0, %v3760_v27 }
 0x199   :  { %6425 = vst [vmem:[#allocation15_spill] sm:$0xff] %v3762_v28  ;;  %v3776_v33 = vpop.f32.mrb[5].mxu0  ;;  %v3781_v34 = vsel %vm272_vm2, 2147483648, %v268_v25  ;;  %v269_v35 = vor.u32 %v3710_v4, %v264_v26  ;;  %vm750_vm12 = vcmp.ge.s32.totalorder %v3762_v28, 0  ;;  %v309_v44 = vshra.s32 %v3768_v30, 16 }
 0x19a   :  { %6426 = vst [vmem:[#allocation16_spill] sm:$0xff] %v3776_v33  ;;  %v3790_v37 = vpop.f32.mrb[6].mxu0  ;;  %v281_v38 = vshra.s32 %v3781_v34, 16  ;;  %v3796_v39 = vsel %vm275_vm5, 2147483648, %v271_v29  ;;  %vm748_vm13 = vcmp.ge.s32.totalorder %v3776_v33, 0  ;;  %v752_v40 = vsub.s32 2147483648, %v3776_v33 }
 0x19b   :  { %6427 = vst [vmem:[#allocation17_spill] sm:$0xff] %v3790_v37  ;;  %v3802_v41 = vpop.f32.mrb[7].mxu0  ;;  %v3807_v42 = vsel %vm273_vm8, 2147483648, %v269_v35  ;;  %v323_v43 = vshra.s32 %v3796_v39, 16  ;;  %v754_v45 = vsub.s32 2147483648, %v3762_v28  ;;  %vm751_vm0 = vcmp.ge.s32.totalorder %v3790_v37, 0 }
 0x19c   :  { %6428 = vst [vmem:[#allocation18_spill] sm:$0xff] %v3802_v41  ;;  %v3812_v46 = vcvt.s32.f32 %v281_v38  ;;  %v295_v47 = vshra.s32 %v3807_v42, 16  ;;  %v756_v48 = vsel %vm748_vm13, %v3776_v33, %v752_v40  ;;  %vm749_vm15 = vcmp.ge.s32.totalorder %v3802_v41, 0 }
 0x19d   :  { %v760_v49 = vand.u32 4294967168, %v756_v48  ;;  %v753_v50 = vsub.s32 2147483648, %v3802_v41  ;;  %v758_v51 = vsel %vm750_vm12, %v3762_v28, %v754_v45  ;;  %v755_v55 = vsub.s32 2147483648, %v3790_v37 }
 0x19e   :  { %284 = vmax.xlane.f32.xlu0 %v3812_v46  ;;  %v3825_v53 = vcvt.s32.f32 %v295_v47  ;;  %v762_v54 = vand.u32 4294967168, %v758_v51  ;;  %v3829_v56 = vcvt.s32.f32 %v309_v44  ;;  %vm1274_vm2 = vcmp.eq.s32.totalorder %v3699_v0, %v3774_v32 }
 0x19f   :  { %v764_v57 = vor.u32 %v760_v49, %v3710_v4  ;;  %v757_v58 = vsel %vm749_vm15, %v3802_v41, %v753_v50  ;;  %v3843_v61 = vcvt.s32.f32 %v323_v43  ;;  %v759_v9 = vsel %vm751_vm0, %v3790_v37, %v755_v55 }
 0x1a0   :  { %298 = vmax.xlane.f32.xlu1 %v3825_v53  ;;  %v3841_v60 = vpop.f32.mrb[8].mxu0  ;;  %v761_v62 = vand.u32 4294967168, %v757_v58  ;;  %v766_v7 = vor.u32 %v762_v54, %v3710_v4  ;;  %v763_v13 = vand.u32 4294967168, %v759_v9  ;;  %v3895_v43 = vadd.s32 96, %v3719_v6 }
 0x1a1   :  { %6429 = vst [vmem:[#allocation19_spill] sm:$0xff] %v3841_v60  ;;  %v3849_v12 = vpop.f32.mrb[9].mxu0  ;;  %v3854_v1 = vsel %vm772_vm9, 2147483648, %v764_v57  ;;  %vm1250_vm4 = vcmp.ge.s32.totalorder %v3841_v60, 0  ;;  %v1254_v15 = vsub.s32 2147483648, %v3841_v60  ;;  %vm1772_vm9 = vcmp.eq.s32.totalorder %v3699_v0, %v3822_v52 }
 0x1a2   :  { %6430 = vst [vmem:[#allocation20_spill] sm:$0xff] %v3849_v12  ;;  %326 = vmax.xlane.f32.xlu0 %v3843_v61  ;;  %v3859_v16 = vpop.f32.mrb[10].mxu0  ;;  %v781_v17 = vshra.s32 %v3854_v1, 16  ;;  %v765_v18 = vor.u32 %v761_v62, %v3710_v4  ;;  %v3866_v19 = vsel %vm774_vm10, 2147483648, %v766_v7  ;;  %vm1248_vm5 = vcmp.ge.s32.totalorder %v3849_v12, 0 }
 0x1a3   :  { %6431 = vst [vmem:[#allocation21_spill] sm:$0xff] %v3859_v16  ;;  %v3869_v10 = vpop.f32.mrb[11].mxu0  ;;  %v809_v21 = vshra.s32 %v3866_v19, 16  ;;  %v767_v22 = vor.u32 %v763_v13, %v3710_v4  ;;  %v1252_v23 = vsub.s32 2147483648, %v3849_v12  ;;  %v1258_v25 = vsel %vm1250_vm4, %v3841_v60, %v1254_v15 }
 0x1a4   :  { %6432 = vst [vmem:[#allocation22_spill] sm:$0xff] %v3869_v10  ;;  %312 = vmax.xlane.f32.xlu1 %v3829_v56  ;;  %v3878_v14 = vcvt.s32.f32 %v781_v17  ;;  %v3883_v26 = vsel %vm773_vm11, 2147483648, %v765_v18  ;;  %vm1249_vm7 = vcmp.ge.s32.totalorder %v3869_v10, 0  ;;  %v1253_v29 = vsub.s32 2147483648, %v3869_v10 }
 0x1a5   :  { %v795_v35 = vshra.s32 %v3883_v26, 16  ;;  %v3891_v38 = vsel %vm775_vm14, 2147483648, %v767_v22  ;;  %v1256_v40 = vsel %vm1248_vm5, %v3849_v12, %v1252_v23  ;;  %v1262_v47 = vand.u32 4294967168, %v1258_v25 }
 0x1a6   :  { %v823_v20 = vshra.s32 %v3891_v38, 16  ;;  %v1260_v44 = vand.u32 4294967168, %v1256_v40  ;;  %v1257_v45 = vsel %vm1249_vm7, %v3869_v10, %v1253_v29  ;;  %vm1251_vm8 = vcmp.ge.s32.totalorder %v3859_v16, 0 }
 0x1a7   :  { %v3899_v48 = vcvt.s32.f32 %v795_v35  ;;  %v1261_v49 = vand.u32 4294967168, %v1257_v45  ;;  %v1255_v24 = vsub.s32 2147483648, %v3859_v16  ;;  %v3908_v51 = vcvt.s32.f32 %v809_v21 }
 0x1a8   :  { %784 = vmax.xlane.f32.xlu1 %v3878_v14  ;;  %v3906_v50 = vpop.f32.mrb[12].mxu0  ;;  %v3910_v54 = vcvt.s32.f32 %v823_v20  ;;  %v1264_v55 = vor.u32 %v1260_v44, %v3710_v4  ;;  %v1266_v57 = vor.u32 %v1262_v47, %v3710_v4  ;;  %vm1774_vm10 = vcmp.eq.s32.totalorder %v3699_v0, %v3838_v59 }
 0x1a9   :  { %6433 = vst [vmem:[#allocation23_spill] sm:$0xff] %v3906_v50  ;;  %798 = vmax.xlane.f32.xlu0 %v3899_v48  ;;  %v3917_v58 = vpop.f32.mrb[13].mxu0  ;;  %v1265_v62 = vor.u32 %v1261_v49, %v3710_v4  ;;  %v1259_v7 = vsel %vm1251_vm8, %v3859_v16, %v1255_v24  ;;  %vm1750_vm11 = vcmp.ge.s32.totalorder %v3906_v50, 0  ;;  %v1754_v9 = vsub.s32 2147483648, %v3906_v50 }
 0x1aa   :  { %6434 = vst [vmem:[#allocation24_spill] sm:$0xff] %v3917_v58  ;;  %v3923_v13 = vpop.f32.mrb[14].mxu0  ;;  %v3928_v15 = vsel %vm1272_vm1, 2147483648, %v1264_v55  ;;  %v3933_v17 = vsel %vm1274_vm2, 2147483648, %v1266_v57  ;;  %v1263_v18 = vand.u32 4294967168, %v1259_v7  ;;  %vm1748_vm12 = vcmp.ge.s32.totalorder %v3917_v58, 0 }
 0x1ab   :  { %6435 = vst [vmem:[#allocation25_spill] sm:$0xff] %v3923_v13  ;;  %v3936_v21 = vpop.f32.mrb[15].mxu0  ;;  %v1281_v22 = vshra.s32 %v3928_v15, 16  ;;  %v3942_v23 = vsel %vm1273_vm3, 2147483648, %v1265_v62  ;;  %v1309_v27 = vshra.s32 %v3933_v17, 16  ;;  %v1752_v25 = vsub.s32 2147483648, %v3917_v58 }
 0x1ac   :  { %6436 = vst [vmem:[#allocation26_spill] sm:$0xff] %v3936_v21  ;;  %812 = vmax.xlane.f32.xlu1 %v3908_v51  ;;  %v1295_v32 = vshra.s32 %v3942_v23, 16  ;;  %v1267_v29 = vor.u32 %v1263_v18, %v3710_v4  ;;  %vm1749_vm13 = vcmp.ge.s32.totalorder %v3936_v21, 0  ;;  %v1753_v35 = vsub.s32 2147483648, %v3936_v21 }
 0x1ad   :  { %826 = vmax.xlane.f32.xlu0 %v3910_v54  ;;  %v3952_v40 = vcvt.s32.f32 %v1281_v22  ;;  %v1756_v31 = vsel %vm1748_vm12, %v3917_v58, %v1752_v25  ;;  %vm1773_vm14 = vcmp.eq.s32.totalorder %v3699_v0, %v3895_v43  ;;  %v1758_v20 = vsel %vm1750_vm11, %v3906_v50, %v1754_v9 }
 0x1ae   :  { %v3960_v44 = vcvt.s32.f32 %v1295_v32  ;;  %v3965_v45 = vsel %vm1275_vm6, 2147483648, %v1267_v29  ;;  %v1760_v47 = vand.u32 4294967168, %v1756_v31  ;;  %v1757_v49 = vsel %vm1749_vm13, %v3936_v21, %v1753_v35 }
 0x1af   :  { %v1323_v24 = vshra.s32 %v3965_v45, 16  ;;  %v1761_v55 = vand.u32 4294967168, %v1757_v49  ;;  %v1762_v57 = vand.u32 4294967168, %v1758_v20  ;;  %vm1751_vm15 = vcmp.ge.s32.totalorder %v3923_v13, 0 }
 0x1b0   :  { %1284 = vmax.xlane.f32.xlu1 %v3952_v40  ;;  %v3971_v62 = vcvt.s32.f32 %v1309_v27  ;;  %v1764_v7 = vor.u32 %v1760_v47, %v3710_v4  ;;  %v1755_v9 = vsub.s32 2147483648, %v3923_v13  ;;  %vm1775_vm0 = vcmp.eq.s32.totalorder %v3699_v0, %v1771_v36 }
 0x1b1   :  { %1298 = vmax.xlane.f32.xlu0 %v3960_v44  ;;  %v3977_v18 = vcvt.s32.f32 %v1323_v24  ;;  %v1765_v22 = vor.u32 %v1761_v55, %v3710_v4  ;;  %v1766_v25 = vor.u32 %v1762_v57, %v3710_v4 }
 0x1b2   :  { %v3984_v32 = vsel %vm1772_vm9, 2147483648, %v1764_v7  ;;  %v1759_v27 = vsel %vm1751_vm15, %v3923_v13, %v1755_v9  ;;  %v294_v7 = vand.u32 65535, %v3807_v42 }
 0x1b3   :  { %v1781_v29 = vshra.s32 %v3984_v32, 16  ;;  %v3991_v2 = vsel %vm1773_vm14, 2147483648, %v1765_v22  ;;  %v3996_v35 = vsel %vm1774_vm10, 2147483648, %v1766_v25  ;;  %v1763_v31 = vand.u32 4294967168, %v1759_v27 }
 0x1b4   :  { %1312 = vmax.xlane.f32.xlu1 %v3971_v62  ;;  %v1795_v52 = vshra.s32 %v3991_v2, 16  ;;  %v1809_v49 = vshra.s32 %v3996_v35, 16  ;;  %v296_v27 = vcvt.s32.f32 %v294_v7  ;;  %v794_v7 = vand.u32 65535, %v3883_v26 }
 0x1b5   :  { %1326 = vmax.xlane.f32.xlu0 %v3977_v18  ;;  %v1767_v20 = vor.u32 %v1763_v31, %v3710_v4  ;;  %v4003_v47 = vcvt.s32.f32 %v1781_v29  ;;  %v280_v4 = vand.u32 65535, %v3781_v34  ;;  %v308_v29 = vand.u32 65535, %v3768_v30 }
 0x1b6   :  { %v4005_v43 = vcvt.s32.f32 %v1795_v52  ;;  %v4013_v55 = vcvt.s32.f32 %v1809_v49  ;;  %v322_v31 = vand.u32 65535, %v3796_v39 }
 0x1b7   :  { %v4008_v59 = vsel %vm1775_vm0, 2147483648, %v1767_v20  ;;  %v282_v36 = vcvt.s32.f32 %v280_v4  ;;  %v310_v49 = vcvt.s32.f32 %v308_v29  ;;  %v780_v4 = vand.u32 65535, %v3854_v1 }
 0x1b8   :  { %6437 = vst [vmem:[#allocation27_spill] sm:$0xff] %v4008_v59  ;;  %1784 = vmax.xlane.f32.xlu1 %v4003_v47  ;;  %v1823_v24 = vshra.s32 %v4008_v59, 16  ;;  %v796_v29 = vcvt.s32.f32 %v794_v7  ;;  %v1294_v7 = vand.u32 65535, %v3942_v23 }
 0x1b9   :  { %1798 = vmax.xlane.f32.xlu0 %v4005_v43 }
 0x1ba   :  { %v4015_v57 = vcvt.s32.f32 %v1823_v24  ;;  %v324_v24 = vcvt.s32.f32 %v322_v31  ;;  %v822_v31 = vand.u32 65535, %v3891_v38 }
 0x1bc   :  { %1812 = vmax.xlane.f32.xlu1 %v4013_v55 }
 0x1bd   :  { %1826 = vmax.xlane.f32.xlu0 %v4015_v57 }
 0x22b   :  { %v4021_v9 = vpop.xlane.xlu0 %284 }
 0x22c   :  { %vm286_vm1 = vcmp.eq.f32.partialorder %v3812_v46, %v4021_v9 }
 0x22d   :  { %v4025_v22 = vpop.xlane.xlu1 %298  ;;  %v287_v25 = vsel %vm286_vm1, %v282_v36, -inf }
 0x22e   :  { %288 = vmax.xlane.f32.xlu1 %v287_v25  ;;  %vm300_vm2 = vcmp.eq.f32.partialorder %v3825_v53, %v4025_v22 }
 0x22f   :  { %v4031_v52 = vpop.xlane.xlu0 %326  ;;  %v301_v20 = vsel %vm300_vm2, %v296_v27, -inf  ;;  %v782_v27 = vcvt.s32.f32 %v780_v4 }
 0x230   :  { %302 = vmax.xlane.f32.xlu0 %v301_v20  ;;  %vm328_vm3 = vcmp.eq.f32.partialorder %v3843_v61, %v4031_v52  ;;  %v808_v61 = vand.u32 65535, %v3866_v19 }
 0x231   :  { %v4035_v46 = vpop.xlane.xlu1 %312  ;;  %v329_v53 = vsel %vm328_vm3, %v324_v24, -inf }
 0x232   :  { %vm314_vm4 = vcmp.eq.f32.partialorder %v3829_v56, %v4035_v46  ;;  %v810_v4 = vcvt.s32.f32 %v808_v61 }
 0x233   :  { %v315_v36 = vsel %vm314_vm4, %v310_v49, -inf }
 0x234   :  { %316 = vmax.xlane.f32.xlu1 %v315_v36  ;;  %330 = vmax.xlane.f32.xlu0 %v329_v53  ;;  %v1280_v36 = vand.u32 65535, %v3928_v15 }
 0x235   :  { %v4041_v25 = vpop.xlane.xlu1 %784 }
 0x236   :  { %v4044_v20 = vpop.xlane.xlu0 %798  ;;  %vm786_vm5 = vcmp.eq.f32.partialorder %v3878_v14, %v4041_v25  ;;  %v824_v14 = vcvt.s32.f32 %v822_v31  ;;  %v1282_v61 = vcvt.s32.f32 %v1280_v36  ;;  %v1322_v31 = vand.u32 65535, %v3965_v45 }
 0x237   :  { %v787_v56 = vsel %vm786_vm5, %v782_v27, -inf  ;;  %vm800_vm6 = vcmp.eq.f32.partialorder %v3899_v48, %v4044_v20 }
 0x238   :  { %788 = vmax.xlane.f32.xlu1 %v787_v56  ;;  %v801_v49 = vsel %vm800_vm6, %v796_v29, -inf  ;;  %v1308_v56 = vand.u32 65535, %v3933_v17 }
 0x239   :  { %802 = vmax.xlane.f32.xlu0 %v801_v49  ;;  %v4051_v24 = vpop.xlane.xlu1 %812 }
 0x23a   :  { %v4054_v53 = vpop.xlane.xlu0 %826  ;;  %vm814_vm7 = vcmp.eq.f32.partialorder %v3908_v51, %v4051_v24  ;;  %v1296_v51 = vcvt.s32.f32 %v1294_v7  ;;  %v1310_v36 = vcvt.s32.f32 %v1308_v56  ;;  %v1794_v7 = vand.u32 65535, %v3991_v2 }
 0x23b   :  { %v815_v27 = vsel %vm814_vm7, %v810_v4, -inf  ;;  %vm828_vm8 = vcmp.eq.f32.partialorder %v3910_v54, %v4054_v53 }
 0x23c   :  { %816 = vmax.xlane.f32.xlu1 %v815_v27  ;;  %v829_v48 = vsel %vm828_vm8, %v824_v14, -inf  ;;  %v1780_v27 = vand.u32 65535, %v3984_v32 }
 0x23d   :  { %830 = vmax.xlane.f32.xlu0 %v829_v48  ;;  %v4061_v29 = vpop.xlane.xlu1 %1284 }
 0x23e   :  { %v4064_v49 = vpop.xlane.xlu0 %1298  ;;  %vm1286_vm9 = vcmp.eq.f32.partialorder %v3952_v40, %v4061_v29  ;;  %v1324_v40 = vcvt.s32.f32 %v1322_v31  ;;  %v1782_v56 = vcvt.s32.f32 %v1780_v27  ;;  %v1822_v31 = vand.u32 65535, %v4008_v59 }
 0x23f   :  { %v1287_v4 = vsel %vm1286_vm9, %v1282_v61, -inf  ;;  %vm1300_vm10 = vcmp.eq.f32.partialorder %v3960_v44, %v4064_v49 }
 0x240   :  { %1288 = vmax.xlane.f32.xlu1 %v1287_v4  ;;  %v1301_v54 = vsel %vm1300_vm10, %v1296_v51, -inf  ;;  %v1808_v4 = vand.u32 65535, %v3996_v35 }
 0x241   :  { %1302 = vmax.xlane.f32.xlu0 %v1301_v54  ;;  %v4071_v14 = vpop.xlane.xlu1 %1312 }
 0x242   :  { %v4074_v48 = vpop.xlane.xlu0 %1326  ;;  %vm1314_vm11 = vcmp.eq.f32.partialorder %v3971_v62, %v4071_v14  ;;  %v1796_v62 = vcvt.s32.f32 %v1794_v7  ;;  %v1810_v27 = vcvt.s32.f32 %v1808_v4  ;;  %v333_v4 = vcvt.f32.s32 %v4031_v52 }
 0x243   :  { %v1315_v61 = vsel %vm1314_vm11, %v1310_v36, -inf  ;;  %vm1328_vm12 = vcmp.eq.f32.partialorder %v3977_v18, %v4074_v48  ;;  %v1319_v52 = vcvt.f32.s32 %v4071_v14 }
 0x244   :  { %1316 = vmax.xlane.f32.xlu1 %v1315_v61  ;;  %v1329_v44 = vsel %vm1328_vm12, %v1324_v40, -inf }
 0x245   :  { %1330 = vmax.xlane.f32.xlu0 %v1329_v44  ;;  %v4081_v51 = vpop.xlane.xlu1 %1784  ;;  %v1824_v44 = vcvt.s32.f32 %v1822_v31  ;;  %v805_v31 = vcvt.f32.s32 %v4044_v20  ;;  %v4115_v14 = vshll.u32 %v1319_v52, 16 }
 0x246   :  { %v4084_v54 = vpop.xlane.xlu0 %1798  ;;  %vm1786_vm13 = vcmp.eq.f32.partialorder %v4003_v47, %v4081_v51 }
 0x247   :  { %v1787_v36 = vsel %vm1786_vm13, %v1782_v56, -inf  ;;  %vm1800_vm14 = vcmp.eq.f32.partialorder %v4005_v43, %v4084_v54  ;;  %v291_v43 = vcvt.f32.s32 %v4021_v9  ;;  %v305_v56 = vcvt.f32.s32 %v4025_v22 }
 0x248   :  { %1788 = vmax.xlane.f32.xlu1 %v1787_v36  ;;  %v1801_v18 = vsel %vm1800_vm14, %v1796_v62, -inf  ;;  %v1291_v22 = vcvt.f32.s32 %v4061_v29  ;;  %v806_v20 = vshll.u32 %v805_v31, 16 }
 0x249   :  { %1802 = vmax.xlane.f32.xlu0 %v1801_v18  ;;  %v4091_v40 = vpop.xlane.xlu1 %1812  ;;  %v292_v36 = vshll.u32 %v291_v43, 16  ;;  %v319_v18 = vcvt.f32.s32 %v4035_v46  ;;  %v1305_v43 = vcvt.f32.s32 %v4064_v49  ;;  %v334_v46 = vshll.u32 %v333_v4, 16 }
 0x24a   :  { %v4093_v61 = vpop.xlane.xlu0 %1826  ;;  %vm1814_vm15 = vcmp.eq.f32.partialorder %v4013_v55, %v4091_v40  ;;  %v791_v55 = vcvt.f32.s32 %v4041_v25  ;;  %v4111_v29 = vshll.u32 %v1291_v22, 16 }
 0x24b   :  { %v1815_v47 = vsel %vm1814_vm15, %v1810_v27, -inf  ;;  %vm1828_vm0 = vcmp.eq.f32.partialorder %v4015_v57, %v4093_v61  ;;  %v819_v57 = vcvt.f32.s32 %v4051_v24  ;;  %v1333_v24 = vcvt.f32.s32 %v4074_v48 }
 0x24c   :  { %1816 = vmax.xlane.f32.xlu1 %v1815_v47  ;;  %v1829_v7 = vsel %vm1828_vm0, %v1824_v44, -inf  ;;  %v306_v44 = vshll.u32 %v305_v56, 16  ;;  %v833_v47 = vcvt.f32.s32 %v4054_v53  ;;  %v792_v13 = vshll.u32 %v791_v55, 16 }
 0x24d   :  { %1830 = vmax.xlane.f32.xlu0 %v1829_v7  ;;  %v820_v59 = vshll.u32 %v819_v57, 16  ;;  %v4113_v49 = vshll.u32 %v1305_v43, 16  ;;  %v4118_v31 = vshll.u32 %v1333_v24, 16  ;;  %v1791_v48 = vcvt.f32.s32 %v4081_v51 }
 0x24e   :  { %v834_v53 = vshll.u32 %v833_v47, 16 }
 0x24f   :  { %v4139_v24 = vshll.u32 %v1791_v48, 16 }
 0x2bb   :  { %v289_v62 = vpop.xlane.xlu1 %288 }
 0x2bc   :  { %v290_v6 = vcvt.f32.s32 %v289_v62  ;;  %v320_v62 = vshll.u32 %v319_v18, 16 }
 0x2bd   :  { %v303_v27 = vpop.xlane.xlu0 %302 }
 0x2be   :  { %v293_v9 = vadd.s32 %v292_v36, %v290_v6  ;;  %v304_v7 = vcvt.f32.s32 %v303_v27 }
 0x2c0   :  { %v336_v63 = vand.u32 127, %v293_v9  ;;  %v307_v25 = vadd.s32 %v306_v44, %v304_v7  ;;  %vm348_vm1 = vcmp.gt.s32.totalorder %v293_v9, 2147483648  ;;  %v1819_v7 = vcvt.f32.s32 %v4091_v40 }
 0x2c1   :  { %v317_v56 = vpop.xlane.xlu1 %316  ;;  %v331_v50 = vpop.xlane.xlu0 %330 }
 0x2c2   :  { %v340_v6 = vsub.s32 127, %v336_v63  ;;  %v337_v36 = vand.u32 127, %v307_v25  ;;  %v318_v27 = vcvt.f32.s32 %v317_v56  ;;  %v332_v4 = vcvt.f32.s32 %v331_v50 }
 0x2c3   :  { %v1805_v63 = vcvt.f32.s32 %v4084_v54  ;;  %vm349_vm4 = vcmp.gt.s32.totalorder %v307_v25, 2147483648 }
 0x2c4   :  { %v341_v18 = vsub.s32 127, %v337_v36  ;;  %v321_v55 = vadd.s32 %v320_v62, %v318_v27  ;;  %vm344_vm2 = vcmp.eq.s32.totalorder %v3699_v0, %v340_v6  ;;  %v335_v57 = vadd.s32 %v334_v46, %v332_v4 }
 0x2c5   :  { %v789_v44 = vpop.xlane.xlu1 %788  ;;  %vm4122_vm3 = vmand %vm344_vm2, %vm348_vm1  ;;  %v4141_v56 = vshll.u32 %v1805_v63, 16 }
 0x2c6   :  { %v338_v50 = vand.u32 127, %v321_v55  ;;  %v790_v9 = vcvt.f32.s32 %v789_v44  ;;  %v803_v22 = vpop.xlane.xlu0 %802  ;;  %v339_v52 = vand.u32 127, %v335_v57  ;;  %v4133_v54 = vsel %vm4122_vm3, 2147483648, %v3781_v34 }
 0x2c7   :  { %v804_v51 = vcvt.f32.s32 %v803_v22  ;;  %v373_v40 = vshra.s32 %v4133_v54, 16  ;;  %vm345_vm5 = vcmp.eq.s32.totalorder %v3699_v0, %v341_v18  ;;  %v4149_v34 = vshll.u32 %v1819_v7, 16 }
 0x2c8   :  { %v342_v46 = vsub.s32 127, %v338_v50  ;;  %v4135_v62 = vadd.s32 %v792_v13, %v790_v9  ;;  %v343_v6 = vsub.s32 127, %v339_v52  ;;  %vm4145_vm6 = vmand %vm345_vm5, %vm349_vm4  ;;  %v1833_v13 = vcvt.f32.s32 %v4093_v61 }
 0x2c9   :  { %v4143_v25 = vadd.s32 %v806_v20, %v804_v51  ;;  %v817_v36 = vpop.xlane.xlu1 %816  ;;  %v4152_v50 = vcvt.s32.f32 %v373_v40  ;;  %vm350_vm7 = vcmp.gt.s32.totalorder %v321_v55, 2147483648  ;;  %v4163_v61 = vsel %vm4145_vm6, 2147483648, %v3807_v42 }
 0x2ca   :  { %v818_v4 = vcvt.f32.s32 %v817_v36  ;;  %v831_v44 = vpop.xlane.xlu0 %830  ;;  %v836_v18 = vand.u32 127, %v4135_v62  ;;  %vm346_vm8 = vcmp.eq.s32.totalorder %v3699_v0, %v342_v46  ;;  %vm351_vm9 = vcmp.gt.s32.totalorder %v335_v57, 2147483648 }
 0x2cb   :  { %v837_v48 = vand.u32 127, %v4143_v25  ;;  %v832_v63 = vcvt.f32.s32 %v831_v44  ;;  %376 = vmax.xlane.f32.xlu1 %v4152_v50  ;;  %v387_v52 = vshra.s32 %v4163_v61, 16  ;;  %vm4169_vm10 = vmand %vm346_vm8, %vm350_vm7  ;;  %vm347_vm11 = vcmp.eq.s32.totalorder %v3699_v0, %v343_v6 }
 0x2cc   :  { %v821_v9 = vadd.s32 %v820_v59, %v818_v4  ;;  %v4174_v59 = vshll.u32 %v1833_v13, 16  ;;  %vm4179_vm12 = vmand %vm347_vm11, %vm351_vm9  ;;  %v840_v46 = vsub.s32 127, %v836_v18  ;;  %vm848_vm13 = vcmp.gt.s32.totalorder %v4135_v62, 2147483648 }
 0x2cd   :  { %v4166_v7 = vadd.s32 %v834_v53, %v832_v63  ;;  %v1289_v22 = vpop.xlane.xlu1 %1288  ;;  %v841_v36 = vsub.s32 127, %v837_v48  ;;  %v4183_v44 = vcvt.s32.f32 %v387_v52  ;;  %v4192_v63 = vsel %vm4169_vm10, 2147483648, %v3768_v30 }
 0x2ce   :  { %v838_v55 = vand.u32 127, %v821_v9  ;;  %v1290_v40 = vcvt.f32.s32 %v1289_v22  ;;  %v1303_v42 = vpop.xlane.xlu0 %1302  ;;  %v401_v52 = vshra.s32 %v4192_v63, 16  ;;  %vm849_vm14 = vcmp.gt.s32.totalorder %v4143_v25, 2147483648 }
 0x2cf   :  { %v1304_v4 = vcvt.f32.s32 %v1303_v42  ;;  %v839_v6 = vand.u32 127, %v4166_v7  ;;  %390 = vmax.xlane.f32.xlu0 %v4183_v44  ;;  %vm850_vm15 = vcmp.gt.s32.totalorder %v821_v9, 2147483648  ;;  %vm851_vm0 = vcmp.gt.s32.totalorder %v4166_v7, 2147483648 }
 0x2d0   :  { %v4187_v13 = vadd.s32 %v4111_v29, %v1290_v40  ;;  %v842_v57 = vsub.s32 127, %v838_v55  ;;  %v4205_v29 = vsel %vm4179_vm12, 2147483648, %v3796_v39  ;;  %v4211_v42 = vcvt.s32.f32 %v401_v52 }
 0x2d1   :  { %v4198_v18 = vadd.s32 %v4113_v49, %v1304_v4  ;;  %v1317_v48 = vpop.xlane.xlu1 %1316  ;;  %v415_v55 = vshra.s32 %v4205_v29, 16  ;;  %vm844_vm1 = vcmp.eq.s32.totalorder %v3699_v0, %v840_v46  ;;  %v6446_v52 = vmov 0 }
 0x2d2   :  { %v1318_v30 = vcvt.f32.s32 %v1317_v48  ;;  %v1331_v40 = vpop.xlane.xlu0 %1330  ;;  %v1336_v49 = vand.u32 127, %v4187_v13  ;;  %v843_v48 = vsub.s32 127, %v839_v6  ;;  %404 = vmax.xlane.f32.xlu1 %v4211_v42  ;;  %vm4227_vm2 = vmand %vm844_vm1, %vm848_vm13  ;;  %vm845_vm4 = vcmp.eq.s32.totalorder %v3699_v0, %v841_v36 }
 0x2d3   :  { %v1332_v4 = vcvt.f32.s32 %v1331_v40  ;;  %v1337_v22 = vand.u32 127, %v4198_v18  ;;  %v4218_v20 = vcvt.s32.f32 %v415_v55  ;;  %v6447_v52 = vsel %vm4227_vm2, 4294967295, %v6446_v52  ;;  %vm4246_vm8 = vmand %vm845_vm4, %vm849_vm14 }
 0x2d4   :  { %v4216_v39 = vadd.s32 %v4115_v14, %v1318_v30  ;;  %6448 = vst [vmem:[#allocation28_spill] sm:$0xff] %v6447_v52  ;;  %vm846_vm5 = vcmp.eq.s32.totalorder %v3699_v0, %v842_v57  ;;  %vm1348_vm7 = vcmp.gt.s32.totalorder %v4187_v13, 2147483648  ;;  %v4242_v62 = vsel %vm4227_vm2, 2147483648, %v3854_v1 }
 0x2d5   :  { %v4223_v43 = vadd.s32 %v4118_v31, %v1332_v4  ;;  %v1789_v40 = vpop.xlane.xlu1 %1788  ;;  %418 = vmax.xlane.f32.xlu0 %v4218_v20  ;;  %v1340_v36 = vsub.s32 127, %v1336_v49  ;;  %v873_v30 = vshra.s32 %v4242_v62, 16  ;;  %vm4253_vm9 = vmand %vm846_vm5, %vm850_vm15  ;;  %v1341_v1 = vsub.s32 127, %v1337_v22 }
 0x2d6   :  { %v1338_v14 = vand.u32 127, %v4216_v39  ;;  %v1803_v57 = vpop.xlane.xlu0 %1802  ;;  %v1790_v55 = vcvt.f32.s32 %v1789_v40  ;;  %vm1349_vm11 = vcmp.gt.s32.totalorder %v4198_v18, 2147483648  ;;  %v4264_v49 = vsel %vm4246_vm8, 2147483648, %v3883_v26 }
 0x2d7   :  { %v1339_v6 = vand.u32 127, %v4223_v43  ;;  %v1804_v31 = vcvt.f32.s32 %v1803_v57  ;;  %vm1350_vm13 = vcmp.gt.s32.totalorder %v4216_v39, 2147483648  ;;  %v4267_v9 = vcvt.s32.f32 %v873_v30 }
 0x2d8   :  { %v1342_v33 = vsub.s32 127, %v1338_v14  ;;  %v1793_v40 = vadd.s32 %v4139_v24, %v1790_v55  ;;  %v887_v22 = vshra.s32 %v4264_v49, 16  ;;  %v4281_v14 = vsel %vm4253_vm9, 2147483648, %v3866_v19 }
 0x2d9   :  { %v1817_v52 = vpop.xlane.xlu1 %1816  ;;  %v4273_v25 = vadd.s32 %v4141_v56, %v1804_v31  ;;  %v1343_v24 = vsub.s32 127, %v1339_v6  ;;  %876 = vmax.xlane.f32.xlu1 %v4267_v9  ;;  %v901_v56 = vshra.s32 %v4281_v14, 16  ;;  %vm847_vm1 = vcmp.eq.s32.totalorder %v3699_v0, %v843_v48 }
 0x2da   :  { %v1818_v57 = vcvt.f32.s32 %v1817_v52  ;;  %v1831_v30 = vpop.xlane.xlu0 %1830  ;;  %v1836_v55 = vand.u32 127, %v1793_v40  ;;  %v4284_v41 = vcvt.s32.f32 %v887_v22  ;;  %vm4296_vm5 = vmand %vm847_vm1, %vm851_vm0  ;;  %vm1344_vm15 = vcmp.eq.s32.totalorder %v3699_v0, %v1340_v36 }
 0x2db   :  { %v1837_v31 = vand.u32 127, %v4273_v25  ;;  %v4292_v19 = vcvt.s32.f32 %v901_v56  ;;  %v1832_v6 = vcvt.f32.s32 %v1831_v30  ;;  %vm4306_vm4 = vmand %vm1344_vm15, %vm1348_vm7  ;;  %v4314_v7 = vsel %vm4296_vm5, 2147483648, %v3891_v38 }
 0x2dc   :  { %v1821_v26 = vadd.s32 %v4149_v34, %v1818_v57  ;;  %890 = vmax.xlane.f32.xlu0 %v4284_v41  ;;  %v1840_v22 = vsub.s32 127, %v1836_v55  ;;  %v6455_v57 = vmov 0  ;;  %v4323_v13 = vsel %vm4306_vm4, 2147483648, %v3928_v15 }
 0x2dd   :  { %v1841_v28 = vsub.s32 127, %v1837_v31  ;;  %v6456_v57 = vsel %vm4306_vm4, 4294967295, %v6455_v57  ;;  %904 = vmax.xlane.f32.xlu1 %v4292_v19  ;;  %v1835_v36 = vadd.s32 %v4174_v59, %v1832_v6  ;;  %v915_v55 = vshra.s32 %v4314_v7, 16 }
 0x2de   :  { %v1838_v34 = vand.u32 127, %v1821_v26  ;;  %v1373_v56 = vshra.s32 %v4323_v13, 16  ;;  %vm1345_vm7 = vcmp.eq.s32.totalorder %v3699_v0, %v1341_v1  ;;  %v6457_v59 = vmov 0 }
 0x2df   :  { %v1839_v31 = vand.u32 127, %v1835_v36  ;;  %vm4330_vm15 = vmand %vm1345_vm7, %vm1349_vm11  ;;  %vm1346_vm1 = vcmp.eq.s32.totalorder %v3699_v0, %v1342_v33  ;;  %vm1347_vm14 = vcmp.eq.s32.totalorder %v3699_v0, %v1343_v24  ;;  %v4336_v15 = vcvt.s32.f32 %v915_v55 }
 0x2e0   :  { %v1842_v38 = vsub.s32 127, %v1838_v34  ;;  %v6458_v59 = vsel %vm4330_vm15, 4294967295, %v6457_v59  ;;  %v4338_v6 = vcvt.s32.f32 %v1373_v56  ;;  %v4346_v18 = vsel %vm4330_vm15, 2147483648, %v3942_v23  ;;  %vm4350_vm11 = vmand %vm1346_vm1, %vm1350_vm13 }
 0x2e1   :  { %v6459_v34 = vmov 0  ;;  %v1843_v33 = vsub.s32 127, %v1839_v31  ;;  %v1387_v24 = vshra.s32 %v4346_v18, 16  ;;  %v4361_v56 = vsel %vm4350_vm11, 2147483648, %v3933_v17  ;;  %918 = vmax.xlane.f32.xlu0 %v4336_v15 }
 0x2e2   :  { %v6460_v34 = vsel %vm4350_vm11, 4294967295, %v6459_v34  ;;  %vm6461_vm7 = vcmp.gt.s32.totalorder %v4223_v43, 2147483648  ;;  %v6462_v23 = vmov 0  ;;  %1376 = vmax.xlane.f32.xlu1 %v4338_v6  ;;  %v1401_v39 = vshra.s32 %v4361_v56, 16 }
 0x2e3   :  { %vm4365_vm0 = vmand %vm1347_vm14, %vm6461_vm7  ;;  %vm1844_vm13 = vcmp.eq.s32.totalorder %v3699_v0, %v1840_v22  ;;  %v4381_v43 = vcvt.s32.f32 %v1387_v24  ;;  %vm6465_vm14 = vcmp.gt.s32.totalorder %v1793_v40, 2147483648  ;;  %v6466_v1 = vmov 0  ;;  %v6482_v22 = vld [vmem:[#allocation27_spill] sm:$0xff] }
 0x2e4   :  { %v6463_v23 = vsel %vm4365_vm0, 4294967295, %v6462_v23  ;;  %v4378_v17 = vsel %vm4365_vm0, 2147483648, %v3965_v45  ;;  %vm4385_vm1 = vmand %vm1844_vm13, %vm6465_vm14  ;;  %vm1845_vm7 = vcmp.eq.s32.totalorder %v3699_v0, %v1841_v28  ;;  %vm1846_vm11 = vcmp.eq.s32.totalorder %v3699_v0, %v1842_v38 }
 0x2e5   :  { %6464 = vst [vmem:[#allocation29_spill] sm:$0xff] %v6463_v23  ;;  %v1415_v55 = vshra.s32 %v4378_v17, 16  ;;  %v6467_v1 = vsel %vm4385_vm1, 4294967295, %v6466_v1  ;;  %v4391_v31 = vcvt.s32.f32 %v1401_v39  ;;  %v4396_v45 = vsel %vm4385_vm1, 2147483648, %v3984_v32  ;;  %1390 = vmax.xlane.f32.xlu0 %v4381_v43 }
 0x2e6   :  { %6468 = vst [vmem:[#allocation30_spill] sm:$0xff] %v6467_v1  ;;  %vm6469_vm13 = vcmp.gt.s32.totalorder %v4273_v25, 2147483648  ;;  %v6470_v40 = vmov 0  ;;  %vm1847_vm0 = vcmp.eq.s32.totalorder %v3699_v0, %v1843_v33  ;;  %vm1851_vm15 = vcmp.gt.s32.totalorder %v1835_v36, 2147483648 }
 0x2e7   :  { %vm4403_vm14 = vmand %vm1845_vm7, %vm6469_vm13  ;;  %v1873_v28 = vshra.s32 %v4396_v45, 16  ;;  %vm6473_vm1 = vcmp.gt.s32.totalorder %v1821_v26, 2147483648  ;;  %v6474_v25 = vmov 0  ;;  %1404 = vmax.xlane.f32.xlu1 %v4391_v31  ;;  %v4424_v36 = vcvt.s32.f32 %v1415_v55 }
 0x2e8   :  { %v6471_v40 = vsel %vm4403_vm14, 4294967295, %v6470_v40  ;;  %v4412_v32 = vsel %vm4403_vm14, 2147483648, %v3991_v2  ;;  %vm4418_vm4 = vmand %vm1846_vm11, %vm6473_vm1  ;;  %v6479_v39 = vmov 0  ;;  %v900_v16 = vand.u32 65535, %v4281_v14 }
 0x2e9   :  { %6472 = vst [vmem:[#allocation31_spill] sm:$0xff] %v6471_v40  ;;  %v6475_v25 = vsel %vm4418_vm4, 4294967295, %v6474_v25  ;;  %v1887_v33 = vshra.s32 %v4412_v32, 16  ;;  %v4430_v2 = vsel %vm4418_vm4, 2147483648, %v3996_v35  ;;  %vm4435_vm11 = vmand %vm1847_vm0, %vm1851_vm15  ;;  %v4439_v38 = vcvt.s32.f32 %v1873_v28  ;;  %1418 = vmax.xlane.f32.xlu0 %v4424_v36 }
 0x2ea   :  { %6476 = vst [vmem:[#allocation32_spill] sm:$0xff] %v6475_v25  ;;  %6477 = vst [vmem:[#allocation33_spill] sm:$0xff] %v4430_v2  ;;  %v6480_v39 = vsel %vm4435_vm11, 4294967295, %v6479_v39  ;;  %v1901_v55 = vshra.s32 %v4430_v2, 16  ;;  %v4445_v30 = vsel %vm4435_vm11, 2147483648, %v6482_v22  ;;  %v372_v35 = vand.u32 65535, %v4133_v54 }
 0x2eb   :  { %6481 = vst [vmem:[#allocation34_spill] sm:$0xff] %v6480_v39  ;;  %6483 = vst [vmem:[#allocation27_spill] sm:$0xff] %v4445_v30  ;;  %1876 = vmax.xlane.f32.xlu1 %v4439_v38  ;;  %v4452_v26 = vcvt.s32.f32 %v1887_v33  ;;  %v1915_v28 = vshra.s32 %v4445_v30, 16  ;;  %v386_v33 = vand.u32 65535, %v4163_v61  ;;  %v414_v40 = vand.u32 65535, %v4205_v29 }
 0x2ec   :  { %v4454_v24 = vcvt.s32.f32 %v1901_v55  ;;  %v374_v39 = vcvt.s32.f32 %v372_v35  ;;  %v1414_v23 = vand.u32 65535, %v4378_v17  ;;  %v1872_v60 = vand.u32 65535, %v4396_v45 }
 0x2ed   :  { %1890 = vmax.xlane.f32.xlu0 %v4452_v26  ;;  %v4459_v22 = vcvt.s32.f32 %v1915_v28  ;;  %v388_v21 = vcvt.s32.f32 %v386_v33  ;;  %v400_v28 = vand.u32 65535, %v4192_v63  ;;  %v872_v33 = vand.u32 65535, %v4242_v62 }
 0x2ef   :  { %1904 = vmax.xlane.f32.xlu1 %v4454_v24  ;;  %v402_v1 = vcvt.s32.f32 %v400_v28  ;;  %v874_v28 = vcvt.s32.f32 %v872_v33  ;;  %v914_v33 = vand.u32 65535, %v4314_v7 }
 0x2f1   :  { %1918 = vmax.xlane.f32.xlu0 %v4459_v22 }
 0x358   :  { %v4463_v48 = vpop.xlane.xlu1 %376 }
 0x359   :  { %vm378_vm0 = vcmp.eq.f32.partialorder %v4152_v50, %v4463_v48 }
 0x35a   :  { %v379_v55 = vsel %vm378_vm0, %v374_v39, -inf  ;;  %v416_v39 = vcvt.s32.f32 %v414_v40 }
 0x35b   :  { %380 = vmax.xlane.f32.xlu1 %v379_v55 }
 0x35c   :  { %v4468_v25 = vpop.xlane.xlu0 %390 }
 0x35d   :  { %vm392_vm15 = vcmp.eq.f32.partialorder %v4183_v44, %v4468_v25 }
 0x35e   :  { %v393_v58 = vsel %vm392_vm15, %v388_v21, -inf }
 0x35f   :  { %394 = vmax.xlane.f32.xlu0 %v393_v58  ;;  %v4474_v35 = vpop.xlane.xlu1 %404  ;;  %v886_v58 = vand.u32 65535, %v4264_v49 }
 0x360   :  { %vm406_vm1 = vcmp.eq.f32.partialorder %v4211_v42, %v4474_v35 }
 0x361   :  { %v407_v55 = vsel %vm406_vm1, %v402_v1, -inf  ;;  %v888_v40 = vcvt.s32.f32 %v886_v58  ;;  %v916_v58 = vcvt.s32.f32 %v914_v33 }
 0x362   :  { %v4476_v50 = vpop.xlane.xlu0 %418  ;;  %408 = vmax.xlane.f32.xlu1 %v407_v55  ;;  %v902_v55 = vcvt.s32.f32 %v900_v16  ;;  %v1400_v16 = vand.u32 65535, %v4361_v56 }
 0x363   :  { %vm420_vm7 = vcmp.eq.f32.partialorder %v4218_v20, %v4476_v50 }
 0x364   :  { %v421_v44 = vsel %vm420_vm7, %v416_v39, -inf }
 0x365   :  { %422 = vmax.xlane.f32.xlu0 %v421_v44 }
 0x366   :  { %v4484_v21 = vpop.xlane.xlu1 %876 }
 0x367   :  { %vm878_vm13 = vcmp.eq.f32.partialorder %v4267_v9, %v4484_v21  ;;  %v1372_v9 = vand.u32 65535, %v4323_v13 }
 0x368   :  { %v879_v1 = vsel %vm878_vm13, %v874_v28, -inf }
 0x369   :  { %v4489_v42 = vpop.xlane.xlu0 %890  ;;  %880 = vmax.xlane.f32.xlu1 %v879_v1 }
 0x36a   :  { %vm892_vm0 = vcmp.eq.f32.partialorder %v4284_v41, %v4489_v42  ;;  %v4493_v39 = vpop.xlane.xlu1 %904  ;;  %v1374_v41 = vcvt.s32.f32 %v1372_v9  ;;  %v1402_v9 = vcvt.s32.f32 %v1400_v16  ;;  %v1874_v16 = vcvt.s32.f32 %v1872_v60 }
 0x36b   :  { %v893_v20 = vsel %vm892_vm0, %v888_v40, -inf  ;;  %vm906_vm15 = vcmp.eq.f32.partialorder %v4292_v19, %v4493_v39  ;;  %v1386_v40 = vand.u32 65535, %v4346_v18 }
 0x36c   :  { %894 = vmax.xlane.f32.xlu0 %v893_v20  ;;  %v907_v44 = vsel %vm906_vm15, %v902_v55, -inf }
 0x36d   :  { %908 = vmax.xlane.f32.xlu1 %v907_v44  ;;  %v1388_v33 = vcvt.s32.f32 %v1386_v40 }
 0x36e   :  { %v4499_v28 = vpop.xlane.xlu0 %918 }
 0x36f   :  { %v4501_v1 = vpop.xlane.xlu1 %1376  ;;  %vm920_vm1 = vcmp.eq.f32.partialorder %v4336_v15, %v4499_v28 }
 0x370   :  { %vm1378_vm7 = vcmp.eq.f32.partialorder %v4338_v6, %v4501_v1  ;;  %v921_v19 = vsel %vm920_vm1, %v916_v58, -inf }
 0x371   :  { %v1379_v20 = vsel %vm1378_vm7, %v1374_v41, -inf  ;;  %922 = vmax.xlane.f32.xlu0 %v921_v19  ;;  %v1416_v41 = vcvt.s32.f32 %v1414_v23  ;;  %v1886_v19 = vand.u32 65535, %v4412_v32 }
 0x372   :  { %1380 = vmax.xlane.f32.xlu1 %v1379_v20  ;;  %v4509_v55 = vpop.xlane.xlu0 %1390  ;;  %v1900_v20 = vand.u32 65535, %v4430_v2 }
 0x373   :  { %vm1392_vm13 = vcmp.eq.f32.partialorder %v4381_v43, %v4509_v55  ;;  %v1888_v23 = vcvt.s32.f32 %v1886_v19  ;;  %v383_v19 = vcvt.f32.s32 %v4463_v48 }
 0x374   :  { %v4511_v44 = vpop.xlane.xlu1 %1404  ;;  %v1393_v15 = vsel %vm1392_vm13, %v1388_v33, -inf  ;;  %v1902_v60 = vcvt.s32.f32 %v1900_v20 }
 0x375   :  { %vm1406_vm0 = vcmp.eq.f32.partialorder %v4391_v31, %v4511_v44  ;;  %1394 = vmax.xlane.f32.xlu0 %v1393_v15  ;;  %v1914_v15 = vand.u32 65535, %v4445_v30 }
 0x376   :  { %v1407_v6 = vsel %vm1406_vm0, %v1402_v9, -inf  ;;  %v4519_v58 = vpop.xlane.xlu0 %1418 }
 0x377   :  { %1408 = vmax.xlane.f32.xlu1 %v1407_v6  ;;  %vm1420_vm15 = vcmp.eq.f32.partialorder %v4424_v36, %v4519_v58 }
 0x378   :  { %v4521_v40 = vpop.xlane.xlu1 %1876  ;;  %v1421_v31 = vsel %vm1420_vm15, %v1416_v41, -inf  ;;  %v1916_v41 = vcvt.s32.f32 %v1914_v15 }
 0x379   :  { %vm1878_vm1 = vcmp.eq.f32.partialorder %v4439_v38, %v4521_v40  ;;  %1422 = vmax.xlane.f32.xlu0 %v1421_v31  ;;  %v384_v31 = vshll.u32 %v383_v19, 16  ;;  %v911_v19 = vcvt.f32.s32 %v4493_v39 }
 0x37a   :  { %v1879_v43 = vsel %vm1878_vm1, %v1874_v16, -inf  ;;  %v4529_v33 = vpop.xlane.xlu0 %1890 }
 0x37b   :  { %1880 = vmax.xlane.f32.xlu1 %v1879_v43  ;;  %vm1892_vm7 = vcmp.eq.f32.partialorder %v4452_v26, %v4529_v33  ;;  %v397_v43 = vcvt.f32.s32 %v4468_v25  ;;  %v1897_v27 = vcvt.f32.s32 %v4529_v33  ;;  %v6487_v33 = vsel %vm4169_vm10, %v3707_v3, 0.0 }
 0x37c   :  { %v4531_v9 = vpop.xlane.xlu1 %1904  ;;  %v1893_v36 = vsel %vm1892_vm7, %v1888_v23, -inf  ;;  %v411_v23 = vcvt.f32.s32 %v4474_v35 }
 0x37d   :  { %vm1906_vm13 = vcmp.eq.f32.partialorder %v4454_v24, %v4531_v9  ;;  %1894 = vmax.xlane.f32.xlu0 %v1893_v36  ;;  %v883_v36 = vcvt.f32.s32 %v4484_v21  ;;  %v398_v30 = vshll.u32 %v397_v43, 16  ;;  %v1383_v21 = vcvt.f32.s32 %v4501_v1 }
 0x37e   :  { %v1907_v38 = vsel %vm1906_vm13, %v1902_v60, -inf  ;;  %v4538_v6 = vpop.xlane.xlu0 %1918  ;;  %v425_v60 = vcvt.f32.s32 %v4476_v50  ;;  %v412_v48 = vshll.u32 %v411_v23, 16  ;;  %v1397_v23 = vcvt.f32.s32 %v4509_v55 }
 0x37f   :  { %1908 = vmax.xlane.f32.xlu1 %v1907_v38  ;;  %vm1920_vm0 = vcmp.eq.f32.partialorder %v4459_v22, %v4538_v6  ;;  %v897_v22 = vcvt.f32.s32 %v4489_v42  ;;  %v884_v25 = vshll.u32 %v883_v36, 16  ;;  %v1411_v55 = vcvt.f32.s32 %v4511_v44 }
 0x380   :  { %v1921_v16 = vsel %vm1920_vm0, %v1916_v41, -inf  ;;  %v426_v2 = vshll.u32 %v425_v60, 16  ;;  %v6486_v44 = vsel %vm4145_vm6, %v3732_v11, 0.0 }
 0x381   :  { %1922 = vmax.xlane.f32.xlu0 %v1921_v16  ;;  %v898_v50 = vshll.u32 %v897_v22, 16  ;;  %v1425_v22 = vcvt.f32.s32 %v4519_v58 }
 0x3e8   :  { %v381_v20 = vpop.xlane.xlu1 %380 }
 0x3e9   :  { %v382_v26 = vcvt.f32.s32 %v381_v20 }
 0x3eb   :  { %v385_v24 = vadd.s32 %v384_v31, %v382_v26  ;;  %v925_v31 = vcvt.f32.s32 %v4499_v28 }
 0x3ec   :  { %v395_v38 = vpop.xlane.xlu0 %394 }
 0x3ed   :  { %v428_v15 = vand.u32 127, %v385_v24  ;;  %v396_v41 = vcvt.f32.s32 %v395_v38  ;;  %vm440_vm15 = vcmp.gt.s32.totalorder %v385_v24, 2147483648  ;;  %v912_v24 = vshll.u32 %v911_v19, 16 }
 0x3ee   :  { %v4564_v38 = vshll.u32 %v925_v31, 16 }
 0x3ef   :  { %v432_v16 = vsub.s32 127, %v428_v15  ;;  %v399_v20 = vadd.s32 %v398_v30, %v396_v41  ;;  %v409_v35 = vpop.xlane.xlu1 %408  ;;  %v6485_v30 = vsel %vm4122_vm3, %v3714_v5, 0.0 }
 0x3f0   :  { %v410_v43 = vcvt.f32.s32 %v409_v35  ;;  %v4571_v35 = vshll.u32 %v1397_v23, 16 }
 0x3f1   :  { %vm436_vm1 = vcmp.eq.s32.totalorder %v3699_v0, %v432_v16  ;;  %v429_v26 = vand.u32 127, %v399_v20  ;;  %vm441_vm13 = vcmp.gt.s32.totalorder %v399_v20, 2147483648  ;;  %v1384_v16 = vshll.u32 %v1383_v21, 16 }
 0x3f2   :  { %v423_v42 = vpop.xlane.xlu0 %422  ;;  %vm452_vm7 = vmand %vm436_vm1, %vm440_vm15  ;;  %v413_v1 = vadd.s32 %v412_v48, %v410_v43  ;;  %v1883_v48 = vcvt.f32.s32 %v4521_v40  ;;  %v4585_v20 = vshll.u32 %v1411_v55, 16  ;;  %v4587_v40 = vshll.u32 %v1425_v22, 16 }
 0x3f3   :  { %v424_v60 = vcvt.f32.s32 %v423_v42  ;;  %v4554_v39 = vsel %vm452_vm7, 2147483648, %v4133_v54  ;;  %v4561_v28 = vsel %vm452_vm7, %v3714_v5, %v6485_v30  ;;  %v433_v36 = vsub.s32 127, %v429_v26 }
 0x3f4   :  { %v465_v15 = vshra.s32 %v4554_v39, 16  ;;  %v430_v41 = vand.u32 127, %v413_v1  ;;  %vm442_vm15 = vcmp.gt.s32.totalorder %v413_v1, 2147483648 }
 0x3f5   :  { %v427_v54 = vadd.s32 %v426_v2, %v424_v60  ;;  %vm437_vm3 = vcmp.eq.s32.totalorder %v3699_v0, %v433_v36 }
 0x3f6   :  { %v4568_v47 = vcvt.s32.f32 %v465_v15  ;;  %v881_v26 = vpop.xlane.xlu1 %880  ;;  %vm453_vm0 = vmand %vm437_vm3, %vm441_vm13  ;;  %v434_v31 = vsub.s32 127, %v430_v41  ;;  %v4595_v15 = vshll.u32 %v1883_v48, 16 }
 0x3f7   :  { %v431_v19 = vand.u32 127, %v427_v54  ;;  %v882_v43 = vcvt.f32.s32 %v881_v26  ;;  %v4576_v2 = vsel %vm453_vm0, 2147483648, %v4163_v61  ;;  %v4583_v58 = vsel %vm453_vm0, %v3732_v11, %v6486_v44 }
 0x3f8   :  { %468 = vmax.xlane.f32.xlu1 %v4568_v47  ;;  %v479_v23 = vshra.s32 %v4576_v2, 16  ;;  %vm438_vm1 = vcmp.eq.s32.totalorder %v3699_v0, %v434_v31  ;;  %vm443_vm7 = vcmp.gt.s32.totalorder %v427_v54, 2147483648  ;;  %v4619_v31 = vshll.u32 %v1897_v27, 16 }
 0x3f9   :  { %v435_v21 = vsub.s32 127, %v431_v19  ;;  %v895_v42 = vpop.xlane.xlu0 %894  ;;  %v885_v60 = vadd.s32 %v884_v25, %v882_v43  ;;  %vm454_vm6 = vmand %vm438_vm1, %vm442_vm15 }
 0x3fa   :  { %v896_v30 = vcvt.f32.s32 %v895_v42  ;;  %v909_v61 = vpop.xlane.xlu1 %908  ;;  %v4592_v36 = vcvt.s32.f32 %v479_v23  ;;  %v4599_v25 = vsel %vm454_vm6, 2147483648, %v4192_v63  ;;  %v4606_v1 = vsel %vm454_vm6, %v3707_v3, %v6487_v33 }
 0x3fb   :  { %vm439_vm13 = vcmp.eq.s32.totalorder %v3699_v0, %v435_v21  ;;  %v928_v55 = vand.u32 127, %v885_v60  ;;  %v910_v41 = vcvt.f32.s32 %v909_v61  ;;  %v1911_v63 = vcvt.f32.s32 %v4531_v9 }
 0x3fc   :  { %v899_v22 = vadd.s32 %v898_v50, %v896_v30  ;;  %vm455_vm3 = vmand %vm439_vm13, %vm443_vm7  ;;  %482 = vmax.xlane.f32.xlu0 %v4592_v36  ;;  %v6488_v50 = vsel %vm4179_vm12, %v3723_v8, 0.0  ;;  %vm940_vm10 = vcmp.gt.s32.totalorder %v885_v60, 2147483648  ;;  %v493_v43 = vshra.s32 %v4599_v25, 16 }
 0x3fd   :  { %v4609_v54 = vsel %vm455_vm3, 2147483648, %v4205_v29  ;;  %v4616_v48 = vsel %vm455_vm3, %v3723_v8, %v6488_v50  ;;  %v932_v19 = vsub.s32 127, %v928_v55  ;;  %v913_v51 = vadd.s32 %v912_v24, %v910_v41  ;;  %v6490_v55 = vld [vmem:[#allocation16_spill] sm:$0xff] }
 0x3fe   :  { %v929_v26 = vand.u32 127, %v899_v22  ;;  %v507_v29 = vshra.s32 %v4609_v54, 16  ;;  %vm941_vm0 = vcmp.gt.s32.totalorder %v899_v22, 2147483648  ;;  %v923_v21 = vpop.xlane.xlu0 %922  ;;  %v4624_v9 = vcvt.s32.f32 %v493_v43 }
 0x3ff   :  { %v930_v53 = vand.u32 127, %v913_v51  ;;  %v1381_v42 = vpop.xlane.xlu1 %1380  ;;  %vm936_vm12 = vcmp.eq.s32.totalorder %v3699_v0, %v932_v19  ;;  %v924_v23 = vcvt.f32.s32 %v923_v21  ;;  %v6491_v41 = vsel %vm4227_vm2, %v6490_v55, 0.0 }
 0x400   :  { %v933_v44 = vsub.s32 127, %v929_v26  ;;  %v1382_v30 = vcvt.f32.s32 %v1381_v42  ;;  %v4626_v61 = vcvt.s32.f32 %v507_v29  ;;  %vm952_vm15 = vmand %vm936_vm12, %vm940_vm10  ;;  %v4639_v50 = vshll.u32 %v1911_v63, 16  ;;  %496 = vmax.xlane.f32.xlu1 %v4624_v9  ;;  %v6493_v63 = vld [vmem:[#allocation18_spill] sm:$0xff] }
 0x401   :  { %v934_v24 = vsub.s32 127, %v930_v53  ;;  %v4629_v60 = vsel %vm952_vm15, 2147483648, %v4242_v62  ;;  %v4636_v33 = vsel %vm952_vm15, %v6490_v55, %v6491_v41  ;;  %v927_v19 = vadd.s32 %v4564_v38, %v924_v23 }
 0x402   :  { %6492 = vst [vmem:[#allocation28_spill] sm:$0xff] %v4636_v33  ;;  %vm937_vm1 = vcmp.eq.s32.totalorder %v3699_v0, %v933_v44  ;;  %v1385_v26 = vadd.s32 %v1384_v16, %v1382_v30  ;;  %510 = vmax.xlane.f32.xlu0 %v4626_v61  ;;  %v965_v62 = vshra.s32 %v4629_v60, 16  ;;  %vm942_vm6 = vcmp.gt.s32.totalorder %v913_v51, 2147483648  ;;  %v1395_v43 = vpop.xlane.xlu0 %1394 }
 0x403   :  { %vm953_vm7 = vmand %vm937_vm1, %vm941_vm0  ;;  %v6494_v44 = vsel %vm4246_vm8, %v6493_v63, 0.0  ;;  %vm938_vm2 = vcmp.eq.s32.totalorder %v3699_v0, %v934_v24  ;;  %v1925_v16 = vcvt.f32.s32 %v4538_v6  ;;  %v931_v21 = vand.u32 127, %v927_v19  ;;  %v6496_v24 = vld [vmem:[#allocation15_spill] sm:$0xff] }
 0x404   :  { %v1409_v29 = vpop.xlane.xlu1 %1408  ;;  %v4647_v53 = vsel %vm953_vm7, 2147483648, %v4264_v49  ;;  %v4654_v38 = vsel %vm953_vm7, %v6493_v63, %v6494_v44  ;;  %vm943_vm13 = vcmp.gt.s32.totalorder %v927_v19, 2147483648  ;;  %v1428_v22 = vand.u32 127, %v1385_v26  ;;  %vm954_vm3 = vmand %vm938_vm2, %vm942_vm6 }
 0x405   :  { %6495 = vst [vmem:[#allocation35_spill] sm:$0xff] %v4654_v38  ;;  %v1396_v51 = vcvt.f32.s32 %v1395_v43  ;;  %v1410_v42 = vcvt.f32.s32 %v1409_v29  ;;  %v4658_v23 = vcvt.s32.f32 %v965_v62  ;;  %v979_v49 = vshra.s32 %v4647_v53, 16 }
 0x406   :  { %v935_v46 = vsub.s32 127, %v931_v21  ;;  %v1432_v30 = vsub.s32 127, %v1428_v22  ;;  %v4662_v27 = vsel %vm954_vm3, 2147483648, %v4281_v14  ;;  %v6497_v41 = vsel %vm4253_vm9, %v6496_v24, 0.0  ;;  %v1423_v62 = vpop.xlane.xlu0 %1422 }
 0x407   :  { %v4669_v6 = vsel %vm954_vm3, %v6496_v24, %v6497_v41  ;;  %v1399_v44 = vadd.s32 %v4571_v35, %v1396_v51  ;;  %v1413_v43 = vadd.s32 %v4585_v20, %v1410_v42  ;;  %968 = vmax.xlane.f32.xlu1 %v4658_v23  ;;  %v4674_v21 = vcvt.s32.f32 %v979_v49 }
 0x408   :  { %v1881_v29 = vpop.xlane.xlu1 %1880  ;;  %v993_v14 = vshra.s32 %v4662_v27, 16  ;;  %v1424_v22 = vcvt.f32.s32 %v1423_v62  ;;  %vm939_vm8 = vcmp.eq.s32.totalorder %v3699_v0, %v935_v46  ;;  %vm1436_vm9 = vcmp.eq.s32.totalorder %v3699_v0, %v1432_v30 }
 0x409   :  { %v1882_v55 = vcvt.f32.s32 %v1881_v29  ;;  %v1926_v4 = vshll.u32 %v1925_v16, 16  ;;  %vm1440_vm10 = vcmp.gt.s32.totalorder %v1385_v26, 2147483648  ;;  %v1429_v41 = vand.u32 127, %v1399_v44  ;;  %982 = vmax.xlane.f32.xlu0 %v4674_v21  ;;  %vm955_vm0 = vmand %vm939_vm8, %vm943_vm13 }
 0x40a   :  { %v1430_v35 = vand.u32 127, %v1413_v43  ;;  %v1427_v20 = vadd.s32 %v4587_v40, %v1424_v22  ;;  %v4683_v42 = vcvt.s32.f32 %v993_v14  ;;  %v4686_v49 = vsel %vm955_vm0, 2147483648, %v4314_v7  ;;  %vm4688_vm12 = vmand %vm1436_vm9, %vm1440_vm10  ;;  %v1895_v30 = vpop.xlane.xlu0 %1894 }
 0x40b   :  { %v1885_v51 = vadd.s32 %v4595_v15, %v1882_v55  ;;  %v1433_v26 = vsub.s32 127, %v1429_v41  ;;  %v1007_v19 = vshra.s32 %v4686_v49, 16  ;;  %v6500_v40 = vsel %vm4296_vm5, %v3790_v37, 0.0 }
 0x40c   :  { %v1434_v16 = vsub.s32 127, %v1430_v35  ;;  %v1909_v62 = vpop.xlane.xlu1 %1908  ;;  %v4698_v15 = vsel %vm955_vm0, %v3790_v37, %v6500_v40  ;;  %vm1441_vm15 = vcmp.gt.s32.totalorder %v1399_v44, 2147483648  ;;  %vm1442_vm1 = vcmp.gt.s32.totalorder %v1413_v43, 2147483648  ;;  %996 = vmax.xlane.f32.xlu1 %v4683_v42 }
 0x40d   :  { %6501 = vst [vmem:[#allocation15_spill] sm:$0xff] %v4698_v15  ;;  %v1431_v7 = vand.u32 127, %v1427_v20  ;;  %v1928_v55 = vand.u32 127, %v1885_v51  ;;  %v1896_v29 = vcvt.f32.s32 %v1895_v30  ;;  %v1910_v14 = vcvt.f32.s32 %v1909_v62 }
 0x40e   :  { %v4701_v22 = vcvt.s32.f32 %v1007_v19  ;;  %v4706_v41 = vsel %vm4688_vm12, 2147483648, %v4323_v13  ;;  %vm6502_vm5 = vnez %v6456_v57  ;;  %v1923_v13 = vpop.xlane.xlu0 %1922  ;;  %vm1437_vm7 = vcmp.eq.s32.totalorder %v3699_v0, %v1433_v26 }
 0x40f   :  { %v1435_v52 = vsub.s32 127, %v1431_v7  ;;  %v1932_v35 = vsub.s32 127, %v1928_v55  ;;  %v1465_v40 = vshra.s32 %v4706_v41, 16  ;;  %v6503_v33 = vsel %vm6502_vm5, %v3849_v12, 0.0  ;;  %vm1453_vm2 = vmand %vm1437_vm7, %vm1441_vm15 }
 0x410   :  { %v4716_v30 = vsel %vm4688_vm12, %v3849_v12, %v6503_v33  ;;  %v1899_v62 = vadd.s32 %v4619_v31, %v1896_v29  ;;  %v1913_v19 = vadd.s32 %v4639_v50, %v1910_v14  ;;  %1010 = vmax.xlane.f32.xlu0 %v4701_v22  ;;  %vm1438_vm6 = vcmp.eq.s32.totalorder %v3699_v0, %v1434_v16 }
 0x411   :  { %6504 = vst [vmem:[#allocation36_spill] sm:$0xff] %v4716_v30  ;;  %v1924_v7 = vcvt.f32.s32 %v1923_v13  ;;  %v4723_v57 = vcvt.s32.f32 %v1465_v40  ;;  %vm1439_vm13 = vcmp.eq.s32.totalorder %v3699_v0, %v1435_v52  ;;  %vm1936_vm3 = vcmp.eq.s32.totalorder %v3699_v0, %v1932_v35  ;;  %vm1454_vm10 = vmand %vm1438_vm6, %vm1442_vm1  ;;  %v6512_v35 = vld [vmem:[#allocation29_spill] sm:$0xff] }
 0x412   :  { %vm1443_vm8 = vcmp.gt.s32.totalorder %v1427_v20, 2147483648  ;;  %vm1940_vm9 = vcmp.gt.s32.totalorder %v1885_v51, 2147483648  ;;  %v1929_v31 = vand.u32 127, %v1899_v62  ;;  %v1930_v33 = vand.u32 127, %v1913_v19  ;;  %v6514_v13 = vld [vmem:[#allocation21_spill] sm:$0xff] }
 0x413   :  { %v1927_v50 = vadd.s32 %v1926_v4, %v1924_v7  ;;  %1468 = vmax.xlane.f32.xlu1 %v4723_v57  ;;  %v4731_v46 = vsel %vm1453_vm2, 2147483648, %v4346_v18  ;;  %vm6505_vm0 = vnez %v6458_v59  ;;  %v4741_v20 = vsel %vm1454_vm10, 2147483648, %v4361_v56  ;;  %vm1455_vm12 = vmand %vm1439_vm13, %vm1443_vm8  ;;  %v6509_v18 = vld [vmem:[#allocation19_spill] sm:$0xff] }
 0x414   :  { %v6506_v44 = vsel %vm6505_vm0, %v3869_v10, 0.0  ;;  %v1933_v51 = vsub.s32 127, %v1929_v31  ;;  %v1934_v43 = vsub.s32 127, %v1930_v33  ;;  %v1479_v4 = vshra.s32 %v4731_v46, 16  ;;  %vm1952_vm15 = vmand %vm1936_vm3, %vm1940_vm9 }
 0x415   :  { %v4738_v26 = vsel %vm1453_vm2, %v3869_v10, %v6506_v44  ;;  %v1493_v16 = vshra.s32 %v4741_v20, 16  ;;  %vm1941_vm1 = vcmp.gt.s32.totalorder %v1899_v62, 2147483648  ;;  %v1931_v59 = vand.u32 127, %v1927_v50  ;;  %v6518_v44 = vld [vmem:[#allocation30_spill] sm:$0xff] }
 0x416   :  { %6507 = vst [vmem:[#allocation37_spill] sm:$0xff] %v4738_v26  ;;  %vm6508_vm5 = vnez %v6460_v34  ;;  %v4755_v56 = vsel %vm1455_vm12, 2147483648, %v4378_v17  ;;  %v4757_v14 = vcvt.s32.f32 %v1479_v4  ;;  %vm6513_vm7 = vnez %v6512_v35  ;;  %v6520_v17 = vld [vmem:[#allocation24_spill] sm:$0xff] }
 0x417   :  { %v6510_v55 = vsel %vm6508_vm5, %v6509_v18, 0.0  ;;  %v4759_v52 = vcvt.s32.f32 %v1493_v16  ;;  %v1507_v40 = vshra.s32 %v4755_v56, 16  ;;  %v6515_v7 = vsel %vm6513_vm7, %v6514_v13, 0.0 }
 0x418   :  { %v4752_v29 = vsel %vm1454_vm10, %v6509_v18, %v6510_v55  ;;  %v4767_v34 = vsel %vm1455_vm12, %v6514_v13, %v6515_v7  ;;  %v1935_v31 = vsub.s32 127, %v1931_v59  ;;  %v4770_v33 = vsel %vm1952_vm15, 2147483648, %v4396_v45  ;;  %1482 = vmax.xlane.f32.xlu0 %v4757_v14 }
 0x419   :  { %6511 = vst [vmem:[#allocation38_spill] sm:$0xff] %v4752_v29  ;;  %6516 = vst [vmem:[#allocation29_spill] sm:$0xff] %v4767_v34  ;;  %vm6519_vm6 = vnez %v6518_v44  ;;  %vm1937_vm2 = vcmp.eq.s32.totalorder %v3699_v0, %v1933_v51  ;;  %vm1942_vm13 = vcmp.gt.s32.totalorder %v1913_v19, 2147483648  ;;  %1496 = vmax.xlane.f32.xlu1 %v4759_v52  ;;  %v4782_v55 = vcvt.s32.f32 %v1507_v40  ;;  %v6525_v51 = vld [vmem:[#allocation26_spill] sm:$0xff]  ;;  %v6528_v44 = vld [vmem:[#allocation33_spill] sm:$0xff] }
 0x41a   :  { %6517 = vst [vmem:[#allocation39_spill] sm:$0xff] %v4770_v33  ;;  %v6521_v4 = vsel %vm6519_vm6, %v6520_v17, 0.0  ;;  %v1965_v59 = vshra.s32 %v4770_v33, 16  ;;  %vm1953_vm3 = vmand %vm1937_vm2, %vm1941_vm1  ;;  %vm1938_vm8 = vcmp.eq.s32.totalorder %v3699_v0, %v1934_v43  ;;  %vm1943_vm9 = vcmp.gt.s32.totalorder %v1927_v50, 2147483648 }
 0x41b   :  { %v4777_v16 = vsel %vm1952_vm15, %v6520_v17, %v6521_v4  ;;  %v4788_v45 = vsel %vm1953_vm3, 2147483648, %v4412_v32  ;;  %v6526_v19 = vsel %vm4403_vm14, %v6525_v51, 0.0  ;;  %vm1954_vm10 = vmand %vm1938_vm8, %vm1942_vm13  ;;  %vm1939_vm0 = vcmp.eq.s32.totalorder %v3699_v0, %v1935_v31  ;;  %v6530_v32 = vld [vmem:[#allocation23_spill] sm:$0xff] }
 0x41c   :  { %6522 = vst [vmem:[#allocation30_spill] sm:$0xff] %v4777_v16  ;;  %6523 = vst [vmem:[#allocation40_spill] sm:$0xff] %v4788_v45  ;;  %v4795_v7 = vsel %vm1953_vm3, %v6525_v51, %v6526_v19  ;;  %v4798_v40 = vcvt.s32.f32 %v1965_v59  ;;  %v1979_v62 = vshra.s32 %v4788_v45, 16  ;;  %v4802_v43 = vsel %vm1954_vm10, 2147483648, %v6528_v44  ;;  %v6533_v17 = vld [vmem:[#allocation27_spill] sm:$0xff]  ;;  %v6536_v59 = vld [vmem:[#allocation25_spill] sm:$0xff]  ;;  %1510 = vmax.xlane.f32.xlu0 %v4782_v55 }
 0x41d   :  { %6527 = vst [vmem:[#allocation31_spill] sm:$0xff] %v4795_v7  ;;  %v6531_v4 = vsel %vm4418_vm4, %v6530_v32, 0.0  ;;  %vm1955_vm14 = vmand %vm1939_vm0, %vm1943_vm9  ;;  %v1993_v19 = vshra.s32 %v4802_v43, 16  ;;  %v6537_v51 = vsel %vm4435_vm11, %v6536_v59, 0.0  ;;  %v478_v31 = vand.u32 65535, %v4576_v2 }
 0x41e   :  { %v4809_v35 = vsel %vm1954_vm10, %v6530_v32, %v6531_v4  ;;  %v4813_v16 = vsel %vm1955_vm14, 2147483648, %v6533_v17  ;;  %v4820_v44 = vsel %vm1955_vm14, %v6536_v59, %v6537_v51  ;;  %1968 = vmax.xlane.f32.xlu1 %v4798_v40  ;;  %v4824_v50 = vcvt.s32.f32 %v1979_v62 }
 0x41f   :  { %6532 = vst [vmem:[#allocation33_spill] sm:$0xff] %v4809_v35  ;;  %6534 = vst [vmem:[#allocation32_spill] sm:$0xff] %v4813_v16  ;;  %v2007_v4 = vshra.s32 %v4813_v16, 16  ;;  %v4827_v32 = vcvt.s32.f32 %v1993_v19  ;;  %v3566_v51 = vmov 0   ;;  %v480_v62 = vcvt.s32.f32 %v478_v31 }
 0x420   :  { %6538 = vst [vmem:[#allocation27_spill] sm:$0xff] %v4820_v44  ;;  %1982 = vmax.xlane.f32.xlu0 %v4824_v50  ;;  %3382 = vset.pattern.permute.xlu1 %v3566_v51  ;;  %v492_v35 = vand.u32 65535, %v4599_v25  ;;  %v464_v13 = vand.u32 65535, %v4554_v39  ;;  %v992_v34 = vand.u32 65535, %v4662_v27 }
 0x421   :  { %v4831_v17 = vcvt.s32.f32 %v2007_v4  ;;  %3383 = vset.pattern.permute.xlu0 %v3566_v51  ;;  %v506_v4 = vand.u32 65535, %v4609_v54 }
 0x422   :  { %1996 = vmax.xlane.f32.xlu1 %v4827_v32  ;;  %v494_v51 = vcvt.s32.f32 %v492_v35 }
 0x423   :  { %v508_v30 = vcvt.s32.f32 %v506_v4 }
 0x424   :  { %2010 = vmax.xlane.f32.xlu0 %v4831_v17 }
 0x485   :  { %v4839_v19 = vpop.xlane.xlu1 %468 }
 0x486   :  { %vm470_vm15 = vcmp.eq.f32.partialorder %v4568_v47, %v4839_v19 }
 0x489   :  { %v4835_v59 = vpop.xlane.xlu0 %482 }
 0x48a   :  { %vm484_vm4 = vcmp.eq.f32.partialorder %v4592_v36, %v4835_v59 }
 0x48b   :  { %v485_v44 = vsel %vm484_vm4, %v480_v62, -inf  ;;  %v466_v62 = vcvt.s32.f32 %v464_v13  ;;  %v964_v13 = vand.u32 65535, %v4629_v60  ;;  %vm6390_vm4 = vcmask 130048  }
 0x48c   :  { %486 = vmax.xlane.f32.xlu0 %v485_v44  ;;  %v978_v44 = vand.u32 65535, %v4647_v53 }
 0x48d   :  { %v4843_v7 = vpop.xlane.xlu1 %496  ;;  %v471_v4 = vsel %vm470_vm15, %v466_v62, -inf }
 0x48e   :  { %vm498_vm11 = vcmp.eq.f32.partialorder %v4624_v9, %v4843_v7  ;;  %v980_v9 = vcvt.s32.f32 %v978_v44 }
 0x48f   :  { %v4845_v12 = vpop.xlane.xlu0 %510  ;;  %v499_v36 = vsel %vm498_vm11, %v494_v51, -inf  ;;  %v994_v51 = vcvt.s32.f32 %v992_v34 }
 0x490   :  { %vm512_vm12 = vcmp.eq.f32.partialorder %v4626_v61, %v4845_v12  ;;  %500 = vmax.xlane.f32.xlu1 %v499_v36 }
 0x491   :  { %v513_v31 = vsel %vm512_vm12, %v508_v30, -inf  ;;  %v1006_v30 = vand.u32 65535, %v4686_v49 }
 0x492   :  { %514 = vmax.xlane.f32.xlu0 %v513_v31 }
 0x493   :  { %v1008_v44 = vcvt.s32.f32 %v1006_v30 }
 0x494   :  { %v4855_v35 = vpop.xlane.xlu1 %968  ;;  %472 = vmax.xlane.f32.xlu1 %v471_v4 }
 0x495   :  { %vm970_vm7 = vcmp.eq.f32.partialorder %v4658_v23, %v4855_v35 }
 0x496   :  { %v4858_v18 = vpop.xlane.xlu0 %982 }
 0x497   :  { %vm984_vm1 = vcmp.eq.f32.partialorder %v4674_v21, %v4858_v18  ;;  %v966_v21 = vcvt.s32.f32 %v964_v13 }
 0x498   :  { %v985_v61 = vsel %vm984_vm1, %v980_v9, -inf  ;;  %v1492_v9 = vand.u32 65535, %v4741_v20 }
 0x499   :  { %986 = vmax.xlane.f32.xlu0 %v985_v61  ;;  %v4863_v47 = vpop.xlane.xlu1 %996  ;;  %v971_v4 = vsel %vm970_vm7, %v966_v21, -inf }
 0x49a   :  { %vm998_vm5 = vcmp.eq.f32.partialorder %v4683_v42, %v4863_v47  ;;  %v1478_v42 = vand.u32 65535, %v4731_v46  ;;  %v1494_v23 = vcvt.s32.f32 %v1492_v9  ;;  %v1978_v9 = vand.u32 65535, %v4788_v45 }
 0x49b   :  { %v999_v36 = vsel %vm998_vm5, %v994_v51, -inf  ;;  %v975_v45 = vcvt.f32.s32 %v4855_v35 }
 0x49c   :  { %1000 = vmax.xlane.f32.xlu1 %v999_v36  ;;  %v1480_v30 = vcvt.s32.f32 %v1478_v42  ;;  %v1506_v36 = vand.u32 65535, %v4755_v56 }
 0x49d   :  { %v4868_v31 = vpop.xlane.xlu0 %1010 }
 0x49e   :  { %vm1012_vm6 = vcmp.eq.f32.partialorder %v4701_v22, %v4868_v31  ;;  %v1464_v22 = vand.u32 65535, %v4706_v41 }
 0x49f   :  { %v1013_v62 = vsel %vm1012_vm6, %v1008_v44, -inf }
 0x4a0   :  { %1014 = vmax.xlane.f32.xlu0 %v1013_v62  ;;  %v4874_v34 = vpop.xlane.xlu1 %1468  ;;  %972 = vmax.xlane.f32.xlu1 %v971_v4  ;;  %v1508_v62 = vcvt.s32.f32 %v1506_v36  ;;  %v1466_v42 = vcvt.s32.f32 %v1464_v22  ;;  %v1964_v22 = vand.u32 65535, %v4770_v33 }
 0x4a1   :  { %vm1470_vm3 = vcmp.eq.f32.partialorder %v4723_v57, %v4874_v34  ;;  %v1980_v57 = vcvt.s32.f32 %v1978_v9 }
 0x4a5   :  { %v4878_v61 = vpop.xlane.xlu0 %1482 }
 0x4a6   :  { %v4880_v51 = vpop.xlane.xlu1 %1496  ;;  %vm1484_vm2 = vcmp.eq.f32.partialorder %v4757_v14, %v4878_v61  ;;  %v1992_v14 = vand.u32 65535, %v4802_v43 }
 0x4a7   :  { %vm1498_vm13 = vcmp.eq.f32.partialorder %v4759_v52, %v4880_v51  ;;  %v1485_v13 = vsel %vm1484_vm2, %v1480_v30, -inf  ;;  %v1471_v30 = vsel %vm1470_vm3, %v1466_v42, -inf  ;;  %v1503_v35 = vcvt.f32.s32 %v4880_v51 }
 0x4a8   :  { %v1499_v44 = vsel %vm1498_vm13, %v1494_v23, -inf  ;;  %1486 = vmax.xlane.f32.xlu0 %v1485_v13  ;;  %v1994_v36 = vcvt.s32.f32 %v1992_v14  ;;  %v1966_v14 = vcvt.s32.f32 %v1964_v22  ;;  %v517_v22 = vcvt.f32.s32 %v4845_v12 }
 0x4a9   :  { %1500 = vmax.xlane.f32.xlu1 %v1499_v44  ;;  %v4890_v21 = vpop.xlane.xlu0 %1510  ;;  %v2006_v44 = vand.u32 65535, %v4813_v16  ;;  %v1475_v12 = vcvt.f32.s32 %v4874_v34 }
 0x4aa   :  { %vm1512_vm8 = vcmp.eq.f32.partialorder %v4782_v55, %v4890_v21 }
 0x4ab   :  { %v4892_v4 = vpop.xlane.xlu1 %1968  ;;  %v1513_v52 = vsel %vm1512_vm8, %v1508_v62, -inf  ;;  %v2008_v9 = vcvt.s32.f32 %v2006_v44 }
 0x4ac   :  { %1514 = vmax.xlane.f32.xlu0 %v1513_v52  ;;  %vm1970_vm0 = vcmp.eq.f32.partialorder %v4798_v40, %v4892_v4  ;;  %v489_v40 = vcvt.f32.s32 %v4835_v59 }
 0x4ad   :  { %1472 = vmax.xlane.f32.xlu1 %v1471_v30  ;;  %v4898_v23 = vpop.xlane.xlu0 %1982  ;;  %v1971_v30 = vsel %vm1970_vm0, %v1966_v14, -inf }
 0x4ae   :  { %vm1984_vm9 = vcmp.eq.f32.partialorder %v4824_v50, %v4898_v23  ;;  %v6379_v50 = vmov 0.0  }
 0x4af   :  { %v4900_v13 = vpop.xlane.xlu1 %1996  ;;  %v1985_v55 = vsel %vm1984_vm9, %v1980_v57, -inf  ;;  %2361 = vst.msk [vmem:[#allocation6 + $0x78] sm:$0xff] %vm6390_vm4, %v6379_v50 }
 0x4b0   :  { %vm1998_vm10 = vcmp.eq.f32.partialorder %v4827_v32, %v4900_v13  ;;  %1986 = vmax.xlane.f32.xlu0 %v1985_v55  ;;  %v2240_v32 = vld [vmem:[%s6325_s2] sm:$0xff] }
 0x4b1   :  { %v1999_v62 = vsel %vm1998_vm10, %v1994_v36, -inf  ;;  %v4910_v42 = vpop.xlane.xlu0 %2010  ;;  %v490_v36 = vshll.u32 %v489_v40, 16  ;;  %v989_v40 = vcvt.f32.s32 %v4858_v18 }
 0x4b2   :  { %2000 = vmax.xlane.f32.xlu1 %v1999_v62  ;;  %vm2012_vm14 = vcmp.eq.f32.partialorder %v4831_v17, %v4910_v42  ;;  %v503_v17 = vcvt.f32.s32 %v4843_v7  ;;  %v1017_v7 = vcvt.f32.s32 %v4868_v31 }
 0x4b3   :  { %v2013_v52 = vsel %vm2012_vm14, %v2008_v9, -inf  ;;  %v475_v9 = vcvt.f32.s32 %v4839_v19 }
 0x4b4   :  { %2014 = vmax.xlane.f32.xlu0 %v2013_v52  ;;  %v504_v14 = vshll.u32 %v503_v17, 16  ;;  %v518_v52 = vshll.u32 %v517_v22, 16 }
 0x4b5   :  { %v476_v22 = vshll.u32 %v475_v9, 16  ;;  %v4943_v9 = vshll.u32 %v1503_v35, 16  ;;  %v1975_v35 = vcvt.f32.s32 %v4892_v4 }
 0x4b6   :  { %1972 = vmax.xlane.f32.xlu1 %v1971_v30 }
 0x4c7   :  { %2256 = vperm.xlu1 %3382, %v2240_v32  }
 0x519   :  { %v487_v57 = vpop.xlane.xlu0 %486 }
 0x51a   :  { %v488_v44 = vcvt.f32.s32 %v487_v57  ;;  %v1003_v57 = vcvt.f32.s32 %v4863_v47 }
 0x51c   :  { %v491_v55 = vadd.s32 %v490_v36, %v488_v44  ;;  %v1489_v44 = vcvt.f32.s32 %v4878_v61  ;;  %v1018_v61 = vshll.u32 %v1017_v7, 16 }
 0x51d   :  { %v501_v30 = vpop.xlane.xlu1 %500 }
 0x51e   :  { %v521_v62 = vand.u32 127, %v491_v55  ;;  %v502_v33 = vcvt.f32.s32 %v501_v30  ;;  %vm533_vm12 = vcmp.gt.s32.totalorder %v491_v55, 2147483648  ;;  %v1004_v55 = vshll.u32 %v1003_v57, 16 }
 0x51f   :  { %v515_v32 = vpop.xlane.xlu0 %514 }
 0x520   :  { %v525_v50 = vsub.s32 127, %v521_v62  ;;  %v516_v59 = vcvt.f32.s32 %v515_v32  ;;  %v505_v19 = vadd.s32 %v504_v14, %v502_v33  ;;  %v990_v33 = vshll.u32 %v989_v40, 16 }
 0x521   :  { %v473_v18 = vpop.xlane.xlu1 %472  ;;  %v4939_v14 = vshll.u32 %v1475_v12, 16  ;;  %v4941_v32 = vshll.u32 %v1489_v44, 16  ;;  %v1517_v40 = vcvt.f32.s32 %v4890_v21 }
 0x522   :  { %vm529_vm11 = vcmp.eq.s32.totalorder %v3699_v0, %v525_v50  ;;  %v519_v36 = vadd.s32 %v518_v52, %v516_v59  ;;  %v522_v31 = vand.u32 127, %v505_v19  ;;  %v976_v50 = vshll.u32 %v975_v45, 16 }
 0x523   :  { %vm4931_vm15 = vmand %vm529_vm11, %vm533_vm12  ;;  %v474_v62 = vcvt.f32.s32 %v473_v18  ;;  %vm534_vm5 = vcmp.gt.s32.totalorder %v505_v19, 2147483648 }
 0x524   :  { %v523_v34 = vand.u32 127, %v519_v36  ;;  %v526_v51 = vsub.s32 127, %v522_v31  ;;  %v4950_v45 = vsel %vm4931_vm15, 2147483648, %v4576_v2  ;;  %vm535_vm2 = vcmp.gt.s32.totalorder %v519_v36, 2147483648 }
 0x525   :  { %v477_v59 = vadd.s32 %v476_v22, %v474_v62  ;;  %v571_v22 = vshra.s32 %v4950_v45, 16 }
 0x526   :  { %v527_v52 = vsub.s32 127, %v523_v34  ;;  %v987_v30 = vpop.xlane.xlu0 %986  ;;  %vm530_vm1 = vcmp.eq.s32.totalorder %v3699_v0, %v526_v51 }
 0x527   :  { %v988_v16 = vcvt.f32.s32 %v987_v30  ;;  %vm4953_vm6 = vmand %vm530_vm1, %vm534_vm5  ;;  %v520_v7 = vand.u32 127, %v477_v59  ;;  %vm532_vm3 = vcmp.gt.s32.totalorder %v477_v59, 2147483648 }
 0x528   :  { %vm531_vm7 = vcmp.eq.s32.totalorder %v3699_v0, %v527_v52  ;;  %v4969_v18 = vsel %vm4953_vm6, 2147483648, %v4599_v25 }
 0x529   :  { %v991_v12 = vadd.s32 %v990_v33, %v988_v16  ;;  %v1001_v44 = vpop.xlane.xlu1 %1000  ;;  %vm4962_vm13 = vmand %vm531_vm7, %vm535_vm2  ;;  %v524_v4 = vsub.s32 127, %v520_v7  ;;  %v585_v33 = vshra.s32 %v4969_v18, 16 }
 0x52a   :  { %v1002_v21 = vcvt.f32.s32 %v1001_v44  ;;  %v4980_v62 = vsel %vm4962_vm13, 2147483648, %v4609_v54 }
 0x52b   :  { %v1021_v36 = vand.u32 127, %v991_v12  ;;  %vm528_vm8 = vcmp.eq.s32.totalorder %v3699_v0, %v524_v4  ;;  %v599_v30 = vshra.s32 %v4980_v62, 16  ;;  %vm1033_vm10 = vcmp.gt.s32.totalorder %v991_v12, 2147483648 }
 0x52c   :  { %v1005_v31 = vadd.s32 %v1004_v55, %v1002_v21  ;;  %vm4984_vm9 = vmand %vm528_vm8, %vm532_vm3  ;;  %v4988_v44 = vcvt.s32.f32 %v585_v33 }
 0x52d   :  { %v1015_v34 = vpop.xlane.xlu0 %1014  ;;  %v1025_v25 = vsub.s32 127, %v1021_v36  ;;  %v973_v52 = vpop.xlane.xlu1 %972  ;;  %v4995_v4 = vcvt.s32.f32 %v599_v30  ;;  %v1518_v36 = vshll.u32 %v1517_v40, 16  ;;  %v5005_v33 = vsel %vm4984_vm9, 2147483648, %v4554_v39 }
 0x52e   :  { %v1016_v51 = vcvt.f32.s32 %v1015_v34  ;;  %v1022_v55 = vand.u32 127, %v1005_v31  ;;  %v974_v59 = vcvt.f32.s32 %v973_v52  ;;  %v6547_v34 = vmov 0  ;;  %588 = vmax.xlane.f32.xlu1 %v4988_v44 }
 0x52f   :  { %vm1029_vm0 = vcmp.eq.s32.totalorder %v3699_v0, %v1025_v25  ;;  %v5007_v52 = vshll.u32 %v1975_v35, 16  ;;  %602 = vmax.xlane.f32.xlu0 %v4995_v4  ;;  %v557_v25 = vshra.s32 %v5005_v33, 16  ;;  %vm1034_vm12 = vcmp.gt.s32.totalorder %v1005_v31, 2147483648 }
 0x530   :  { %v1019_v21 = vadd.s32 %v1018_v61, %v1016_v51  ;;  %vm4997_vm14 = vmand %vm1029_vm0, %vm1033_vm10  ;;  %v1026_v12 = vsub.s32 127, %v1022_v55  ;;  %v977_v47 = vadd.s32 %v976_v50, %v974_v59  ;;  %v1989_v50 = vcvt.f32.s32 %v4898_v23 }
 0x531   :  { %v6548_v34 = vsel %vm4997_vm14, 4294967295, %v6547_v34  ;;  %v2003_v39 = vcvt.f32.s32 %v4900_v13  ;;  %v5022_v55 = vcvt.s32.f32 %v557_v25  ;;  %v5024_v59 = vcvt.s32.f32 %v571_v22 }
 0x532   :  { %6549 = vst [vmem:[#allocation34_spill] sm:$0xff] %v6548_v34  ;;  %v1023_v40 = vand.u32 127, %v1019_v21  ;;  %vm1030_vm11 = vcmp.eq.s32.totalorder %v3699_v0, %v1026_v12  ;;  %v1020_v51 = vand.u32 127, %v977_v47  ;;  %vm1035_vm5 = vcmp.gt.s32.totalorder %v1019_v21, 2147483648 }
 0x533   :  { %vm5018_vm1 = vmand %vm1030_vm11, %vm1034_vm12  ;;  %560 = vmax.xlane.f32.xlu1 %v5022_v55  ;;  %574 = vmax.xlane.f32.xlu0 %v5024_v59  ;;  %v2017_v21 = vcvt.f32.s32 %v4910_v42  ;;  %vm1032_vm8 = vcmp.gt.s32.totalorder %v977_v47, 2147483648  ;;  %v1990_v47 = vshll.u32 %v1989_v50, 16 }
 0x534   :  { %v1027_v30 = vsub.s32 127, %v1023_v40  ;;  %v1024_v12 = vsub.s32 127, %v1020_v51  ;;  %v5033_v13 = vsel %vm5018_vm1, 2147483648, %v4662_v27  ;;  %v5048_v27 = vsel %vm4997_vm14, 2147483648, %v4647_v53 }
 0x535   :  { %v1487_v31 = vpop.xlane.xlu0 %1486  ;;  %v1085_v22 = vshra.s32 %v5033_v13, 16 }
 0x536   :  { %v1501_v61 = vpop.xlane.xlu1 %1500  ;;  %vm1031_vm7 = vcmp.eq.s32.totalorder %v3699_v0, %v1027_v30  ;;  %v1488_v40 = vcvt.f32.s32 %v1487_v31  ;;  %vm1028_vm3 = vcmp.eq.s32.totalorder %v3699_v0, %v1024_v12  ;;  %v6554_v30 = vmov 0 }
 0x537   :  { %v1502_v25 = vcvt.f32.s32 %v1501_v61  ;;  %vm5040_vm2 = vmand %vm1031_vm7, %vm1035_vm5  ;;  %v5060_v12 = vcvt.s32.f32 %v1085_v22 }
 0x538   :  { %vm5054_vm10 = vmand %vm1028_vm3, %vm1032_vm8  ;;  %v1491_v42 = vadd.s32 %v4941_v32, %v1488_v40  ;;  %v5069_v61 = vsel %vm5040_vm2, 2147483648, %v4686_v49  ;;  %v2018_v49 = vshll.u32 %v2017_v21, 16  ;;  %v6559_v21 = vmov 0 }
 0x539   :  { %v6555_v30 = vsel %vm5054_vm10, 4294967295, %v6554_v30  ;;  %v1505_v31 = vadd.s32 %v4943_v9, %v1502_v25  ;;  %v1515_v16 = vpop.xlane.xlu0 %1514  ;;  %v5074_v32 = vsel %vm5054_vm10, 2147483648, %v4629_v60  ;;  %v2004_v9 = vshll.u32 %v2003_v39, 16  ;;  %1088 = vmax.xlane.f32.xlu1 %v5060_v12 }
 0x53a   :  { %6556 = vst [vmem:[#allocation41_spill] sm:$0xff] %v6555_v30  ;;  %v1473_v19 = vpop.xlane.xlu1 %1472  ;;  %v1521_v40 = vand.u32 127, %v1491_v42  ;;  %v1071_v25 = vshra.s32 %v5048_v27, 16  ;;  %v1516_v22 = vcvt.f32.s32 %v1515_v16  ;;  %v1099_v38 = vshra.s32 %v5069_v61, 16 }
 0x53b   :  { %v1522_v50 = vand.u32 127, %v1505_v31  ;;  %v1474_v53 = vcvt.f32.s32 %v1473_v19  ;;  %v1057_v63 = vshra.s32 %v5074_v32, 16  ;;  %vm1533_vm0 = vcmp.gt.s32.totalorder %v1491_v42, 2147483648 }
 0x53c   :  { %v1525_v34 = vsub.s32 127, %v1521_v40  ;;  %v1519_v54 = vadd.s32 %v1518_v36, %v1516_v22  ;;  %v5081_v15 = vcvt.s32.f32 %v1099_v38  ;;  %vm1534_vm7 = vcmp.gt.s32.totalorder %v1505_v31, 2147483648 }
 0x53d   :  { %v1526_v23 = vsub.s32 127, %v1522_v50  ;;  %v1477_v60 = vadd.s32 %v4939_v14, %v1474_v53  ;;  %v1987_v39 = vpop.xlane.xlu0 %1986  ;;  %v5083_v37 = vcvt.s32.f32 %v1057_v63  ;;  %v5093_v38 = vcvt.s32.f32 %v1071_v25 }
 0x53e   :  { %vm1529_vm11 = vcmp.eq.s32.totalorder %v3699_v0, %v1525_v34  ;;  %v1988_v19 = vcvt.f32.s32 %v1987_v39  ;;  %v1523_v36 = vand.u32 127, %v1519_v54  ;;  %1102 = vmax.xlane.f32.xlu0 %v5081_v15  ;;  %v6562_v14 = vmov 0 }
 0x53f   :  { %v2001_v30 = vpop.xlane.xlu1 %2000  ;;  %vm1530_vm12 = vcmp.eq.s32.totalorder %v3699_v0, %v1526_v23  ;;  %vm5087_vm5 = vmand %vm1529_vm11, %vm1533_vm0  ;;  %v1520_v42 = vand.u32 127, %v1477_v60  ;;  %1060 = vmax.xlane.f32.xlu1 %v5083_v37  ;;  %vm1535_vm8 = vcmp.gt.s32.totalorder %v1519_v54, 2147483648  ;;  %vm1532_vm0 = vcmp.gt.s32.totalorder %v1477_v60, 2147483648 }
 0x540   :  { %v2002_v16 = vcvt.f32.s32 %v2001_v30  ;;  %v6560_v21 = vsel %vm5087_vm5, 4294967295, %v6559_v21  ;;  %vm5099_vm3 = vmand %vm1530_vm12, %vm1534_vm7  ;;  %v1991_v34 = vadd.s32 %v1990_v47, %v1988_v19  ;;  %v1527_v53 = vsub.s32 127, %v1523_v36 }
 0x541   :  { %6561 = vst [vmem:[#allocation42_spill] sm:$0xff] %v6560_v21  ;;  %v6563_v14 = vsel %vm5099_vm3, 4294967295, %v6562_v14  ;;  %v1524_v40 = vsub.s32 127, %v1520_v42  ;;  %v2015_v50 = vpop.xlane.xlu0 %2014  ;;  %v5110_v22 = vsel %vm5099_vm3, 2147483648, %v4741_v20  ;;  %v5115_v47 = vsel %vm5087_vm5, 2147483648, %v4731_v46 }
 0x542   :  { %v2005_v23 = vadd.s32 %v2004_v9, %v2002_v16  ;;  %v2021_v39 = vand.u32 127, %v1991_v34  ;;  %6565 = vst [vmem:[#allocation43_spill] sm:$0xff] %v5115_v47  ;;  %vm1531_vm11 = vcmp.eq.s32.totalorder %v3699_v0, %v1527_v53  ;;  %v2016_v9 = vcvt.f32.s32 %v2015_v50  ;;  %1074 = vmax.xlane.f32.xlu0 %v5093_v38 }
 0x543   :  { %v1973_v25 = vpop.xlane.xlu1 %1972  ;;  %vm1528_vm12 = vcmp.eq.s32.totalorder %v3699_v0, %v1524_v40  ;;  %vm5121_vm7 = vmand %vm1531_vm11, %vm1535_vm8  ;;  %v6566_v20 = vmov 0  ;;  %vm2033_vm4 = vcmp.gt.s32.totalorder %v1991_v34, 2147483648  ;;  %v1585_v42 = vshra.s32 %v5110_v22, 16 }
 0x544   :  { %v2022_v63 = vand.u32 127, %v2005_v23  ;;  %v1974_v19 = vcvt.f32.s32 %v1973_v25  ;;  %v6567_v20 = vsel %vm5121_vm7, 4294967295, %v6566_v20  ;;  %v2025_v16 = vsub.s32 127, %v2021_v39  ;;  %vm5131_vm5 = vmand %vm1528_vm12, %vm1532_vm0 }
 0x545   :  { %6568 = vst [vmem:[#allocation44_spill] sm:$0xff] %v6567_v20  ;;  %v6571_v40 = vmov 0  ;;  %v2019_v54 = vadd.s32 %v2018_v49, %v2016_v9  ;;  %v5139_v34 = vsel %vm5121_vm7, 2147483648, %v4755_v56  ;;  %v5147_v60 = vcvt.s32.f32 %v1585_v42 }
 0x546   :  { %v2026_v36 = vsub.s32 127, %v2022_v63  ;;  %v6572_v40 = vsel %vm5131_vm5, 4294967295, %v6571_v40  ;;  %v1977_v50 = vadd.s32 %v5007_v52, %v1974_v19  ;;  %vm2029_vm8 = vcmp.eq.s32.totalorder %v3699_v0, %v2025_v16 }
 0x547   :  { %6573 = vst [vmem:[#allocation45_spill] sm:$0xff] %v6572_v40  ;;  %vm5149_vm11 = vmand %vm2029_vm8, %vm2033_vm4  ;;  %v6576_v49 = vmov 0  ;;  %vm2034_vm12 = vcmp.gt.s32.totalorder %v2005_v23, 2147483648  ;;  %v2023_v52 = vand.u32 127, %v2019_v54  ;;  %v2257_v56 = vpop.permute.xlu1 %2256  ;;  %v6581_v39 = vmov 0  ;;  %1588 = vmax.xlane.f32.xlu1 %v5147_v60 }
 0x548   :  { %vm2030_vm0 = vcmp.eq.s32.totalorder %v3699_v0, %v2026_v36  ;;  %v6577_v49 = vsel %vm5149_vm11, 4294967295, %v6576_v49  ;;  %v2020_v9 = vand.u32 127, %v1977_v50  ;;  %v1599_v16 = vshra.s32 %v5139_v34, 16 }
 0x549   :  { %6578 = vst [vmem:[#allocation46_spill] sm:$0xff] %v6577_v49  ;;  %vm5157_vm7 = vmand %vm2030_vm0, %vm2034_vm12  ;;  %v5166_v23 = vsel %vm5131_vm5, 2147483648, %v4706_v41  ;;  %v1571_v36 = vshra.s32 %v5115_v47, 16  ;;  %v2027_v19 = vsub.s32 127, %v2023_v52  ;;  %vm2035_vm4 = vcmp.gt.s32.totalorder %v2019_v54, 2147483648  ;;  %v2245_v49 = vld [vmem:[%s6325_s2 + $0x28] sm:$0xff] }
 0x54a   :  { %v6582_v39 = vsel %vm5157_vm7, 4294967295, %v6581_v39  ;;  %v2024_v53 = vsub.s32 127, %v2020_v9  ;;  %v1557_v20 = vshra.s32 %v5166_v23, 16  ;;  %v5174_v26 = vcvt.s32.f32 %v1599_v16 }
 0x54b   :  { %6583 = vst [vmem:[#allocation47_spill] sm:$0xff] %v6582_v39  ;;  %v5179_v10 = vsel %vm5157_vm7, 2147483648, %v4802_v43  ;;  %vm2300_vm8 = vcmp.eq.s32.totalorder %v2257_v56, %v3699_v0  ;;  %vm2031_vm0 = vcmp.eq.s32.totalorder %v3699_v0, %v2027_v19  ;;  %v6587_v9 = vmov 0  ;;  %v6596_v19 = vld [vmem:[#allocation32_spill] sm:$0xff]  ;;  %v6601_v39 = vld [vmem:[#allocation39_spill] sm:$0xff] }
 0x54c   :  { %6586 = vst [vmem:[#allocation48_spill] sm:$0xff] %v5179_v10  ;;  %vm2028_vm12 = vcmp.eq.s32.totalorder %v3699_v0, %v2024_v53  ;;  %v5184_v41 = vcvt.s32.f32 %v1557_v20  ;;  %v2085_v52 = vshra.s32 %v5179_v10, 16  ;;  %vm5187_vm5 = vmand %vm2031_vm0, %vm2035_vm4  ;;  %vm2032_vm3 = vcmp.gt.s32.totalorder %v1977_v50, 2147483648  ;;  %1602 = vmax.xlane.f32.xlu0 %v5174_v26 }
 0x54d   :  { %v6588_v9 = vsel %vm5187_vm5, 4294967295, %v6587_v9  ;;  %v6590_v54 = vmov 0.0   ;;  %vm5197_vm7 = vmand %vm2028_vm12, %vm2032_vm3  ;;  %v6593_v53 = vmov 0  ;;  %v5207_v50 = vsel %vm5187_vm5, 2147483648, %v6596_v19  ;;  %v6603_v19 = vld [vmem:[#allocation40_spill] sm:$0xff] }
 0x54e   :  { %6589 = vst [vmem:[#allocation49_spill] sm:$0xff] %v6588_v9  ;;  %v3147_v43 = vsel %vm2300_vm8, 1.0, %v6590_v54  ;;  %v6594_v53 = vsel %vm5197_vm7, 4294967295, %v6593_v53  ;;  %1560 = vmax.xlane.f32.xlu1 %v5184_v41  ;;  %v5202_v20 = vcvt.s32.f32 %v2085_v52  ;;  %6597 = vst [vmem:[#allocation32_spill] sm:$0xff] %v5207_v50  ;;  %vm6598_vm4 = vcmask 130048  }
 0x54f   :  { %6595 = vst [vmem:[#allocation50_spill] sm:$0xff] %v6594_v53  ;;  %2346 = vst.msk [vmem:[#allocation6] sm:$0xff] %vm6598_vm4, %v3147_v43  ;;  %v5214_v16 = vcvt.s32.f32 %v1571_v36  ;;  %v2099_v46 = vshra.s32 %v5207_v50, 16  ;;  %v5220_v52 = vsel %vm5197_vm7, 2147483648, %v6601_v39  ;;  %v5226_v43 = vsel %vm5149_vm11, 2147483648, %v6603_v19  ;;  %v2242_v19 = vld [vmem:[%s6325_s2 + $0x10] sm:$0xff] }
 0x550   :  { %6602 = vst [vmem:[#allocation39_spill] sm:$0xff] %v5220_v52  ;;  %v2057_v9 = vshra.s32 %v5220_v52, 16  ;;  %6604 = vst [vmem:[#allocation40_spill] sm:$0xff] %v5226_v43  ;;  %v2071_v56 = vshra.s32 %v5226_v43, 16  ;;  %v598_v42 = vand.u32 65535, %v4980_v62  ;;  %v570_v63 = vand.u32 65535, %v4950_v45 }
 0x551   :  { %1574 = vmax.xlane.f32.xlu0 %v5214_v16  ;;  %v5229_v21 = vcvt.s32.f32 %v2099_v46  ;;  %v2243_v46 = vld [vmem:[%s6325_s2 + $0x18] sm:$0xff] }
 0x552   :  { %2088 = vmax.xlane.f32.xlu1 %v5202_v20  ;;  %v5232_v36 = vcvt.s32.f32 %v2057_v9  ;;  %v5237_v39 = vcvt.s32.f32 %v2071_v56  ;;  %v2241_v9 = vld [vmem:[%s6325_s2 + $0x8] sm:$0xff]  ;;  %v2244_v56 = vld [vmem:[%s6325_s2 + $0x20] sm:$0xff]  ;;  %v572_v30 = vcvt.s32.f32 %v570_v63  ;;  %v1098_v63 = vand.u32 65535, %v5069_v61 }
 0x555   :  { %2102 = vmax.xlane.f32.xlu0 %v5229_v21 }
 0x556   :  { %2060 = vmax.xlane.f32.xlu1 %v5232_v36 }
 0x559   :  { %2074 = vmax.xlane.f32.xlu0 %v5237_v39 }
 0x567   :  { %2262 = vperm.xlu1 %3382, %v2242_v19   ;;  %v2246_v19 = vld [vmem:[%s6325_s2 + $0x30] sm:$0xff] }
 0x56b   :  { %2265 = vperm.xlu1 %3382, %v2243_v46   ;;  %v2247_v46 = vld [vmem:[%s6325_s2 + $0x38] sm:$0xff] }
 0x56f   :  { %2259 = vperm.xlu0 %3383, %v2241_v9   ;;  %2268 = vperm.xlu1 %3382, %v2244_v56   ;;  %v2248_v9 = vld [vmem:[%s6325_s2 + $0x40] sm:$0xff]  ;;  %v2249_v56 = vld [vmem:[%s6325_s2 + $0x48] sm:$0xff] }
 0x573   :  { %2271 = vperm.xlu1 %3382, %v2245_v49   ;;  %v584_v49 = vand.u32 65535, %v4969_v18 }
 0x575   :  { %v586_v31 = vcvt.s32.f32 %v584_v49 }
 0x577   :  { %2274 = vperm.xlu1 %3382, %v2246_v19  }
 0x57b   :  { %2277 = vperm.xlu1 %3382, %v2247_v46   ;;  %v600_v46 = vcvt.s32.f32 %v598_v42 }
 0x57f   :  { %2280 = vperm.xlu1 %3382, %v2248_v9   ;;  %v556_v9 = vand.u32 65535, %v5005_v33 }
 0x581   :  { %v558_v29 = vcvt.s32.f32 %v556_v9 }
 0x583   :  { %2283 = vperm.xlu1 %3382, %v2249_v56  }
 0x5bb   :  { %v5269_v19 = vpop.xlane.xlu1 %588 }
 0x5bc   :  { %v5271_v53 = vpop.xlane.xlu0 %602  ;;  %vm590_vm3 = vcmp.eq.f32.partialorder %v4988_v44, %v5269_v19  ;;  %v1084_v44 = vand.u32 65535, %v5033_v13 }
 0x5bd   :  { %v591_v25 = vsel %vm590_vm3, %v586_v31, -inf  ;;  %vm604_vm8 = vcmp.eq.f32.partialorder %v4995_v4, %v5271_v53 }
 0x5be   :  { %592 = vmax.xlane.f32.xlu1 %v591_v25  ;;  %v605_v56 = vsel %vm604_vm8, %v600_v46, -inf  ;;  %v1086_v25 = vcvt.s32.f32 %v1084_v44  ;;  %v1056_v46 = vand.u32 65535, %v5074_v32 }
 0x5bf   :  { %606 = vmax.xlane.f32.xlu0 %v605_v56  ;;  %v1100_v56 = vcvt.s32.f32 %v1098_v63 }
 0x5c0   :  { %v5279_v40 = vpop.xlane.xlu1 %560  ;;  %v5281_v49 = vpop.xlane.xlu0 %574 }
 0x5c1   :  { %vm562_vm0 = vcmp.eq.f32.partialorder %v5022_v55, %v5279_v40  ;;  %vm576_vm12 = vcmp.eq.f32.partialorder %v5024_v59, %v5281_v49 }
 0x5c2   :  { %v563_v31 = vsel %vm562_vm0, %v558_v29, -inf  ;;  %v577_v42 = vsel %vm576_vm12, %v572_v30, -inf  ;;  %v1058_v29 = vcvt.s32.f32 %v1056_v46  ;;  %v1070_v30 = vand.u32 65535, %v5048_v27 }
 0x5c3   :  { %564 = vmax.xlane.f32.xlu1 %v563_v31  ;;  %578 = vmax.xlane.f32.xlu0 %v577_v42 }
 0x5c4   :  { %v1072_v42 = vcvt.s32.f32 %v1070_v30 }
 0x5c6   :  { %v5288_v4 = vpop.xlane.xlu1 %1088 }
 0x5c7   :  { %vm1090_vm4 = vcmp.eq.f32.partialorder %v5060_v12, %v5288_v4 }
 0x5c8   :  { %v1091_v9 = vsel %vm1090_vm4, %v1086_v25, -inf  ;;  %v1584_v25 = vand.u32 65535, %v5110_v22 }
 0x5c9   :  { %1092 = vmax.xlane.f32.xlu1 %v1091_v9  ;;  %v1598_v9 = vand.u32 65535, %v5139_v34 }
 0x5cb   :  { %v5294_v55 = vpop.xlane.xlu0 %1102  ;;  %v1600_v30 = vcvt.s32.f32 %v1598_v9  ;;  %v2098_v9 = vand.u32 65535, %v5207_v50 }
 0x5cc   :  { %v5296_v59 = vpop.xlane.xlu1 %1060  ;;  %vm1104_vm3 = vcmp.eq.f32.partialorder %v5081_v15, %v5294_v55  ;;  %v1586_v15 = vcvt.s32.f32 %v1584_v25 }
 0x5cd   :  { %vm1062_vm8 = vcmp.eq.f32.partialorder %v5083_v37, %v5296_v59  ;;  %v1105_v12 = vsel %vm1104_vm3, %v1100_v56, -inf  ;;  %v1556_v37 = vand.u32 65535, %v5166_v23 }
 0x5ce   :  { %v1063_v44 = vsel %vm1062_vm8, %v1058_v29, -inf  ;;  %1106 = vmax.xlane.f32.xlu0 %v1105_v12 }
 0x5cf   :  { %1064 = vmax.xlane.f32.xlu1 %v1063_v44  ;;  %v5303_v31 = vpop.xlane.xlu0 %1074  ;;  %v1558_v44 = vcvt.s32.f32 %v1556_v37 }
 0x5d0   :  { %vm1076_vm0 = vcmp.eq.f32.partialorder %v5093_v38, %v5303_v31  ;;  %v1570_v38 = vand.u32 65535, %v5115_v47 }
 0x5d1   :  { %v1077_v63 = vsel %vm1076_vm0, %v1072_v42, -inf  ;;  %v2084_v42 = vand.u32 65535, %v5179_v10 }
 0x5d2   :  { %1078 = vmax.xlane.f32.xlu0 %v1077_v63 }
 0x5d3   :  { %v2086_v37 = vcvt.s32.f32 %v2084_v42 }
 0x5d4   :  { %v5308_v46 = vpop.xlane.xlu1 %1588 }
 0x5d5   :  { %vm1590_vm12 = vcmp.eq.f32.partialorder %v5147_v60, %v5308_v46 }
 0x5d6   :  { %v1591_v56 = vsel %vm1590_vm12, %v1586_v15, -inf  ;;  %v1572_v15 = vcvt.s32.f32 %v1570_v38  ;;  %v2100_v38 = vcvt.s32.f32 %v2098_v9 }
 0x5d7   :  { %1592 = vmax.xlane.f32.xlu1 %v1591_v56  ;;  %v2056_v56 = vand.u32 65535, %v5220_v52 }
 0x5d9   :  { %v5314_v29 = vpop.xlane.xlu0 %1602  ;;  %v2058_v42 = vcvt.s32.f32 %v2056_v56 }
 0x5da   :  { %vm1604_vm4 = vcmp.eq.f32.partialorder %v5174_v26, %v5314_v29 }
 0x5db   :  { %v5319_v12 = vpop.xlane.xlu1 %1560  ;;  %v1605_v25 = vsel %vm1604_vm4, %v1600_v30, -inf }
 0x5dc   :  { %vm1562_vm3 = vcmp.eq.f32.partialorder %v5184_v41, %v5319_v12  ;;  %1606 = vmax.xlane.f32.xlu0 %v1605_v25  ;;  %v2070_v25 = vand.u32 65535, %v5226_v43 }
 0x5dd   :  { %v1563_v60 = vsel %vm1562_vm3, %v1558_v44, -inf }
 0x5de   :  { %v5324_v63 = vpop.xlane.xlu0 %1574  ;;  %1564 = vmax.xlane.f32.xlu1 %v1563_v60 }
 0x5df   :  { %vm1576_vm8 = vcmp.eq.f32.partialorder %v5214_v16, %v5324_v63  ;;  %v5329_v26 = vpop.xlane.xlu1 %2088  ;;  %v1581_v7 = vcvt.f32.s32 %v5324_v63  ;;  %v6621_v63 = vsel %vm4931_vm15, %v3732_v11, %v4583_v58 }
 0x5e0   :  { %v1577_v30 = vsel %vm1576_vm8, %v1572_v15, -inf  ;;  %vm2090_vm0 = vcmp.eq.f32.partialorder %v5202_v20, %v5329_v26 }
 0x5e1   :  { %1578 = vmax.xlane.f32.xlu0 %v1577_v30  ;;  %v2091_v41 = vsel %vm2090_vm0, %v2086_v37, -inf  ;;  %v2072_v37 = vcvt.s32.f32 %v2070_v25  ;;  %vm6605_vm0 = vcmask 130048  }
 0x5e2   :  { %v5334_v44 = vpop.xlane.xlu0 %2102  ;;  %2092 = vmax.xlane.f32.xlu1 %v2091_v41  ;;  %vm6607_vm11 = vmmov %vm6605_vm0 }
 0x5e3   :  { %vm2104_vm12 = vcmp.eq.f32.partialorder %v5229_v21, %v5334_v44  ;;  %v5339_v16 = vpop.xlane.xlu1 %2060 }
 0x5e4   :  { %v2105_v60 = vsel %vm2104_vm12, %v2100_v38, -inf  ;;  %vm2062_vm4 = vcmp.eq.f32.partialorder %v5232_v36, %v5339_v16 }
 0x5e5   :  { %2106 = vmax.xlane.f32.xlu0 %v2105_v60  ;;  %v2063_v20 = vsel %vm2062_vm4, %v2058_v42, -inf  ;;  %vm6606_vm4 = vmmov %vm6605_vm0  ;;  %v2251_v60 = vld [vmem:[%s6325_s2 + $0x58] sm:$0xff] }
 0x5e6   :  { %v5343_v15 = vpop.xlane.xlu0 %2074  ;;  %2064 = vmax.xlane.f32.xlu1 %v2063_v20 }
 0x5e7   :  { %vm2076_vm3 = vcmp.eq.f32.partialorder %v5237_v39, %v5343_v15  ;;  %v2263_v9 = vpop.permute.xlu1 %2262 }
 0x5e8   :  { %v2077_v30 = vsel %vm2076_vm3, %v2072_v37, -inf  ;;  %vm2302_vm8 = vcmp.eq.s32.totalorder %v2263_v9, %v3699_v0  ;;  %v2362_v9 = vld [vmem:[#allocation6] sm:$0xff] }
 0x5e9   :  { %2078 = vmax.xlane.f32.xlu0 %v2077_v30  ;;  %v3149_v21 = vsel %vm2302_vm8, 1.0, %v6590_v54  ;;  %vm6608_vm8 = vmmov %vm6605_vm0 }
 0x5ea   :  { %2348 = vst.msk [vmem:[#allocation6 + $0x10] sm:$0xff] %vm6605_vm0, %v3149_v21 }
 0x5eb   :  { %v2266_v56 = vpop.permute.xlu1 %2265 }
 0x5ec   :  { %vm2303_vm12 = vcmp.eq.s32.totalorder %v2266_v56, %v3699_v0  ;;  %v2252_v56 = vld [vmem:[%s6325_s2 + $0x60] sm:$0xff] }
 0x5ed   :  { %v3150_v36 = vsel %vm2303_vm12, 1.0, %v6590_v54  ;;  %vm6609_vm12 = vmmov %vm6606_vm4 }
 0x5ee   :  { %2349 = vst.msk [vmem:[#allocation6 + $0x18] sm:$0xff] %vm6606_vm4, %v3150_v36  ;;  %v2260_v41 = vpop.permute.xlu0 %2259 }
 0x5ef   :  { %vm2301_vm5 = vcmp.eq.s32.totalorder %v2260_v41, %v3699_v0  ;;  %v2269_v39 = vpop.permute.xlu1 %2268 }
 0x5f0   :  { %v3148_v38 = vsel %vm2301_vm5, 1.0, %v6590_v54  ;;  %vm2304_vm3 = vcmp.eq.s32.totalorder %v2269_v39, %v3699_v0 }
 0x5f1   :  { %2347 = vst.msk [vmem:[#allocation6 + $0x8] sm:$0xff] %vm6607_vm11, %v3148_v38  ;;  %v3151_v25 = vsel %vm2304_vm3, 1.0, %v6590_v54  ;;  %vm6610_vm11 = vmmov %vm6606_vm4  ;;  %v2364_v39 = vld [vmem:[#allocation6 + $0x10] sm:$0xff] }
 0x5f2   :  { %2350 = vst.msk [vmem:[#allocation6 + $0x20] sm:$0xff] %vm6608_vm8, %v3151_v25  ;;  %vm6611_vm3 = vmmov %vm6608_vm8 }
 0x5f3   :  { %v2272_v42 = vpop.permute.xlu1 %2271 }
 0x5f4   :  { %vm2305_vm0 = vcmp.eq.s32.totalorder %v2272_v42, %v3699_v0  ;;  %v2250_v42 = vld [vmem:[%s6325_s2 + $0x50] sm:$0xff] }
 0x5f5   :  { %v3152_v20 = vsel %vm2305_vm0, 1.0, %v6590_v54  ;;  %v2365_v21 = vld [vmem:[#allocation6 + $0x18] sm:$0xff]  ;;  %vm6612_vm0 = vmmov %vm6611_vm3 }
 0x5f6   :  { %2351 = vst.msk [vmem:[#allocation6 + $0x28] sm:$0xff] %vm6609_vm12, %v3152_v20  ;;  %v2379_v38 = vpack.c.bf16 %v2365_v21, %v2364_v39 }
 0x5f7   :  { %2289 = vperm.xlu1 %3382, %v2251_v60   ;;  %v2275_v37 = vpop.permute.xlu1 %2274 }
 0x5f8   :  { %vm2306_vm5 = vcmp.eq.s32.totalorder %v2275_v37, %v3699_v0  ;;  %v2363_v30 = vld [vmem:[#allocation6 + $0x8] sm:$0xff] }
 0x5f9   :  { %v3153_v36 = vsel %vm2306_vm5, 1.0, %v6590_v54  ;;  %v2378_v41 = vpack.c.bf16 %v2363_v30, %v2362_v9  ;;  %v2366_v20 = vld [vmem:[#allocation6 + $0x20] sm:$0xff]  ;;  %vm6613_vm5 = vmmov %vm6612_vm0 }
 0x5fa   :  { %2352 = vst.msk [vmem:[#allocation6 + $0x30] sm:$0xff] %vm6610_vm11, %v3153_v36 }
 0x5fb   :  { %3258 = vmatprep.subr.bf16.mxu1 %v2378_v41  ;;  %2292 = vperm.xlu1 %3382, %v2252_v56   ;;  %v2278_v25 = vpop.permute.xlu1 %2277 }
 0x5fc   :  { %3259 = vmatpush3.bf16.msra.mxu1 %v2378_v41  ;;  %vm2307_vm4 = vcmp.eq.s32.totalorder %v2278_v25, %v3699_v0 }
 0x5fd   :  { %3260 = vmatprep.subr.bf16.mxu1 %v2379_v38  ;;  %v3154_v60 = vsel %vm2307_vm4, 1.0, %v6590_v54  ;;  %v2367_v37 = vld [vmem:[#allocation6 + $0x28] sm:$0xff] }
 0x5fe   :  { %2353 = vst.msk [vmem:[#allocation6 + $0x38] sm:$0xff] %vm6611_vm3, %v3154_v60  ;;  %v2380_v9 = vpack.c.bf16 %v2367_v37, %v2366_v20  ;;  %v595_v20 = vcvt.f32.s32 %v5269_v19  ;;  %v609_v37 = vcvt.f32.s32 %v5271_v53  ;;  %v1067_v19 = vcvt.f32.s32 %v5296_v59 }
 0x5ff   :  { %2286 = vperm.xlu0 %3383, %v2250_v42   ;;  %v2281_v30 = vpop.permute.xlu1 %2280 }
 0x600   :  { %3261 = vmatpush3.bf16.msra.mxu1 %v2379_v38  ;;  %vm2308_vm8 = vcmp.eq.s32.totalorder %v2281_v30, %v3699_v0  ;;  %v596_v30 = vshll.u32 %v595_v20, 16  ;;  %v610_v52 = vshll.u32 %v609_v37, 16 }
 0x601   :  { %v3155_v21 = vsel %vm2308_vm8, 1.0, %v6590_v54  ;;  %3262 = vmatprep.subr.bf16.mxu1 %v2380_v9  ;;  %v2368_v41 = vld [vmem:[#allocation6 + $0x30] sm:$0xff] }
 0x602   :  { %2354 = vst.msk [vmem:[#allocation6 + $0x40] sm:$0xff] %vm6612_vm0, %v3155_v21  ;;  %v567_v21 = vcvt.f32.s32 %v5279_v40 }
 0x603   :  { %v2284_v56 = vpop.permute.xlu1 %2283 }
 0x604   :  { %3263 = vmatpush3.bf16.msra.mxu1 %v2380_v9  ;;  %vm2309_vm12 = vcmp.eq.s32.totalorder %v2284_v56, %v3699_v0 }
 0x605   :  { %v3156_v36 = vsel %vm2309_vm12, 1.0, %v6590_v54  ;;  %v2369_v39 = vld [vmem:[#allocation6 + $0x38] sm:$0xff] }
 0x606   :  { %2355 = vst.msk [vmem:[#allocation6 + $0x48] sm:$0xff] %vm6613_vm5, %v3156_v36  ;;  %v2381_v25 = vpack.c.bf16 %v2369_v39, %v2368_v41  ;;  %v581_v36 = vcvt.f32.s32 %v5281_v49 }
 0x608   :  { %3264 = vmatprep.subr.bf16.mxu1 %v2381_v25  ;;  %v582_v10 = vshll.u32 %v581_v36, 16 }
 0x609   :  { %3265 = vmatpush3.bf16.msra.mxu1 %v2381_v25  ;;  %v2370_v38 = vld [vmem:[#allocation6 + $0x40] sm:$0xff]  ;;  %v1095_v25 = vcvt.f32.s32 %v5288_v4  ;;  %v1068_v4 = vshll.u32 %v1067_v19, 16 }
 0x60b   :  { %v1096_v54 = vshll.u32 %v1095_v25, 16 }
 0x60d   :  { %v2371_v42 = vld [vmem:[#allocation6 + $0x48] sm:$0xff] }
 0x60e   :  { %v2382_v60 = vpack.c.bf16 %v2371_v42, %v2370_v38  ;;  %v568_v42 = vshll.u32 %v567_v21, 16 }
 0x610   :  { %3266 = vmatprep.subr.bf16.mxu1 %v2382_v60 }
 0x611   :  { %3267 = vmatpush3.bf16.msra.mxu1 %v2382_v60  ;;  %v1109_v60 = vcvt.f32.s32 %v5294_v55  ;;  %v1081_v55 = vcvt.f32.s32 %v5303_v31  ;;  %v1595_v31 = vcvt.f32.s32 %v5308_v46 }
 0x64b   :  { %v593_v9 = vpop.xlane.xlu1 %592 }
 0x64c   :  { %v594_v56 = vcvt.f32.s32 %v593_v9  ;;  %v607_v43 = vpop.xlane.xlu0 %606 }
 0x64d   :  { %v608_v41 = vcvt.f32.s32 %v607_v43 }
 0x64e   :  { %v597_v39 = vadd.s32 %v596_v30, %v594_v56  ;;  %v1110_v56 = vshll.u32 %v1109_v60, 16 }
 0x64f   :  { %v611_v38 = vadd.s32 %v610_v52, %v608_v41 }
 0x650   :  { %v614_v53 = vand.u32 127, %v597_v39  ;;  %v565_v50 = vpop.xlane.xlu1 %564  ;;  %v579_v20 = vpop.xlane.xlu0 %578  ;;  %vm626_vm11 = vcmp.gt.s32.totalorder %v597_v39, 2147483648 }
 0x651   :  { %v615_v40 = vand.u32 127, %v611_v38  ;;  %v566_v9 = vcvt.f32.s32 %v565_v50  ;;  %v580_v47 = vcvt.f32.s32 %v579_v20  ;;  %vm627_vm3 = vcmp.gt.s32.totalorder %v611_v38, 2147483648 }
 0x652   :  { %v618_v37 = vsub.s32 127, %v614_v53 }
 0x653   :  { %v619_v49 = vsub.s32 127, %v615_v40  ;;  %v569_v43 = vadd.s32 %v568_v42, %v566_v9  ;;  %v583_v30 = vadd.s32 %v582_v10, %v580_v47  ;;  %v6614_v10 = vsel %vm4953_vm6, %v3707_v3, %v4606_v1  ;;  %v6626_v40 = vld [vmem:[#allocation15_spill] sm:$0xff] }
 0x654   :  { %vm622_vm4 = vcmp.eq.s32.totalorder %v3699_v0, %v618_v37  ;;  %v6615_v1 = vsel %vm4962_vm13, %v3723_v8, %v4616_v48  ;;  %v1609_v48 = vcvt.f32.s32 %v5314_v29 }
 0x655   :  { %v612_v59 = vand.u32 127, %v569_v43  ;;  %v613_v21 = vand.u32 127, %v583_v30  ;;  %vm638_vm8 = vmand %vm622_vm4, %vm626_vm11  ;;  %vm623_vm0 = vcmp.eq.s32.totalorder %v3699_v0, %v619_v49  ;;  %vm624_vm5 = vcmp.gt.s32.totalorder %v569_v43, 2147483648 }
 0x656   :  { %v1093_v52 = vpop.xlane.xlu1 %1092  ;;  %v5393_v50 = vsel %vm638_vm8, 2147483648, %v4969_v18  ;;  %v5402_v47 = vsel %vm638_vm8, %v3707_v3, %v6614_v10  ;;  %vm639_vm12 = vmand %vm623_vm0, %vm627_vm3  ;;  %vm625_vm4 = vcmp.gt.s32.totalorder %v583_v30, 2147483648  ;;  %v1082_v30 = vshll.u32 %v1081_v55, 16 }
 0x657   :  { %v1094_v36 = vcvt.f32.s32 %v1093_v52  ;;  %v616_v41 = vsub.s32 127, %v612_v59  ;;  %v617_v39 = vsub.s32 127, %v613_v21  ;;  %v677_v25 = vshra.s32 %v5393_v50, 16 }
 0x658   :  { %v5407_v38 = vsel %vm639_vm12, 2147483648, %v4980_v62  ;;  %v5415_v57 = vsel %vm639_vm12, %v3723_v8, %v6615_v1  ;;  %v1596_v52 = vshll.u32 %v1595_v31, 16 }
 0x659   :  { %v1097_v18 = vadd.s32 %v1096_v54, %v1094_v36  ;;  %v5417_v60 = vcvt.s32.f32 %v677_v25  ;;  %v691_v19 = vshra.s32 %v5407_v38, 16  ;;  %vm620_vm6 = vcmp.eq.s32.totalorder %v3699_v0, %v616_v41 }
 0x65a   :  { %vm621_vm11 = vcmp.eq.s32.totalorder %v3699_v0, %v617_v39  ;;  %vm636_vm3 = vmand %vm620_vm6, %vm624_vm5  ;;  %v6630_v39 = vld [vmem:[#allocation16_spill] sm:$0xff] }
 0x65b   :  { %v1107_v42 = vpop.xlane.xlu0 %1106  ;;  %v1114_v62 = vand.u32 127, %v1097_v18  ;;  %680 = vmax.xlane.f32.xlu1 %v5417_v60  ;;  %v5424_v53 = vcvt.s32.f32 %v691_v19  ;;  %v5427_v20 = vsel %vm636_vm3, 2147483648, %v5005_v33  ;;  %vm5429_vm13 = vmand %vm621_vm11, %vm625_vm4  ;;  %v6618_v33 = vsel %vm4984_vm9, %v3714_v5, %v4561_v28 }
 0x65c   :  { %v1065_v46 = vpop.xlane.xlu1 %1064  ;;  %v1108_v54 = vcvt.f32.s32 %v1107_v42  ;;  %v649_v43 = vshra.s32 %v5427_v20, 16  ;;  %v5438_v29 = vsel %vm5429_vm13, 2147483648, %v4950_v45  ;;  %vm1126_vm8 = vcmp.gt.s32.totalorder %v1097_v18, 2147483648 }
 0x65d   :  { %v1066_v2 = vcvt.f32.s32 %v1065_v46  ;;  %v1118_v9 = vsub.s32 127, %v1114_v62  ;;  %694 = vmax.xlane.f32.xlu0 %v5424_v53  ;;  %v663_v31 = vshra.s32 %v5438_v29, 16  ;;  %v1610_v45 = vshll.u32 %v1609_v48, 16  ;;  %v6625_v48 = vld [vmem:[#allocation17_spill] sm:$0xff] }
 0x65e   :  { %v1111_v37 = vadd.s32 %v1110_v56, %v1108_v54  ;;  %v5446_v56 = vsel %vm636_vm3, %v3714_v5, %v6618_v33  ;;  %v5449_v10 = vcvt.s32.f32 %v649_v43  ;;  %v5474_v1 = vsel %vm5429_vm13, %v3732_v11, %v6621_v63  ;;  %v6631_v63 = vld [vmem:[#allocation28_spill] sm:$0xff] }
 0x65f   :  { %v1069_v49 = vadd.s32 %v1068_v4, %v1066_v2  ;;  %v1079_v59 = vpop.xlane.xlu0 %1078  ;;  %v1567_v4 = vcvt.f32.s32 %v5319_v12  ;;  %vm1122_vm0 = vcmp.eq.s32.totalorder %v3699_v0, %v1118_v9  ;;  %v5459_v25 = vcvt.s32.f32 %v663_v31 }
 0x660   :  { %v1115_v55 = vand.u32 127, %v1111_v37  ;;  %v1080_v36 = vcvt.f32.s32 %v1079_v59  ;;  %vm5454_vm9 = vmand %vm1122_vm0, %vm1126_vm8  ;;  %652 = vmax.xlane.f32.xlu1 %v5449_v10  ;;  %vm1127_vm12 = vcmp.gt.s32.totalorder %v1111_v37, 2147483648  ;;  %v2109_v59 = vcvt.f32.s32 %v5334_v44 }
 0x661   :  { %v1112_v21 = vand.u32 127, %v1069_v49  ;;  %v5464_v18 = vsel %vm5454_vm9, 2147483648, %v5033_v13  ;;  %v2095_v13 = vcvt.f32.s32 %v5329_v26  ;;  %vm1124_vm11 = vcmp.gt.s32.totalorder %v1069_v49, 2147483648  ;;  %666 = vmax.xlane.f32.xlu0 %v5459_v25 }
 0x662   :  { %v1119_v41 = vsub.s32 127, %v1115_v55  ;;  %v1083_v12 = vadd.s32 %v1082_v30, %v1080_v36  ;;  %v1177_v46 = vshra.s32 %v5464_v18, 16  ;;  %v6624_v26 = vsel %vm5018_vm1, %v6496_v24, %v4669_v6 }
 0x663   :  { %v1116_v28 = vsub.s32 127, %v1112_v21  ;;  %v5498_v2 = vsel %vm5454_vm9, %v6496_v24, %v6624_v26  ;;  %v1568_v43 = vshll.u32 %v1567_v4, 16  ;;  %v1582_v30 = vshll.u32 %v1581_v7, 16  ;;  %v6636_v26 = vld [vmem:[#allocation35_spill] sm:$0xff] }
 0x664   :  { %v1593_v42 = vpop.xlane.xlu1 %1592  ;;  %vm1123_vm5 = vcmp.eq.s32.totalorder %v3699_v0, %v1119_v41  ;;  %v1113_v17 = vand.u32 127, %v1083_v12  ;;  %v5481_v58 = vcvt.s32.f32 %v1177_v46  ;;  %v2096_v55 = vshll.u32 %v2095_v13, 16 }
 0x665   :  { %vm1120_vm6 = vcmp.eq.s32.totalorder %v3699_v0, %v1116_v28  ;;  %v1594_v19 = vcvt.f32.s32 %v1593_v42  ;;  %vm1139_vm15 = vmand %vm1123_vm5, %vm1127_vm12  ;;  %vm1125_vm1 = vcmp.gt.s32.totalorder %v1083_v12, 2147483648  ;;  %v6632_v42 = vsel %vm5054_vm10, %v6630_v39, %v6631_v63 }
 0x666   :  { %v5484_v62 = vsel %vm1139_vm15, 2147483648, %v5069_v61  ;;  %vm5486_vm4 = vmand %vm1120_vm6, %vm1124_vm11  ;;  %v6627_v61 = vsel %vm5040_vm2, %v6625_v48, %v6626_v40  ;;  %v1117_v37 = vsub.s32 127, %v1113_v17  ;;  %1180 = vmax.xlane.f32.xlu1 %v5481_v58  ;;  %v2110_v46 = vshll.u32 %v2109_v59, 16 }
 0x667   :  { %v5506_v9 = vsel %vm1139_vm15, %v6625_v48, %v6627_v61  ;;  %v1597_v49 = vadd.s32 %v1596_v52, %v1594_v19  ;;  %v1191_v35 = vshra.s32 %v5484_v62, 16  ;;  %v5512_v6 = vsel %vm5486_vm4, 2147483648, %v5074_v32  ;;  %v6635_v19 = vld [vmem:[#allocation18_spill] sm:$0xff]  ;;  %v6664_v48 = vld [vmem:[#allocation45_spill] sm:$0xff] }
 0x668   :  { %6628 = vst [vmem:[#allocation15_spill] sm:$0xff] %v5506_v9  ;;  %v1149_v33 = vshra.s32 %v5512_v6, 16  ;;  %vm1121_vm2 = vcmp.eq.s32.totalorder %v3699_v0, %v1117_v37  ;;  %v2067_v32 = vcvt.f32.s32 %v5339_v16  ;;  %v5532_v12 = vsel %vm5486_vm4, %v6630_v39, %v6632_v42  ;;  %v6639_v42 = vld [vmem:[#allocation19_spill] sm:$0xff]  ;;  %v6667_v9 = vld [vmem:[#allocation36_spill] sm:$0xff] }
 0x669   :  { %v1607_v51 = vpop.xlane.xlu0 %1606  ;;  %v1614_v21 = vand.u32 127, %v1597_v49  ;;  %v5517_v31 = vcvt.s32.f32 %v1191_v35  ;;  %vm1137_vm3 = vmand %vm1121_vm2, %vm1125_vm1  ;;  %6633 = vst [vmem:[#allocation41_spill] sm:$0xff] %v5532_v12  ;;  %v6637_v40 = vsel %vm4997_vm14, %v6635_v19, %v6636_v26  ;;  %v2081_v54 = vcvt.f32.s32 %v5343_v15 }
 0x66a   :  { %v1608_v36 = vcvt.f32.s32 %v1607_v51  ;;  %v5519_v28 = vcvt.s32.f32 %v1149_v33  ;;  %v5536_v16 = vsel %vm1137_vm3, 2147483648, %v5048_v27  ;;  %v5544_v61 = vsel %vm1137_vm3, %v6635_v19, %v6637_v40 }
 0x66b   :  { %v1565_v52 = vpop.xlane.xlu1 %1564  ;;  %v1618_v44 = vsub.s32 127, %v1614_v21  ;;  %1194 = vmax.xlane.f32.xlu0 %v5517_v31  ;;  %vm1626_vm10 = vcmp.gt.s32.totalorder %v1597_v49, 2147483648  ;;  %v2068_v27 = vshll.u32 %v2067_v32, 16  ;;  %vm6638_vm8 = vnez %v6563_v14  ;;  %v6640_v49 = vld [vmem:[#allocation38_spill] sm:$0xff] }
 0x66c   :  { %v1566_v41 = vcvt.f32.s32 %v1565_v52  ;;  %v1611_v4 = vadd.s32 %v1610_v45, %v1608_v36  ;;  %1152 = vmax.xlane.f32.xlu1 %v5519_v28  ;;  %v2082_v32 = vshll.u32 %v2081_v54, 16  ;;  %vm6648_vm2 = vcmask 130048  }
 0x66d   :  { %vm1622_vm13 = vcmp.eq.s32.totalorder %v3699_v0, %v1618_v44 }
 0x66e   :  { %v1569_v13 = vadd.s32 %v1568_v43, %v1566_v41  ;;  %v1579_v17 = vpop.xlane.xlu0 %1578  ;;  %v1615_v37 = vand.u32 127, %v1611_v4  ;;  %v1163_v43 = vshra.s32 %v5536_v16, 16  ;;  %vm1638_vm14 = vmand %vm1622_vm13, %vm1626_vm10  ;;  %vm1627_vm0 = vcmp.gt.s32.totalorder %v1611_v4, 2147483648 }
 0x66f   :  { %v1580_v35 = vcvt.f32.s32 %v1579_v17  ;;  %v2093_v59 = vpop.xlane.xlu1 %2092  ;;  %v5552_v15 = vsel %vm1638_vm14, 2147483648, %v5110_v22  ;;  %v6641_v17 = vsel %vm6638_vm8, %v6639_v42, %v6640_v49 }
 0x670   :  { %v1612_v51 = vand.u32 127, %v1569_v13  ;;  %v2094_v33 = vcvt.f32.s32 %v2093_v59  ;;  %v1619_v21 = vsub.s32 127, %v1615_v37  ;;  %v5549_v52 = vcvt.s32.f32 %v1163_v43 }
 0x671   :  { %v1583_v36 = vadd.s32 %v1582_v30, %v1580_v35  ;;  %v5560_v45 = vsel %vm1638_vm14, %v6639_v42, %v6641_v17  ;;  %vm1624_vm12 = vcmp.gt.s32.totalorder %v1569_v13, 2147483648  ;;  %v6647_v17 = vmov 0.0   ;;  %v6677_v42 = vld [vmem:[#allocation21_spill] sm:$0xff] }
 0x672   :  { %v1616_v41 = vsub.s32 127, %v1612_v51  ;;  %v2097_v7 = vadd.s32 %v2096_v55, %v2094_v33  ;;  %v2107_v63 = vpop.xlane.xlu0 %2106  ;;  %6642 = vst [vmem:[#allocation28_spill] sm:$0xff] %v5560_v45  ;;  %1166 = vmax.xlane.f32.xlu0 %v5549_v52  ;;  %v1677_v55 = vshra.s32 %v5552_v15, 16  ;;  %vm1623_vm9 = vcmp.eq.s32.totalorder %v3699_v0, %v1619_v21  ;;  %v6678_v13 = vld [vmem:[#allocation29_spill] sm:$0xff]  ;;  %v6683_v45 = vld [vmem:[#allocation30_spill] sm:$0xff] }
 0x673   :  { %v1613_v44 = vand.u32 127, %v1583_v36  ;;  %v2108_v30 = vcvt.f32.s32 %v2107_v63  ;;  %v2065_v26 = vpop.xlane.xlu1 %2064  ;;  %vm5567_vm5 = vmand %vm1623_vm9, %vm1627_vm0  ;;  %vm1625_vm15 = vcmp.gt.s32.totalorder %v1583_v36, 2147483648 }
 0x674   :  { %v2114_v40 = vand.u32 127, %v2097_v7  ;;  %v2066_v22 = vcvt.f32.s32 %v2065_v26  ;;  %v5565_v37 = vcvt.s32.f32 %v1677_v55  ;;  %vm1620_vm6 = vcmp.eq.s32.totalorder %v3699_v0, %v1616_v41 }
 0x675   :  { %v2111_v14 = vadd.s32 %v2110_v46, %v2108_v30  ;;  %v1617_v54 = vsub.s32 127, %v1613_v44  ;;  %v5575_v4 = vsel %vm5567_vm5, 2147483648, %v5139_v34  ;;  %vm5577_vm11 = vmand %vm1620_vm6, %vm1624_vm12  ;;  %vm2126_vm4 = vcmp.gt.s32.totalorder %v2097_v7, 2147483648 }
 0x676   :  { %v2118_v59 = vsub.s32 127, %v2114_v40  ;;  %v2069_v43 = vadd.s32 %v2068_v27, %v2066_v22  ;;  %v2079_v51 = vpop.xlane.xlu0 %2078  ;;  %1680 = vmax.xlane.f32.xlu1 %v5565_v37  ;;  %v1691_v41 = vshra.s32 %v5575_v4, 16  ;;  %v5587_v34 = vsel %vm5577_vm11, 2147483648, %v5166_v23 }
 0x677   :  { %v2115_v46 = vand.u32 127, %v2111_v14  ;;  %v2080_v33 = vcvt.f32.s32 %v2079_v51  ;;  %v2290_v21 = vpop.permute.xlu1 %2289  ;;  %v1649_v55 = vshra.s32 %v5587_v34, 16  ;;  %vm1621_vm3 = vcmp.eq.s32.totalorder %v3699_v0, %v1617_v54  ;;  %v6651_v54 = vld [vmem:[#allocation43_spill] sm:$0xff]  ;;  %v2253_v51 = vld [vmem:[%s6325_s2 + $0x68] sm:$0xff] }
 0x678   :  { %v2112_v27 = vand.u32 127, %v2069_v43  ;;  %vm2311_vm1 = vcmp.eq.s32.totalorder %v2290_v21, %v3699_v0  ;;  %v5590_v30 = vcvt.s32.f32 %v1691_v41  ;;  %vm2122_vm10 = vcmp.eq.s32.totalorder %v3699_v0, %v2118_v59  ;;  %vm5598_vm8 = vmand %vm1621_vm3, %vm1625_vm15  ;;  %v6654_v21 = vld [vmem:[#allocation48_spill] sm:$0xff] }
 0x679   :  { %v2119_v63 = vsub.s32 127, %v2115_v46  ;;  %v2083_v49 = vadd.s32 %v2082_v32, %v2080_v33  ;;  %v3158_v44 = vsel %vm2311_vm1, 1.0, %v6647_v17  ;;  %vm2127_vm13 = vcmp.gt.s32.totalorder %v2111_v14, 2147483648  ;;  %vm5612_vm12 = vmand %vm2122_vm10, %vm2126_vm4  ;;  %v6685_v32 = vld [vmem:[#allocation46_spill] sm:$0xff]  ;;  %v6695_v14 = vld [vmem:[#allocation49_spill] sm:$0xff] }
 0x67a   :  { %v2116_v26 = vsub.s32 127, %v2112_v27  ;;  %2357 = vst.msk [vmem:[#allocation6 + $0x58] sm:$0xff] %vm6648_vm2, %v3158_v44  ;;  %vm2124_vm14 = vcmp.gt.s32.totalorder %v2069_v43, 2147483648  ;;  %1694 = vmax.xlane.f32.xlu0 %v5590_v30  ;;  %v5603_v22 = vcvt.s32.f32 %v1649_v55  ;;  %v5609_v59 = vsel %vm5598_vm8, 2147483648, %v6651_v54  ;;  %vm6657_vm1 = vmmov %vm6648_vm2  ;;  %v6658_v44 = vld [vmem:[#allocation32_spill] sm:$0xff] }
 0x67b   :  { %v2113_v40 = vand.u32 127, %v2083_v49  ;;  %v2293_v23 = vpop.permute.xlu1 %2292  ;;  %vm2123_vm0 = vcmp.eq.s32.totalorder %v3699_v0, %v2119_v63  ;;  %v1663_v33 = vshra.s32 %v5609_v59, 16  ;;  %v5622_v41 = vsel %vm5612_vm12, 2147483648, %v6654_v21 }
 0x67c   :  { %vm2312_vm9 = vcmp.eq.s32.totalorder %v2293_v23, %v3699_v0  ;;  %vm2120_vm6 = vcmp.eq.s32.totalorder %v3699_v0, %v2116_v26  ;;  %vm5625_vm15 = vmand %vm2123_vm0, %vm2127_vm13  ;;  %vm2125_vm4 = vcmp.gt.s32.totalorder %v2083_v49, 2147483648  ;;  %1652 = vmax.xlane.f32.xlu1 %v5603_v22  ;;  %v2177_v63 = vshra.s32 %v5622_v41, 16  ;;  %v6661_v23 = vld [vmem:[#allocation39_spill] sm:$0xff] }
 0x67d   :  { %v2117_v36 = vsub.s32 127, %v2113_v40  ;;  %v3159_v46 = vsel %vm2312_vm9, 1.0, %v6647_v17  ;;  %v5635_v26 = vsel %vm5625_vm15, 2147483648, %v6658_v44  ;;  %vm5638_vm2 = vmand %vm2120_vm6, %vm2124_vm14  ;;  %v5642_v55 = vcvt.s32.f32 %v1663_v33  ;;  %v6663_v44 = vld [vmem:[#allocation40_spill] sm:$0xff] }
 0x67e   :  { %2358 = vst.msk [vmem:[#allocation6 + $0x60] sm:$0xff] %vm6657_vm1, %v3159_v46  ;;  %v2287_v7 = vpop.permute.xlu0 %2286  ;;  %v2191_v40 = vshra.s32 %v5635_v26, 16  ;;  %v5649_v54 = vsel %vm5638_vm2, 2147483648, %v6661_v23  ;;  %v5652_v21 = vcvt.s32.f32 %v2177_v63  ;;  %vm6662_vm13 = vmmov %vm6657_vm1  ;;  %vm6665_vm0 = vnez %v6664_v48 }
 0x67f   :  { %vm2310_vm3 = vcmp.eq.s32.totalorder %v2287_v7, %v3699_v0  ;;  %v2149_v43 = vshra.s32 %v5649_v54, 16  ;;  %vm2121_vm10 = vcmp.eq.s32.totalorder %v3699_v0, %v2117_v36  ;;  %1666 = vmax.xlane.f32.xlu0 %v5642_v55  ;;  %v6666_v36 = vld [vmem:[#allocation20_spill] sm:$0xff] }
 0x680   :  { %v3157_v46 = vsel %vm2310_vm3, 1.0, %v6647_v17  ;;  %v5658_v33 = vcvt.s32.f32 %v2191_v40  ;;  %vm2137_vm14 = vmand %vm2121_vm10, %vm2125_vm4  ;;  %2180 = vmax.xlane.f32.xlu1 %v5652_v21  ;;  %v6668_v39 = vsel %vm6665_vm0, %v6666_v36, %v6667_v9  ;;  %v6675_v9 = vld [vmem:[#allocation44_spill] sm:$0xff] }
 0x681   :  { %2356 = vst.msk [vmem:[#allocation6 + $0x50] sm:$0xff] %vm6662_vm13, %v3157_v46  ;;  %v5662_v7 = vcvt.s32.f32 %v2149_v43  ;;  %v5665_v23 = vsel %vm2137_vm14, 2147483648, %v6663_v44  ;;  %v5676_v40 = vsel %vm5577_vm11, %v6666_v36, %v6668_v39  ;;  %v6669_v46 = vld [vmem:[#allocation42_spill] sm:$0xff]  ;;  %v6672_v44 = vld [vmem:[#allocation37_spill] sm:$0xff]  ;;  %vm6676_vm6 = vnez %v6675_v9 }
 0x682   :  { %v2163_v63 = vshra.s32 %v5665_v23, 16  ;;  %vm6670_vm9 = vnez %v6669_v46  ;;  %v6671_v43 = vld [vmem:[#allocation22_spill] sm:$0xff]  ;;  %v6679_v39 = vsel %vm6676_vm6, %v6677_v42, %v6678_v13  ;;  %vm6686_vm11 = vnez %v6685_v32  ;;  %v6688_v13 = vld [vmem:[#allocation31_spill] sm:$0xff]  ;;  %v6693_v46 = vld [vmem:[#allocation33_spill] sm:$0xff] }
 0x683   :  { %2194 = vmax.xlane.f32.xlu0 %v5658_v33  ;;  %v6673_v12 = vsel %vm6670_vm9, %v6671_v43, %v6672_v44  ;;  %v6682_v44 = vld [vmem:[#allocation24_spill] sm:$0xff]  ;;  %v6687_v9 = vld [vmem:[#allocation26_spill] sm:$0xff]  ;;  %v6698_v32 = vld [vmem:[#allocation27_spill] sm:$0xff]  ;;  %vm6700_vm9 = vcmask 130048  }
 0x684   :  { %v5679_v49 = vcvt.s32.f32 %v2163_v63  ;;  %v5689_v48 = vsel %vm5598_vm8, %v6671_v43, %v6673_v12  ;;  %v5699_v63 = vsel %vm5567_vm5, %v6677_v42, %v6679_v39  ;;  %2152 = vmax.xlane.f32.xlu1 %v5662_v7  ;;  %v6684_v36 = vsel %vm5197_vm7, %v6682_v44, %v6683_v45  ;;  %v6690_v39 = vld [vmem:[#allocation47_spill] sm:$0xff] }
 0x685   :  { %6674 = vst [vmem:[#allocation34_spill] sm:$0xff] %v5689_v48  ;;  %6680 = vst [vmem:[#allocation18_spill] sm:$0xff] %v5699_v63  ;;  %v5710_v12 = vsel %vm5638_vm2, %v6682_v44, %v6684_v36  ;;  %v6689_v43 = vsel %vm6686_vm11, %v6687_v9, %v6688_v13  ;;  %vm6691_vm5 = vnez %v6690_v39  ;;  %v6692_v42 = vld [vmem:[#allocation23_spill] sm:$0xff]  ;;  %vm6696_vm7 = vnez %v6695_v14  ;;  %v6697_v36 = vld [vmem:[#allocation25_spill] sm:$0xff] }
 0x686   :  { %v5718_v35 = vsel %vm2137_vm14, %v6687_v9, %v6689_v43  ;;  %v6694_v63 = vsel %vm6691_vm5, %v6692_v42, %v6693_v46  ;;  %v6699_v48 = vsel %vm6696_vm7, %v6697_v36, %v6698_v32  ;;  %v2373_v39 = vld [vmem:[#allocation6 + $0x58] sm:$0xff] }
 0x687   :  { %v5728_v45 = vsel %vm5612_vm12, %v6692_v42, %v6694_v63  ;;  %v5738_v43 = vsel %vm5625_vm15, %v6697_v36, %v6699_v48  ;;  %2166 = vmax.xlane.f32.xlu0 %v5679_v49  ;;  %v676_v63 = vand.u32 65535, %v5393_v50 }
 0x688   :  { %v2372_v13 = vld [vmem:[#allocation6 + $0x50] sm:$0xff] }
 0x689   :  { %v2383_v46 = vpack.c.bf16 %v2373_v39, %v2372_v13  ;;  %v678_v32 = vcvt.s32.f32 %v676_v63  ;;  %v648_v13 = vand.u32 65535, %v5427_v20  ;;  %v662_v39 = vand.u32 65535, %v5438_v29 }
 0x68b   :  { %3268 = vmatprep.subr.bf16.mxu1 %v2383_v46  ;;  %v650_v36 = vcvt.s32.f32 %v648_v13 }
 0x68c   :  { %3269 = vmatpush3.bf16.msra.mxu1 %v2383_v46 }
 0x69d   :  { %2295 = vperm.xlu0 %3383, %v2253_v51   ;;  %v690_v51 = vand.u32 65535, %v5407_v38 }
 0x69f   :  { %v692_v29 = vcvt.s32.f32 %v690_v51 }
 0x6e8   :  { %v5745_v14 = vpop.xlane.xlu1 %680 }
 0x6e9   :  { %vm682_vm8 = vcmp.eq.f32.partialorder %v5417_v60, %v5745_v14  ;;  %v664_v60 = vcvt.s32.f32 %v662_v39 }
 0x6ea   :  { %v5749_v27 = vpop.xlane.xlu0 %694  ;;  %v683_v48 = vsel %vm682_vm8, %v678_v32, -inf }
 0x6eb   :  { %684 = vmax.xlane.f32.xlu0 %v683_v48  ;;  %vm696_vm4 = vcmp.eq.f32.partialorder %v5424_v53, %v5749_v27 }
 0x6ec   :  { %v697_v32 = vsel %vm696_vm4, %v692_v29, -inf }
 0x6ed   :  { %v5753_v46 = vpop.xlane.xlu1 %652 }
 0x6ee   :  { %vm654_vm12 = vcmp.eq.f32.partialorder %v5449_v10, %v5753_v46  ;;  %v5758_v50 = vpop.xlane.xlu0 %666  ;;  %v1162_v10 = vand.u32 65535, %v5536_v16  ;;  %v2254_v16 = vld [vmem:[%s6325_s2 + $0x70] sm:$0xff]  ;;  %s3568_s2 = smov [#allocation7]  }
 0x6ef   :  { %v655_v63 = vsel %vm654_vm12, %v650_v36, -inf  ;;  %vm668_vm15 = vcmp.eq.f32.partialorder %v5459_v25, %v5758_v50  ;;  %v1176_v25 = vand.u32 65535, %v5464_v18  ;;  %s3117_s21 = sshll.u32 %s3568_s2, 4  ;;  %s3118_s21 = int_to_ptr.vmem [resolvable:$true] %s3117_s21 }
 0x6f0   :  { %656 = vmax.xlane.f32.xlu0 %v655_v63  ;;  %v669_v20 = vsel %vm668_vm15, %v664_v60, -inf  ;;  %v1164_v39 = vcvt.s32.f32 %v1162_v10  ;;  %s3518_s22 = scalar_lea.vmem %s3118_s21, 16  ;;  %s3522_s1 = scalar_lea.vmem %s3118_s21, 32 }
 0x6f1   :  { %670 = vmax.xlane.f32.xlu1 %v669_v20  ;;  %v1178_v51 = vcvt.s32.f32 %v1176_v25  ;;  %v1648_v20 = vand.u32 65535, %v5587_v34  ;;  %v2148_v25 = vand.u32 65535, %v5649_v54  ;;  %p3519_p0 = scmp.ne.s32.totalorder %s3118_s21, %s3518_s22  ;;  %p3523_p1 = scmp.lt.s32.totalorder %s3118_s21, %s3118_s21 }
 0x6f2   :  { %p3524_p2 = scmp.lt.s32.totalorder %s3522_s1, %s3518_s22 }
 0x6f3   :  { %v5764_v48 = vpop.xlane.xlu1 %1180  ;;  %v1650_v29 = vcvt.s32.f32 %v1648_v20 }
 0x6f4   :  { %698 = vmax.xlane.f32.xlu0 %v697_v32  ;;  %vm1182_vm2 = vcmp.eq.f32.partialorder %v5481_v58, %v5764_v48  ;;  %v1676_v58 = vand.u32 65535, %v5552_v15  ;;  %v2150_v15 = vcvt.s32.f32 %v2148_v25  ;;  %v1190_v25 = vand.u32 65535, %v5484_v62  ;;  %p3525_p3 = por %p3524_p2, %p3523_p1 }
 0x6f5   :  { %v1183_v60 = vsel %vm1182_vm2, %v1178_v51, -inf }
 0x6f6   :  { %v1678_v34 = vcvt.s32.f32 %v1676_v58  ;;  %v1148_v58 = vand.u32 65535, %v5512_v6  ;;  %p3526_p4 = pnand %p3525_p3, %p3519_p0 }
 0x6f8   :  { %v5766_v38 = vpop.xlane.xlu0 %1194 }
 0x6f9   :  { %v5769_v36 = vpop.xlane.xlu1 %1152  ;;  %vm1196_vm11 = vcmp.eq.f32.partialorder %v5517_v31, %v5766_v38  ;;  %v2162_v31 = vand.u32 65535, %v5665_v23 }
 0x6fa   :  { %vm1154_vm6 = vcmp.eq.f32.partialorder %v5519_v28, %v5769_v36 }
 0x6ff   :  { %v5771_v13 = vpop.xlane.xlu0 %1166 }
 0x700   :  { %vm1168_vm1 = vcmp.eq.f32.partialorder %v5549_v52, %v5771_v13 }
 0x701   :  { %v1169_v53 = vsel %vm1168_vm1, %v1164_v39, -inf }
 0x702   :  { %1170 = vmax.xlane.f32.xlu0 %v1169_v53  ;;  %2298 = vperm.xlu1 %3382, %v2254_v16   ;;  %v2176_v16 = vand.u32 65535, %v5622_v41 }
 0x703   :  { %v5778_v63 = vpop.xlane.xlu1 %1680 }
 0x704   :  { %vm1682_vm10 = vcmp.eq.f32.partialorder %v5565_v37, %v5778_v63 }
 0x705   :  { %v1683_v53 = vsel %vm1682_vm10, %v1678_v34, -inf  ;;  %v1150_v34 = vcvt.s32.f32 %v1148_v58 }
 0x706   :  { %1184 = vmax.xlane.f32.xlu0 %v1183_v60  ;;  %v2178_v60 = vcvt.s32.f32 %v2176_v16  ;;  %v1662_v16 = vand.u32 65535, %v5609_v59  ;;  %v2164_v59 = vcvt.s32.f32 %v2162_v31 }
 0x707   :  { %v5784_v18 = vpop.xlane.xlu0 %1694 }
 0x708   :  { %v1664_v28 = vcvt.s32.f32 %v1662_v16  ;;  %vm1696_vm7 = vcmp.eq.f32.partialorder %v5590_v30, %v5784_v18  ;;  %v687_v30 = vcvt.f32.s32 %v5745_v14 }
 0x709   :  { %v5786_v52 = vpop.xlane.xlu1 %1652 }
 0x70a   :  { %vm1654_vm3 = vcmp.eq.f32.partialorder %v5603_v22, %v5786_v52  ;;  %v688_v23 = vshll.u32 %v687_v30, 16 }
 0x70b   :  { %v1655_v32 = vsel %vm1654_vm3, %v1650_v29, -inf }
 0x70c   :  { %v5793_v10 = vpop.xlane.xlu0 %1666  ;;  %1656 = vmax.xlane.f32.xlu0 %v1655_v32 }
 0x70d   :  { %v5795_v39 = vpop.xlane.xlu1 %2180  ;;  %vm1668_vm5 = vcmp.eq.f32.partialorder %v5642_v55, %v5793_v10  ;;  %v2190_v55 = vand.u32 65535, %v5635_v26 }
 0x70e   :  { %vm2182_vm14 = vcmp.eq.f32.partialorder %v5652_v21, %v5795_v39 }
 0x70f   :  { %v2183_v20 = vsel %vm2182_vm14, %v2178_v60, -inf  ;;  %v1669_v60 = vsel %vm1668_vm5, %v1664_v28, -inf }
 0x710   :  { %1684 = vmax.xlane.f32.xlu0 %v1683_v53  ;;  %v5801_v22 = vpop.xlane.xlu0 %2194  ;;  %v1155_v53 = vsel %vm1154_vm6, %v1150_v34, -inf }
 0x711   :  { %v5798_v51 = vpop.xlane.xlu1 %2152  ;;  %vm2196_vm12 = vcmp.eq.f32.partialorder %v5658_v33, %v5801_v22  ;;  %v701_v33 = vcvt.f32.s32 %v5749_v27 }
 0x712   :  { %vm2154_vm13 = vcmp.eq.f32.partialorder %v5662_v7, %v5798_v51  ;;  %v2374_v7 = vld [vmem:[#allocation6 + $0x60] sm:$0xff] }
 0x713   :  { %v2155_v37 = vsel %vm2154_vm13, %v2150_v15, -inf  ;;  %v1192_v15 = vcvt.s32.f32 %v1190_v25  ;;  %v702_v31 = vshll.u32 %v701_v33, 16  ;;  %vm6703_vm13 = vmmov %vm6700_vm9 }
 0x714   :  { %2156 = vmax.xlane.f32.xlu0 %v2155_v37  ;;  %v5807_v54 = vpop.xlane.xlu0 %2166  ;;  %v1690_v37 = vand.u32 65535, %v5575_v4  ;;  %v2192_v4 = vcvt.s32.f32 %v2190_v55 }
 0x715   :  { %v1197_v6 = vsel %vm1196_vm11, %v1192_v15, -inf  ;;  %vm2168_vm8 = vcmp.eq.f32.partialorder %v5679_v49, %v5807_v54 }
 0x716   :  { %v1692_v62 = vcvt.s32.f32 %v1690_v37  ;;  %v1687_v37 = vcvt.f32.s32 %v5778_v63 }
 0x718   :  { %2184 = vmax.xlane.f32.xlu0 %v2183_v20  ;;  %v1697_v20 = vsel %vm1696_vm7, %v1692_v62, -inf }
 0x71c   :  { %v2296_v29 = vpop.permute.xlu0 %2295 }
 0x71d   :  { %vm2313_vm0 = vcmp.eq.s32.totalorder %v2296_v29, %v3699_v0  ;;  %v2169_v29 = vsel %vm2168_vm8, %v2164_v59, -inf }
 0x71e   :  { %v3160_v41 = vsel %vm2313_vm0, 1.0, %v6647_v17 }
 0x71f   :  { %2359 = vst.msk [vmem:[#allocation6 + $0x68] sm:$0xff] %vm6700_vm9, %v3160_v41  ;;  %v2197_v41 = vsel %vm2196_vm12, %v2192_v4, -inf }
 0x726   :  { %v2375_v21 = vld [vmem:[#allocation6 + $0x68] sm:$0xff]  ;;  %1156 = vmax.xlane.f32.xlu1 %v1155_v53 }
 0x727   :  { %v2384_v32 = vpack.c.bf16 %v2375_v21, %v2374_v7  ;;  %v659_v21 = vcvt.f32.s32 %v5753_v46 }
 0x729   :  { %3270 = vmatprep.subr.bf16.mxu1 %v2384_v32  ;;  %v660_v25 = vshll.u32 %v659_v21, 16  ;;  %v2377_v21 = vld [vmem:[#allocation6 + $0x78] sm:$0xff] }
 0x72a   :  { %3271 = vmatpush3.bf16.msra.mxu1 %v2384_v32  ;;  %1198 = vmax.xlane.f32.xlu1 %v1197_v6  ;;  %v673_v32 = vcvt.f32.s32 %v5758_v50 }
 0x72c   :  { %v674_v16 = vshll.u32 %v673_v32, 16 }
 0x72e   :  { %1670 = vmax.xlane.f32.xlu1 %v1669_v60 }
 0x732   :  { %1698 = vmax.xlane.f32.xlu1 %v1697_v20 }
 0x736   :  { %2170 = vmax.xlane.f32.xlu1 %v2169_v29 }
 0x73a   :  { %2198 = vmax.xlane.f32.xlu1 %v2197_v41 }
 0x778   :  { %v685_v58 = vpop.xlane.xlu0 %684 }
 0x779   :  { %v686_v7 = vcvt.f32.s32 %v685_v58  ;;  %v1173_v58 = vcvt.f32.s32 %v5771_v13  ;;  %v1187_v13 = vcvt.f32.s32 %v5764_v48 }
 0x77b   :  { %v689_v49 = vadd.s32 %v688_v23, %v686_v7 }
 0x77d   :  { %v706_v34 = vand.u32 127, %v689_v49  ;;  %v657_v26 = vpop.xlane.xlu0 %656  ;;  %vm718_vm4 = vcmp.gt.s32.totalorder %v689_v49, 2147483648  ;;  %v1174_v49 = vshll.u32 %v1173_v58, 16 }
 0x77e   :  { %v658_v15 = vcvt.f32.s32 %v657_v26  ;;  %v671_v6 = vpop.xlane.xlu1 %670 }
 0x77f   :  { %v710_v53 = vsub.s32 127, %v706_v34  ;;  %v672_v14 = vcvt.f32.s32 %v671_v6 }
 0x780   :  { %v661_v28 = vadd.s32 %v660_v25, %v658_v15  ;;  %v1188_v25 = vshll.u32 %v1187_v13, 16 }
 0x781   :  { %vm714_vm15 = vcmp.eq.s32.totalorder %v3699_v0, %v710_v53  ;;  %v699_v46 = vpop.xlane.xlu0 %698  ;;  %v675_v50 = vadd.s32 %v674_v16, %v672_v14  ;;  %v1659_v16 = vcvt.f32.s32 %v5786_v52 }
 0x782   :  { %vm5835_vm1 = vmand %vm714_vm15, %vm718_vm4  ;;  %v704_v60 = vand.u32 127, %v661_v28  ;;  %v700_v62 = vcvt.f32.s32 %v699_v46  ;;  %v2299_v20 = vpop.permute.xlu1 %2298  ;;  %vm716_vm10 = vcmp.gt.s32.totalorder %v661_v28, 2147483648 }
 0x783   :  { %v734_v27 = vsel %vm5835_vm1, %v3707_v3, %v5402_v47  ;;  %v705_v59 = vand.u32 127, %v675_v50  ;;  %vm2314_vm2 = vcmp.eq.s32.totalorder %v2299_v20, %v3699_v0  ;;  %vm717_vm9 = vcmp.gt.s32.totalorder %v675_v50, 2147483648 }
 0x784   :  { %v708_v55 = vsub.s32 127, %v704_v60  ;;  %v3161_v29 = vsel %vm2314_vm2, 1.0, %v6647_v17  ;;  %v703_v4 = vadd.s32 %v702_v31, %v700_v62  ;;  %v1660_v52 = vshll.u32 %v1659_v16, 16 }
 0x785   :  { %v709_v41 = vsub.s32 127, %v705_v59  ;;  %2360 = vst.msk [vmem:[#allocation6 + $0x70] sm:$0xff] %vm6703_vm13, %v3161_v29  ;;  %v2159_v62 = vcvt.f32.s32 %v5798_v51 }
 0x786   :  { %vm712_vm3 = vcmp.eq.s32.totalorder %v3699_v0, %v708_v55  ;;  %v707_v30 = vand.u32 127, %v703_v4  ;;  %vm719_vm5 = vcmp.gt.s32.totalorder %v703_v4, 2147483648  ;;  %v2187_v4 = vcvt.f32.s32 %v5795_v39 }
 0x787   :  { %vm728_vm14 = vmand %vm712_vm3, %vm716_vm10  ;;  %vm713_vm0 = vcmp.eq.s32.totalorder %v3699_v0, %v709_v41  ;;  %v2160_v41 = vshll.u32 %v2159_v62, 16  ;;  %v1673_v62 = vcvt.f32.s32 %v5793_v10  ;;  %v6720_v10 = vld [vmem:[#allocation16_spill] sm:$0xff] }
 0x788   :  { %v732_v3 = vsel %vm728_vm14, %v3714_v5, %v5446_v56  ;;  %vm729_vm6 = vmand %vm713_vm0, %vm717_vm9  ;;  %v711_v47 = vsub.s32 127, %v707_v30  ;;  %v2188_v13 = vshll.u32 %v2187_v4, 16  ;;  %v1701_v4 = vcvt.f32.s32 %v5784_v18 }
 0x789   :  { %v733_v17 = vsel %vm729_vm6, %v3732_v11, %v5474_v1 }
 0x78a   :  { %vm715_vm11 = vcmp.eq.s32.totalorder %v3699_v0, %v711_v47  ;;  %v5854_v7 = vpack.c.bf16 %v733_v17, %v732_v3 }
 0x78b   :  { %vm731_vm7 = vmand %vm715_vm11, %vm719_vm5 }
 0x78c   :  { %3274 = vmatprep.mubr.bf16.mxu1 %v5854_v7  ;;  %3338 = vmatprep.mubr.bf16.mxu0 %v5854_v7  ;;  %v2376_v5 = vld [vmem:[#allocation6 + $0x70] sm:$0xff]  ;;  %v735_v11 = vsel %vm731_vm7, %v3723_v8, %v5415_v57  ;;  %v2201_v8 = vcvt.f32.s32 %v5801_v22 }
 0x78d   :  { %v2385_v1 = vpack.c.bf16 %v2377_v21, %v2376_v5  ;;  %v5861_v34 = vpack.c.bf16 %v735_v11, %v734_v27  ;;  %v1688_v27 = vshll.u32 %v1687_v37, 16  ;;  %v1201_v37 = vcvt.f32.s32 %v5766_v38  ;;  %v6723_v22 = vld [vmem:[#allocation34_spill] sm:$0xff] }
 0x78f   :  { %v1171_v23 = vpop.xlane.xlu0 %1170  ;;  %3272 = vmatprep.subr.bf16.mxu1 %v2385_v1 }
 0x790   :  { %v1172_v32 = vcvt.f32.s32 %v1171_v23  ;;  %3273 = vmatpush3.bf16.msra.mxu1 %v2385_v1  ;;  %v6710_v23 = vld [vmem:[#allocation20_spill] sm:$0xff] }
 0x791   :  { %v6713_v1 = vld [vmem:[#allocation28_spill] sm:$0xff] }
 0x792   :  { %v1175_v56 = vadd.s32 %v1174_v49, %v1172_v32 }
 0x793   :  { %v1185_v26 = vpop.xlane.xlu0 %1184  ;;  %3275 = vmatmul.mubr.bf16.vlgmr.msra.gmra.mrb[0].mxu1 %v5861_v34 }
 0x794   :  { %v1205_v53 = vand.u32 127, %v1175_v56  ;;  %v1186_v15 = vcvt.f32.s32 %v1185_v26  ;;  %vm1217_vm12 = vcmp.gt.s32.totalorder %v1175_v56, 2147483648  ;;  %v6714_v26 = vld [vmem:[#allocation19_spill] sm:$0xff] }
 0x796   :  { %v1209_v48 = vsub.s32 127, %v1205_v53  ;;  %v1189_v33 = vadd.s32 %v1188_v25, %v1186_v15 }
 0x798   :  { %vm1213_vm8 = vcmp.eq.s32.totalorder %v3699_v0, %v1209_v48  ;;  %v1206_v6 = vand.u32 127, %v1189_v33  ;;  %vm1218_vm1 = vcmp.gt.s32.totalorder %v1189_v33, 2147483648 }
 0x799   :  { %vm5866_vm15 = vmand %vm1213_vm8, %vm1217_vm12  ;;  %v1657_v14 = vpop.xlane.xlu0 %1656 }
 0x79a   :  { %v1210_v57 = vsub.s32 127, %v1206_v6  ;;  %v1233_v28 = vsel %vm5866_vm15, %v6635_v19, %v5544_v61  ;;  %v1658_v46 = vcvt.f32.s32 %v1657_v14 }
 0x79c   :  { %vm1214_vm4 = vcmp.eq.s32.totalorder %v3699_v0, %v1210_v57  ;;  %v1661_v60 = vadd.s32 %v1660_v52, %v1658_v46  ;;  %v1159_v57 = vcvt.f32.s32 %v5769_v36 }
 0x79d   :  { %vm5876_vm2 = vmand %vm1214_vm4, %vm1218_vm1  ;;  %v1685_v31 = vpop.xlane.xlu0 %1684 }
 0x79e   :  { %v1234_v20 = vsel %vm5876_vm2, %v6496_v24, %v5498_v2  ;;  %v1704_v63 = vand.u32 127, %v1661_v60  ;;  %v1686_v59 = vcvt.f32.s32 %v1685_v31  ;;  %vm1716_vm10 = vcmp.gt.s32.totalorder %v1661_v60, 2147483648 }
 0x79f   :  { %v1160_v52 = vshll.u32 %v1159_v57, 16 }
 0x7a0   :  { %v1708_v55 = vsub.s32 127, %v1704_v63  ;;  %v1689_v29 = vadd.s32 %v1688_v27, %v1686_v59  ;;  %v1202_v27 = vshll.u32 %v1201_v37, 16 }
 0x7a1   :  { %v2157_v30 = vpop.xlane.xlu0 %2156 }
 0x7a2   :  { %vm1712_vm3 = vcmp.eq.s32.totalorder %v3699_v0, %v1708_v55  ;;  %v1706_v58 = vand.u32 127, %v1689_v29  ;;  %v2158_v51 = vcvt.f32.s32 %v2157_v30  ;;  %vm1718_vm0 = vcmp.gt.s32.totalorder %v1689_v29, 2147483648 }
 0x7a3   :  { %vm5887_vm13 = vmand %vm1712_vm3, %vm1716_vm10 }
 0x7a4   :  { %v1710_v47 = vsub.s32 127, %v1706_v58  ;;  %v2161_v17 = vadd.s32 %v2160_v41, %v2158_v51  ;;  %v1732_v21 = vsel %vm5887_vm13, %v6710_v23, %v5676_v40  ;;  %v1674_v41 = vshll.u32 %v1673_v62, 16 }
 0x7a5   :  { %v2185_v39 = vpop.xlane.xlu0 %2184 }
 0x7a6   :  { %vm1714_vm14 = vcmp.eq.s32.totalorder %v3699_v0, %v1710_v47  ;;  %v2204_v49 = vand.u32 127, %v2161_v17  ;;  %v2186_v32 = vcvt.f32.s32 %v2185_v39  ;;  %vm2216_vm11 = vcmp.gt.s32.totalorder %v2161_v17, 2147483648  ;;  %v6719_v47 = vld [vmem:[#allocation41_spill] sm:$0xff] }
 0x7a7   :  { %vm5896_vm9 = vmand %vm1714_vm14, %vm1718_vm0  ;;  %v2173_v39 = vcvt.f32.s32 %v5807_v54  ;;  %v6722_v54 = vld [vmem:[#allocation17_spill] sm:$0xff] }
 0x7a8   :  { %v2208_v11 = vsub.s32 127, %v2204_v49  ;;  %v2189_v56 = vadd.s32 %v2188_v13, %v2186_v32  ;;  %v1734_v25 = vsel %vm5896_vm9, %v6714_v26, %v6713_v1  ;;  %v1702_v13 = vshll.u32 %v1701_v4, 16  ;;  %v6727_v1 = vld [vmem:[#allocation25_spill] sm:$0xff] }
 0x7aa   :  { %vm2212_vm6 = vcmp.eq.s32.totalorder %v3699_v0, %v2208_v11  ;;  %v2206_v53 = vand.u32 127, %v2189_v56  ;;  %vm2218_vm8 = vcmp.gt.s32.totalorder %v2189_v56, 2147483648 }
 0x7ab   :  { %vm5905_vm5 = vmand %vm2212_vm6, %vm2216_vm11 }
 0x7ac   :  { %v2210_v48 = vsub.s32 127, %v2206_v53  ;;  %v2232_v33 = vsel %vm5905_vm5, %v6682_v44, %v5710_v12  ;;  %vm6728_vm5 = vcmask 130048  }
 0x7ae   :  { %vm2214_vm7 = vcmp.eq.s32.totalorder %v3699_v0, %v2210_v48  ;;  %v6721_v48 = vld [vmem:[#allocation15_spill] sm:$0xff] }
 0x7af   :  { %vm5914_vm12 = vmand %vm2214_vm7, %vm2218_vm8 }
 0x7b0   :  { %v2234_v6 = vsel %vm5914_vm12, %v6692_v42, %v5728_v45 }
 0x7b3   :  { %v1157_v14 = vpop.xlane.xlu1 %1156 }
 0x7b4   :  { %v1158_v46 = vcvt.f32.s32 %v1157_v14  ;;  %v2174_v14 = vshll.u32 %v2173_v39, 16 }
 0x7b6   :  { %v1161_v60 = vadd.s32 %v1160_v52, %v1158_v46 }
 0x7b7   :  { %v1199_v31 = vpop.xlane.xlu1 %1198 }
 0x7b8   :  { %v1204_v63 = vand.u32 127, %v1161_v60  ;;  %v1200_v59 = vcvt.f32.s32 %v1199_v31  ;;  %vm1216_vm1 = vcmp.gt.s32.totalorder %v1161_v60, 2147483648  ;;  %v6724_v60 = vld [vmem:[#allocation22_spill] sm:$0xff]  ;;  %v2202_v31 = vshll.u32 %v2201_v8, 16 }
 0x7ba   :  { %v1208_v55 = vsub.s32 127, %v1204_v63  ;;  %v1203_v29 = vadd.s32 %v1202_v27, %v1200_v59  ;;  %v6725_v59 = vld [vmem:[#allocation18_spill] sm:$0xff] }
 0x7bb   :  { %v1671_v30 = vpop.xlane.xlu1 %1670 }
 0x7bc   :  { %vm1212_vm4 = vcmp.eq.s32.totalorder %v3699_v0, %v1208_v55  ;;  %v1207_v36 = vand.u32 127, %v1203_v29  ;;  %v1672_v38 = vcvt.f32.s32 %v1671_v30  ;;  %vm1219_vm14 = vcmp.gt.s32.totalorder %v1203_v29, 2147483648  ;;  %v6726_v55 = vld [vmem:[#allocation21_spill] sm:$0xff] }
 0x7bd   :  { %vm1228_vm3 = vmand %vm1212_vm4, %vm1216_vm1 }
 0x7be   :  { %v1211_v58 = vsub.s32 127, %v1207_v36  ;;  %v1675_v51 = vadd.s32 %v1674_v41, %v1672_v38  ;;  %v1232_v17 = vsel %vm1228_vm3, %v6720_v10, %v6719_v47 }
 0x7bf   :  { %v1699_v49 = vpop.xlane.xlu1 %1698  ;;  %v5935_v18 = vpack.c.bf16 %v1233_v28, %v1232_v17 }
 0x7c0   :  { %vm1215_vm10 = vcmp.eq.s32.totalorder %v3699_v0, %v1211_v58  ;;  %v1705_v32 = vand.u32 127, %v1675_v51  ;;  %v1700_v11 = vcvt.f32.s32 %v1699_v49  ;;  %vm1717_vm6 = vcmp.gt.s32.totalorder %v1675_v51, 2147483648 }
 0x7c1   :  { %vm1231_vm0 = vmand %vm1215_vm10, %vm1219_vm14  ;;  %3278 = vmatprep.mubr.bf16.mxu1 %v5935_v18 }
 0x7c2   :  { %v1709_v56 = vsub.s32 127, %v1705_v32  ;;  %v1703_v53 = vadd.s32 %v1702_v13, %v1700_v11  ;;  %v1235_v57 = vsel %vm1231_vm0, %v6722_v54, %v6721_v48  ;;  %vm6729_vm14 = vmmov %vm6728_vm5 }
 0x7c3   :  { %v2171_v37 = vpop.xlane.xlu1 %2170  ;;  %v5947_v19 = vpack.c.bf16 %v1235_v57, %v1234_v20  ;;  %vm6730_vm0 = vmmov %vm6728_vm5 }
 0x7c4   :  { %vm1713_vm15 = vcmp.eq.s32.totalorder %v3699_v0, %v1709_v56  ;;  %v1707_v61 = vand.u32 127, %v1703_v53  ;;  %v2172_v28 = vcvt.f32.s32 %v2171_v37  ;;  %vm1719_vm7 = vcmp.gt.s32.totalorder %v1703_v53, 2147483648  ;;  %vm6731_vm12 = vmmov %vm6730_vm0 }
 0x7c5   :  { %vm1729_vm11 = vmand %vm1713_vm15, %vm1717_vm6  ;;  %3279 = vmatmul.mubr.bf16.gmra.mrb[4].mxu1 %v5947_v19 }
 0x7c6   :  { %v1711_v52 = vsub.s32 127, %v1707_v61  ;;  %v2175_v46 = vadd.s32 %v2174_v14, %v2172_v28  ;;  %v1733_v62 = vsel %vm1729_vm11, %v6724_v60, %v6723_v22  ;;  %vm6732_vm15 = vmmov %vm6730_vm0 }
 0x7c7   :  { %v2199_v50 = vpop.xlane.xlu1 %2198  ;;  %v5958_v24 = vpack.c.bf16 %v1733_v62, %v1732_v21  ;;  %vm6733_vm6 = vmmov %vm6730_vm0 }
 0x7c8   :  { %vm1715_vm2 = vcmp.eq.s32.totalorder %v3699_v0, %v1711_v52  ;;  %v2205_v2 = vand.u32 127, %v2175_v46  ;;  %v2200_v20 = vcvt.f32.s32 %v2199_v50  ;;  %vm2217_vm4 = vcmp.gt.s32.totalorder %v2175_v46, 2147483648  ;;  %vm6734_vm11 = vmmov %vm6730_vm0 }
 0x7c9   :  { %vm1731_vm8 = vmand %vm1715_vm2, %vm1719_vm7  ;;  %3282 = vmatprep.mubr.bf16.mxu1 %v5958_v24 }
 0x7ca   :  { %v2209_v27 = vsub.s32 127, %v2205_v2  ;;  %v2203_v63 = vadd.s32 %v2202_v31, %v2200_v20  ;;  %v1735_v29 = vsel %vm1731_vm8, %v6726_v55, %v6725_v59  ;;  %vm6735_vm2 = vmmov %vm6730_vm0 }
 0x7cb   :  { %v5969_v40 = vpack.c.bf16 %v1735_v29, %v1734_v25  ;;  %vm6736_vm7 = vmmov %vm6730_vm0 }
 0x7cc   :  { %vm2213_vm13 = vcmp.eq.s32.totalorder %v3699_v0, %v2209_v27  ;;  %v2207_v3 = vand.u32 127, %v2203_v63  ;;  %vm2219_vm3 = vcmp.gt.s32.totalorder %v2203_v63, 2147483648  ;;  %vm6737_vm8 = vmmov %vm6730_vm0 }
 0x7cd   :  { %vm2229_vm1 = vmand %vm2213_vm13, %vm2217_vm4  ;;  %3283 = vmatmul.mubr.bf16.gmra.mrb[8].mxu1 %v5969_v40 }
 0x7ce   :  { %v2211_v23 = vsub.s32 127, %v2207_v3  ;;  %v2233_v21 = vsel %vm2229_vm1, %v6687_v9, %v5718_v35  ;;  %vm6738_vm13 = vmmov %vm6730_vm0 }
 0x7cf   :  { %v5980_v5 = vpack.c.bf16 %v2233_v21, %v2232_v33  ;;  %vm6739_vm4 = vmmov %vm6730_vm0 }
 0x7d0   :  { %vm2215_vm9 = vcmp.eq.s32.totalorder %v3699_v0, %v2211_v23  ;;  %vm6740_vm1 = vmmov %vm6730_vm0 }
 0x7d1   :  { %vm2231_vm10 = vmand %vm2215_vm9, %vm2219_vm3  ;;  %3286 = vmatprep.mubr.bf16.mxu1 %v5980_v5 }
 0x7d2   :  { %v2235_v26 = vsel %vm2231_vm10, %v6727_v1, %v5738_v43  ;;  %vm6741_vm9 = vmmov %vm6730_vm0 }
 0x7d3   :  { %v5991_v9 = vpack.c.bf16 %v2235_v26, %v2234_v6  ;;  %vm6742_vm3 = vmmov %vm6730_vm0 }
 0x7d4   :  { %vm6743_vm10 = vmmov %vm6730_vm0 }
 0x7d5   :  { %3287 = vmatmul.mubr.bf16.gmra.mrb[12].mxu1 %v5991_v9 }
 0x7d6   :  { %3306 = vmatprep.mubr.bf16.mxu1 %v5854_v7 }
 0x866   :  { %v3276_v44 = vpop.f32.mrb[0].mxu1 }
 0x867   :  { %v2428_v0 = vpop.f32.mrb[1].mxu1  ;;  %v2497_v15 = vsel %vm6730_vm0, %v3276_v44, -inf }
 0x868   :  { %v3277_v12 = vpop.f32.mrb[2].mxu1  ;;  %v2491_v35 = vsel %vm6728_vm5, %v2428_v0, -inf  ;;  %vm6744_vm5 = vmmov %vm6730_vm0 }
 0x869   :  { %2492 = vmax.xlane.f32.xlu0 %v2491_v35  ;;  %v2431_v25 = vpop.f32.mrb[3].mxu1  ;;  %v2500_v42 = vsel %vm6731_vm12, %v3277_v12, -inf  ;;  %vm6746_vm12 = vmmov %vm6730_vm0 }
 0x86a   :  { %v2494_v43 = vsel %vm6729_vm14, %v2431_v25, -inf  ;;  %vm6745_vm14 = vmmov %vm6730_vm0 }
 0x86b   :  { %2495 = vmax.xlane.f32.xlu1 %v2494_v43 }
 0x86d   :  { %2498 = vmax.xlane.f32.xlu0 %v2497_v15 }
 0x86f   :  { %2501 = vmax.xlane.f32.xlu1 %v2500_v42 }
 0x898   :  { %v5999_v45 = vpop.f32.mrb[4].mxu1 }
 0x899   :  { %v6001_v33 = vpop.f32.mrb[5].mxu1  ;;  %v2509_v41 = vsel %vm6734_vm11, %v5999_v45, -inf  ;;  %vm6749_vm11 = vmmov %vm6730_vm0 }
 0x89a   :  { %v6003_v7 = vpop.f32.mrb[6].mxu1  ;;  %v2503_v16 = vsel %vm6732_vm15, %v6001_v33, -inf  ;;  %vm6747_vm15 = vmmov %vm6730_vm0 }
 0x89b   :  { %2504 = vmax.xlane.f32.xlu0 %v2503_v16  ;;  %v6007_v6 = vpop.f32.mrb[7].mxu1  ;;  %v2512_v36 = vsel %vm6735_vm2, %v6003_v7, -inf  ;;  %vm6750_vm2 = vmmov %vm6730_vm0 }
 0x89c   :  { %v2506_v4 = vsel %vm6733_vm6, %v6007_v6, -inf  ;;  %vm6748_vm6 = vmmov %vm6730_vm0 }
 0x89d   :  { %2507 = vmax.xlane.f32.xlu1 %v2506_v4 }
 0x89f   :  { %2510 = vmax.xlane.f32.xlu0 %v2509_v41 }
 0x8a0   :  { %v6013_v30 = vpop.f32.mrb[8].mxu1 }
 0x8a1   :  { %2513 = vmax.xlane.f32.xlu1 %v2512_v36  ;;  %v6017_v38 = vpop.f32.mrb[9].mxu1  ;;  %v2521_v17 = vsel %vm6738_vm13, %v6013_v30, -inf  ;;  %vm6753_vm13 = vmmov %vm6730_vm0 }
 0x8a2   :  { %v6019_v58 = vpop.f32.mrb[10].mxu1  ;;  %v2515_v51 = vsel %vm6736_vm7, %v6017_v38, -inf  ;;  %vm6751_vm7 = vmmov %vm6730_vm0 }
 0x8a3   :  { %2516 = vmax.xlane.f32.xlu0 %v2515_v51  ;;  %v6023_v47 = vpop.f32.mrb[11].mxu1  ;;  %v2524_v39 = vsel %vm6739_vm4, %v6019_v58, -inf  ;;  %vm6754_vm4 = vmmov %vm6730_vm0 }
 0x8a4   :  { %v2518_v10 = vsel %vm6737_vm8, %v6023_v47, -inf  ;;  %vm6752_vm8 = vmmov %vm6730_vm0 }
 0x8a5   :  { %2519 = vmax.xlane.f32.xlu1 %v2518_v10 }
 0x8a7   :  { %2522 = vmax.xlane.f32.xlu0 %v2521_v17 }
 0x8a8   :  { %v6029_v13 = vpop.f32.mrb[12].mxu1 }
 0x8a9   :  { %2525 = vmax.xlane.f32.xlu1 %v2524_v39  ;;  %v6033_v49 = vpop.f32.mrb[13].mxu1  ;;  %v2533_v48 = vsel %vm6742_vm3, %v6029_v13, -inf  ;;  %vm6757_vm3 = vmmov %vm6730_vm0 }
 0x8aa   :  { %v6035_v32 = vpop.f32.mrb[14].mxu1  ;;  %v2527_v11 = vsel %vm6740_vm1, %v6033_v49, -inf  ;;  %vm6755_vm1 = vmmov %vm6730_vm0 }
 0x8ab   :  { %2528 = vmax.xlane.f32.xlu0 %v2527_v11  ;;  %v6039_v56 = vpop.f32.mrb[15].mxu1  ;;  %v2536_v54 = vsel %vm6743_vm10, %v6035_v32, -inf  ;;  %vm6758_vm10 = vmmov %vm6730_vm0 }
 0x8ac   :  { %v2530_v53 = vsel %vm6741_vm9, %v6039_v56, -inf  ;;  %vm6756_vm9 = vmmov %vm6730_vm0 }
 0x8ad   :  { %2531 = vmax.xlane.f32.xlu1 %v2530_v53 }
 0x8af   :  { %2534 = vmax.xlane.f32.xlu0 %v2533_v48 }
 0x8b1   :  { %2537 = vmax.xlane.f32.xlu1 %v2536_v54 }
 0x8f6   :  { %v2493_v57 = vpop.xlane.xlu0 %2492 }
 0x8f7   :  { %v2539_v8 = vsub.f32 %v2428_v0, %v2493_v57 }
 0x8f8   :  { %v2496_v14 = vpop.xlane.xlu1 %2495 }
 0x8f9   :  { %v2555_v37 = vmul.f32 1.442695, %v2539_v8  ;;  %v2540_v61 = vsub.f32 %v2431_v25, %v2496_v14 }
 0x8fa   :  { %v2499_v28 = vpop.xlane.xlu0 %2498 }
 0x8fb   :  { %3386 = vpow2.f32 %v2555_v37  ;;  %v2557_v52 = vmul.f32 1.442695, %v2540_v61  ;;  %v2541_v46 = vsub.f32 %v3276_v44, %v2499_v28 }
 0x8fc   :  { %v2502_v22 = vpop.xlane.xlu1 %2501 }
 0x8fd   :  { %3388 = vpow2.f32 %v2557_v52  ;;  %v2559_v60 = vmul.f32 1.442695, %v2541_v46  ;;  %v2542_v62 = vsub.f32 %v3277_v12, %v2502_v22 }
 0x8ff   :  { %3390 = vpow2.f32 %v2559_v60  ;;  %v2561_v31 = vmul.f32 1.442695, %v2542_v62 }
 0x901   :  { %3392 = vpow2.f32 %v2561_v31 }
 0x905   :  { %v6047_v50 = vpop.eup %3386 }
 0x906   :  { %v2587_v2 = vsel %vm6744_vm5, %v6047_v50, 0.0  ;;  %vm6759_vm5 = vmmov %vm6730_vm0 }
 0x907   :  { %v6051_v20 = vpop.eup %3388  ;;  %2588 = vadd.xlane.f32.xlu0 %v2587_v2 }
 0x908   :  { %v2590_v27 = vsel %vm6745_vm14, %v6051_v20, 0.0  ;;  %vm6760_vm14 = vmmov %vm6730_vm0 }
 0x909   :  { %v6055_v63 = vpop.eup %3390  ;;  %2591 = vadd.xlane.f32.xlu1 %v2590_v27 }
 0x90a   :  { %v2593_v59 = vsel %vm6730_vm0, %v6055_v63, 0.0 }
 0x90b   :  { %v6059_v55 = vpop.eup %3392  ;;  %2594 = vadd.xlane.f32.xlu0 %v2593_v59 }
 0x90c   :  { %v2596_v29 = vsel %vm6746_vm12, %v6059_v55, 0.0  ;;  %vm6761_vm12 = vmmov %vm6730_vm0 }
 0x90d   :  { %2597 = vadd.xlane.f32.xlu1 %v2596_v29 }
 0x928   :  { %v2505_v3 = vpop.xlane.xlu0 %2504 }
 0x929   :  { %v2543_v23 = vsub.f32 %v6001_v33, %v2505_v3 }
 0x92a   :  { %v2508_v21 = vpop.xlane.xlu1 %2507 }
 0x92b   :  { %v2563_v1 = vmul.f32 1.442695, %v2543_v23  ;;  %v2544_v26 = vsub.f32 %v6007_v6, %v2508_v21 }
 0x92c   :  { %v2511_v44 = vpop.xlane.xlu0 %2510 }
 0x92d   :  { %3394 = vpow2.f32 %v2563_v1  ;;  %v2565_v0 = vmul.f32 1.442695, %v2544_v26  ;;  %v2545_v12 = vsub.f32 %v5999_v45, %v2511_v44 }
 0x92e   :  { %v2514_v35 = vpop.xlane.xlu1 %2513 }
 0x92f   :  { %3396 = vpow2.f32 %v2565_v0  ;;  %v2567_v25 = vmul.f32 1.442695, %v2545_v12  ;;  %v2546_v43 = vsub.f32 %v6003_v7, %v2514_v35 }
 0x930   :  { %v2517_v15 = vpop.xlane.xlu0 %2516 }
 0x931   :  { %3398 = vpow2.f32 %v2567_v25  ;;  %v2569_v42 = vmul.f32 1.442695, %v2546_v43  ;;  %v2547_v16 = vsub.f32 %v6017_v38, %v2517_v15 }
 0x932   :  { %v2520_v33 = vpop.xlane.xlu1 %2519 }
 0x933   :  { %3400 = vpow2.f32 %v2569_v42  ;;  %v2571_v4 = vmul.f32 1.442695, %v2547_v16  ;;  %v2548_v6 = vsub.f32 %v6023_v47, %v2520_v33 }
 0x934   :  { %v2523_v41 = vpop.xlane.xlu0 %2522 }
 0x935   :  { %3402 = vpow2.f32 %v2571_v4  ;;  %v2573_v36 = vmul.f32 1.442695, %v2548_v6  ;;  %v2549_v45 = vsub.f32 %v6013_v30, %v2523_v41 }
 0x936   :  { %v2526_v51 = vpop.xlane.xlu1 %2525 }
 0x937   :  { %v6070_v10 = vpop.eup %3394  ;;  %3404 = vpow2.f32 %v2573_v36  ;;  %v2575_v7 = vmul.f32 1.442695, %v2549_v45  ;;  %v2550_v17 = vsub.f32 %v6019_v58, %v2526_v51 }
 0x938   :  { %v2529_v39 = vpop.xlane.xlu0 %2528  ;;  %v2599_v38 = vsel %vm6747_vm15, %v6070_v10, 0.0  ;;  %vm6762_vm15 = vmmov %vm6730_vm0 }
 0x939   :  { %v6075_v11 = vpop.eup %3396  ;;  %3406 = vpow2.f32 %v2575_v7  ;;  %v2577_v47 = vmul.f32 1.442695, %v2550_v17  ;;  %v2551_v53 = vsub.f32 %v6033_v49, %v2529_v39  ;;  %2600 = vadd.xlane.f32.xlu0 %v2599_v38 }
 0x93a   :  { %v2532_v48 = vpop.xlane.xlu1 %2531  ;;  %v2602_v30 = vsel %vm6748_vm6, %v6075_v11, 0.0  ;;  %vm6763_vm6 = vmmov %vm6730_vm0 }
 0x93b   :  { %v6080_v54 = vpop.eup %3398  ;;  %3408 = vpow2.f32 %v2577_v47  ;;  %v2579_v57 = vmul.f32 1.442695, %v2551_v53  ;;  %v2552_v58 = vsub.f32 %v6039_v56, %v2532_v48  ;;  %2603 = vadd.xlane.f32.xlu1 %v2602_v30 }
 0x93c   :  { %v2535_v8 = vpop.xlane.xlu0 %2534  ;;  %v2605_v14 = vsel %vm6749_vm11, %v6080_v54, 0.0  ;;  %vm6764_vm11 = vmmov %vm6730_vm0 }
 0x93d   :  { %v6085_v37 = vpop.eup %3400  ;;  %3410 = vpow2.f32 %v2579_v57  ;;  %v2581_v49 = vmul.f32 1.442695, %v2552_v58  ;;  %v2553_v61 = vsub.f32 %v6029_v13, %v2535_v8  ;;  %2606 = vadd.xlane.f32.xlu0 %v2605_v14 }
 0x93e   :  { %v2538_v28 = vpop.xlane.xlu1 %2537  ;;  %v2608_v52 = vsel %vm6750_vm2, %v6085_v37, 0.0  ;;  %vm6765_vm2 = vmmov %vm6730_vm0 }
 0x93f   :  { %v6090_v46 = vpop.eup %3402  ;;  %3412 = vpow2.f32 %v2581_v49  ;;  %v2583_v56 = vmul.f32 1.442695, %v2553_v61  ;;  %v2554_v22 = vsub.f32 %v6035_v32, %v2538_v28  ;;  %2609 = vadd.xlane.f32.xlu1 %v2608_v52 }
 0x940   :  { %v2611_v60 = vsel %vm6751_vm7, %v6090_v46, 0.0  ;;  %vm6766_vm7 = vmmov %vm6730_vm0 }
 0x941   :  { %v6095_v62 = vpop.eup %3404  ;;  %3414 = vpow2.f32 %v2583_v56  ;;  %v2585_v31 = vmul.f32 1.442695, %v2554_v22  ;;  %2612 = vadd.xlane.f32.xlu0 %v2611_v60 }
 0x942   :  { %v2614_v13 = vsel %vm6752_vm8, %v6095_v62, 0.0  ;;  %vm6767_vm8 = vmmov %vm6730_vm0 }
 0x943   :  { %v6099_v2 = vpop.eup %3406  ;;  %3416 = vpow2.f32 %v2585_v31  ;;  %2615 = vadd.xlane.f32.xlu1 %v2614_v13 }
 0x944   :  { %v2617_v27 = vsel %vm6753_vm13, %v6099_v2, 0.0  ;;  %vm6768_vm13 = vmmov %vm6730_vm0 }
 0x945   :  { %v6103_v32 = vpop.eup %3408  ;;  %2618 = vadd.xlane.f32.xlu0 %v2617_v27 }
 0x946   :  { %v2620_v59 = vsel %vm6754_vm4, %v6103_v32, 0.0  ;;  %vm6769_vm4 = vmmov %vm6730_vm0 }
 0x947   :  { %v6107_v29 = vpop.eup %3410  ;;  %2621 = vadd.xlane.f32.xlu1 %v2620_v59 }
 0x948   :  { %v2623_v3 = vsel %vm6755_vm1, %v6107_v29, 0.0  ;;  %vm6770_vm1 = vmmov %vm6730_vm0 }
 0x949   :  { %v6111_v23 = vpop.eup %3412  ;;  %2624 = vadd.xlane.f32.xlu0 %v2623_v3 }
 0x94a   :  { %v2626_v21 = vsel %vm6756_vm9, %v6111_v23, 0.0  ;;  %vm6771_vm9 = vmmov %vm6730_vm0 }
 0x94b   :  { %v6115_v1 = vpop.eup %3414  ;;  %2627 = vadd.xlane.f32.xlu1 %v2626_v21 }
 0x94c   :  { %v2629_v26 = vsel %vm6757_vm3, %v6115_v1, 0.0  ;;  %vm6772_vm3 = vmmov %vm6730_vm0 }
 0x94d   :  { %v6119_v44 = vpop.eup %3416  ;;  %2630 = vadd.xlane.f32.xlu0 %v2629_v26 }
 0x94e   :  { %v2632_v0 = vsel %vm6758_vm10, %v6119_v44, 0.0  ;;  %vm6773_vm10 = vmmov %vm6730_vm0 }
 0x94f   :  { %2633 = vadd.xlane.f32.xlu1 %v2632_v0 }
 0x994   :  { %v2589_v12 = vpop.xlane.xlu0 %2588 }
 0x995   :  { %3418 = vrcp.f32 %v2589_v12 }
 0x996   :  { %v2592_v35 = vpop.xlane.xlu1 %2591 }
 0x997   :  { %3420 = vrcp.f32 %v2592_v35 }
 0x998   :  { %v2595_v25 = vpop.xlane.xlu0 %2594 }
 0x999   :  { %3422 = vrcp.f32 %v2595_v25 }
 0x99a   :  { %v2598_v43 = vpop.xlane.xlu1 %2597 }
 0x99b   :  { %3424 = vrcp.f32 %v2598_v43 }
 0x99f   :  { %v3419_v15 = vpop.eup %3418 }
 0x9a0   :  { %v2651_v16 = vmul.f32 %v3419_v15, %v6047_v50 }
 0x9a1   :  { %v3421_v42 = vpop.eup %3420 }
 0x9a2   :  { %v2652_v33 = vmul.f32 %v3421_v42, %v6051_v20 }
 0x9a3   :  { %v3423_v4 = vpop.eup %3422 }
 0x9a4   :  { %v2667_v6 = vpack.c.bf16 %v2652_v33, %v2651_v16  ;;  %v2653_v36 = vmul.f32 %v3423_v4, %v6055_v63 }
 0x9a5   :  { %v3425_v41 = vpop.eup %3424 }
 0x9a6   :  { %3290 = vmatprep.subr.bf16.mxu1 %v2667_v6  ;;  %v2654_v45 = vmul.f32 %v3425_v41, %v6059_v55 }
 0x9a7   :  { %3291 = vmatpush3.bf16.msra.mxu1 %v2667_v6 }
 0x9a8   :  { %v2668_v51 = vpack.c.bf16 %v2654_v45, %v2653_v36 }
 0x9aa   :  { %3292 = vmatprep.subr.bf16.mxu1 %v2668_v51 }
 0x9ab   :  { %3293 = vmatpush3.bf16.msra.mxu1 %v2668_v51 }
 0x9c6   :  { %v2601_v7 = vpop.xlane.xlu0 %2600 }
 0x9c7   :  { %3426 = vrcp.f32 %v2601_v7 }
 0x9c8   :  { %v2604_v17 = vpop.xlane.xlu1 %2603 }
 0x9c9   :  { %3428 = vrcp.f32 %v2604_v17 }
 0x9ca   :  { %v2607_v39 = vpop.xlane.xlu0 %2606 }
 0x9cb   :  { %3430 = vrcp.f32 %v2607_v39 }
 0x9cc   :  { %v2610_v50 = vpop.xlane.xlu1 %2609 }
 0x9cd   :  { %3432 = vrcp.f32 %v2610_v50 }
 0x9ce   :  { %v2613_v20 = vpop.xlane.xlu0 %2612 }
 0x9cf   :  { %3434 = vrcp.f32 %v2613_v20 }
 0x9d0   :  { %v2616_v38 = vpop.xlane.xlu1 %2615 }
 0x9d1   :  { %v3427_v47 = vpop.eup %3426  ;;  %3436 = vrcp.f32 %v2616_v38 }
 0x9d2   :  { %v2619_v63 = vpop.xlane.xlu0 %2618  ;;  %v2655_v48 = vmul.f32 %v3427_v47, %v6070_v10 }
 0x9d3   :  { %v3429_v53 = vpop.eup %3428  ;;  %3438 = vrcp.f32 %v2619_v63 }
 0x9d4   :  { %v2622_v55 = vpop.xlane.xlu1 %2621  ;;  %v2656_v30 = vmul.f32 %v3429_v53, %v6075_v11 }
 0x9d5   :  { %v3431_v57 = vpop.eup %3430  ;;  %3440 = vrcp.f32 %v2622_v55 }
 0x9d6   :  { %v2625_v58 = vpop.xlane.xlu0 %2624  ;;  %v2669_v8 = vpack.c.bf16 %v2656_v30, %v2655_v48  ;;  %v2657_v61 = vmul.f32 %v3431_v57, %v6080_v54 }
 0x9d7   :  { %v3433_v14 = vpop.eup %3432  ;;  %3442 = vrcp.f32 %v2625_v58 }
 0x9d8   :  { %v2628_v49 = vpop.xlane.xlu1 %2627  ;;  %3294 = vmatprep.subr.bf16.mxu1 %v2669_v8  ;;  %v2658_v28 = vmul.f32 %v3433_v14, %v6085_v37 }
 0x9d9   :  { %v3435_v52 = vpop.eup %3434  ;;  %3444 = vrcp.f32 %v2628_v49  ;;  %3295 = vmatpush3.bf16.msra.mxu1 %v2669_v8 }
 0x9da   :  { %v2631_v56 = vpop.xlane.xlu0 %2630  ;;  %v2670_v22 = vpack.c.bf16 %v2658_v28, %v2657_v61  ;;  %v2659_v60 = vmul.f32 %v3435_v52, %v6090_v46 }
 0x9db   :  { %v3437_v10 = vpop.eup %3436  ;;  %3446 = vrcp.f32 %v2631_v56 }
 0x9dc   :  { %v2634_v11 = vpop.xlane.xlu1 %2633  ;;  %3296 = vmatprep.subr.bf16.mxu1 %v2670_v22  ;;  %v2660_v31 = vmul.f32 %v3437_v10, %v6095_v62 }
 0x9dd   :  { %v3439_v13 = vpop.eup %3438  ;;  %3448 = vrcp.f32 %v2634_v11  ;;  %3297 = vmatpush3.bf16.msra.mxu1 %v2670_v22 }
 0x9de   :  { %v2671_v27 = vpack.c.bf16 %v2660_v31, %v2659_v60  ;;  %v2661_v37 = vmul.f32 %v3439_v13, %v6099_v2 }
 0x9df   :  { %v3441_v54 = vpop.eup %3440 }
 0x9e0   :  { %3298 = vmatprep.subr.bf16.mxu1 %v2671_v27  ;;  %v2662_v59 = vmul.f32 %v3441_v54, %v6103_v32 }
 0x9e1   :  { %v3443_v3 = vpop.eup %3442  ;;  %3299 = vmatpush3.bf16.msra.mxu1 %v2671_v27 }
 0x9e2   :  { %v2672_v21 = vpack.c.bf16 %v2662_v59, %v2661_v37  ;;  %v2663_v0 = vmul.f32 %v3443_v3, %v6107_v29 }
 0x9e3   :  { %v3445_v26 = vpop.eup %3444 }
 0x9e4   :  { %3300 = vmatprep.subr.bf16.mxu1 %v2672_v21  ;;  %v2664_v46 = vmul.f32 %v3445_v26, %v6111_v23 }
 0x9e5   :  { %v3447_v62 = vpop.eup %3446  ;;  %3301 = vmatpush3.bf16.msra.mxu1 %v2672_v21 }
 0x9e6   :  { %v2673_v12 = vpack.c.bf16 %v2664_v46, %v2663_v0  ;;  %v2665_v25 = vmul.f32 %v3447_v62, %v6115_v1 }
 0x9e7   :  { %v3449_v35 = vpop.eup %3448 }
 0x9e8   :  { %3302 = vmatprep.subr.bf16.mxu1 %v2673_v12  ;;  %v2666_v2 = vmul.f32 %v3449_v35, %v6119_v44 }
 0x9e9   :  { %3303 = vmatpush3.bf16.msra.mxu1 %v2673_v12 }
 0x9ea   :  { %v2674_v32 = vpack.c.bf16 %v2666_v2, %v2665_v25 }
 0x9ec   :  { %3304 = vmatprep.subr.bf16.mxu1 %v2674_v32 }
 0x9ed   :  { %3305 = vmatpush3.bf16.msra.mxu1 %v2674_v32 }
 0x9f0   :  { %3307 = vmatmul.mubr.bf16.vlgmr.msra.gmra.mrb[16].mxu1 %v5861_v34 }
 0x9f1   :  { %3310 = vmatprep.mubr.bf16.mxu1 %v5935_v18 }
 0x9f8   :  { %3311 = vmatmul.mubr.bf16.gmra.mrb[20].mxu1 %v5947_v19 }
 0x9f9   :  { %3314 = vmatprep.mubr.bf16.mxu1 %v5958_v24 }
 0xa00   :  { %3315 = vmatmul.mubr.bf16.gmra.mrb[24].mxu1 %v5969_v40 }
 0xa01   :  { %3318 = vmatprep.mubr.bf16.mxu1 %v5980_v5 }
 0xa08   :  { %3319 = vmatmul.mubr.bf16.gmra.mrb[28].mxu1 %v5991_v9 }
 0xa09   :  { %3346 = vmatprep.mubr.bf16.mxu1 %v5958_v24 }
 0xac3   :  { %v3308_v29 = vpop.f32.mrb[16].mxu1 }
 0xac4   :  { %v2709_v23 = vpop.f32.mrb[17].mxu1  ;;  %v2778_v42 = vsel %vm6730_vm0, %v3308_v29, -inf }
 0xac5   :  { %v3309_v1 = vpop.f32.mrb[18].mxu1  ;;  %v2772_v44 = vsel %vm6759_vm5, %v2709_v23, -inf  ;;  %vm6774_vm5 = vmmov %vm6730_vm0 }
 0xac6   :  { %2773 = vmax.xlane.f32.xlu0 %v2772_v44  ;;  %v2712_v43 = vpop.f32.mrb[19].mxu1  ;;  %v2781_v33 = vsel %vm6761_vm12, %v3309_v1, -inf  ;;  %vm6776_vm12 = vmmov %vm6730_vm0 }
 0xac7   :  { %v2775_v15 = vsel %vm6760_vm14, %v2712_v43, -inf  ;;  %vm6775_vm14 = vmmov %vm6730_vm0 }
 0xac8   :  { %2776 = vmax.xlane.f32.xlu1 %v2775_v15 }
 0xaca   :  { %2779 = vmax.xlane.f32.xlu0 %v2778_v42 }
 0xacb   :  { %v6150_v16 = vpop.f32.mrb[20].mxu1 }
 0xacc   :  { %2782 = vmax.xlane.f32.xlu1 %v2781_v33  ;;  %v2725_v4 = vpop.f32.mrb[21].mxu1  ;;  %v2790_v45 = vsel %vm6764_vm11, %v6150_v16, -inf  ;;  %vm6779_vm11 = vmmov %vm6730_vm0 }
 0xacd   :  { %v6153_v24 = vpop.f32.mrb[22].mxu1  ;;  %v2784_v6 = vsel %vm6762_vm15, %v2725_v4, -inf  ;;  %vm6777_vm15 = vmmov %vm6730_vm0 }
 0xace   :  { %2785 = vmax.xlane.f32.xlu0 %v2784_v6  ;;  %v2728_v41 = vpop.f32.mrb[23].mxu1  ;;  %v2793_v7 = vsel %vm6765_vm2, %v6153_v24, -inf  ;;  %vm6780_vm2 = vmmov %vm6730_vm0 }
 0xacf   :  { %v2787_v36 = vsel %vm6763_vm6, %v2728_v41, -inf  ;;  %vm6778_vm6 = vmmov %vm6730_vm0 }
 0xad0   :  { %2788 = vmax.xlane.f32.xlu1 %v2787_v36 }
 0xad2   :  { %2791 = vmax.xlane.f32.xlu0 %v2790_v45 }
 0xad3   :  { %v6159_v51 = vpop.f32.mrb[24].mxu1 }
 0xad4   :  { %2794 = vmax.xlane.f32.xlu1 %v2793_v7  ;;  %v6163_v17 = vpop.f32.mrb[25].mxu1  ;;  %v2802_v47 = vsel %vm6768_vm13, %v6159_v51, -inf  ;;  %vm6783_vm13 = vmmov %vm6730_vm0 }
 0xad5   :  { %v6165_v39 = vpop.f32.mrb[26].mxu1  ;;  %v2796_v50 = vsel %vm6766_vm7, %v6163_v17, -inf  ;;  %vm6781_vm7 = vmmov %vm6730_vm0 }
 0xad6   :  { %2797 = vmax.xlane.f32.xlu0 %v2796_v50  ;;  %v6169_v20 = vpop.f32.mrb[27].mxu1  ;;  %v2805_v53 = vsel %vm6769_vm4, %v6165_v39, -inf  ;;  %vm6784_vm4 = vmmov %vm6730_vm0 }
 0xad7   :  { %v2799_v38 = vsel %vm6767_vm8, %v6169_v20, -inf  ;;  %vm6782_vm8 = vmmov %vm6730_vm0 }
 0xad8   :  { %2800 = vmax.xlane.f32.xlu1 %v2799_v38 }
 0xada   :  { %2803 = vmax.xlane.f32.xlu0 %v2802_v47 }
 0xadb   :  { %v6175_v63 = vpop.f32.mrb[28].mxu1 }
 0xadc   :  { %2806 = vmax.xlane.f32.xlu1 %v2805_v53  ;;  %v6179_v55 = vpop.f32.mrb[29].mxu1  ;;  %v2814_v8 = vsel %vm6772_vm3, %v6175_v63, -inf  ;;  %vm6787_vm3 = vmmov %vm6730_vm0 }
 0xadd   :  { %v6181_v48 = vpop.f32.mrb[30].mxu1  ;;  %v2808_v30 = vsel %vm6770_vm1, %v6179_v55, -inf  ;;  %vm6785_vm1 = vmmov %vm6730_vm0 }
 0xade   :  { %2809 = vmax.xlane.f32.xlu0 %v2808_v30  ;;  %v6185_v57 = vpop.f32.mrb[31].mxu1  ;;  %v2817_v14 = vsel %vm6773_vm10, %v6181_v48, -inf  ;;  %vm6788_vm10 = vmmov %vm6730_vm0 }
 0xadf   :  { %v2811_v58 = vsel %vm6771_vm9, %v6185_v57, -inf  ;;  %vm6786_vm9 = vmmov %vm6730_vm0 }
 0xae0   :  { %2812 = vmax.xlane.f32.xlu1 %v2811_v58 }
 0xae2   :  { %2815 = vmax.xlane.f32.xlu0 %v2814_v8 }
 0xae4   :  { %2818 = vmax.xlane.f32.xlu1 %v2817_v14 }
 0xb53   :  { %v2774_v49 = vpop.xlane.xlu0 %2773 }
 0xb54   :  { %v2820_v61 = vsub.f32 %v2709_v23, %v2774_v49 }
 0xb55   :  { %v2777_v28 = vpop.xlane.xlu1 %2776 }
 0xb56   :  { %v2836_v52 = vmul.f32 1.442695, %v2820_v61  ;;  %v2821_v56 = vsub.f32 %v2712_v43, %v2777_v28 }
 0xb57   :  { %v2780_v22 = vpop.xlane.xlu0 %2779 }
 0xb58   :  { %3450 = vpow2.f32 %v2836_v52  ;;  %v2838_v10 = vmul.f32 1.442695, %v2821_v56  ;;  %v2822_v11 = vsub.f32 %v3308_v29, %v2780_v22 }
 0xb59   :  { %v2783_v60 = vpop.xlane.xlu1 %2782 }
 0xb5a   :  { %3452 = vpow2.f32 %v2838_v10  ;;  %v2840_v31 = vmul.f32 1.442695, %v2822_v11  ;;  %v2823_v13 = vsub.f32 %v3309_v1, %v2783_v60 }
 0xb5b   :  { %v2786_v27 = vpop.xlane.xlu0 %2785 }
 0xb5c   :  { %3454 = vpow2.f32 %v2840_v31  ;;  %v2842_v54 = vmul.f32 1.442695, %v2823_v13  ;;  %v2824_v37 = vsub.f32 %v2725_v4, %v2786_v27 }
 0xb5d   :  { %v2789_v59 = vpop.xlane.xlu1 %2788 }
 0xb5e   :  { %3456 = vpow2.f32 %v2842_v54  ;;  %v2844_v3 = vmul.f32 1.442695, %v2824_v37  ;;  %v2825_v21 = vsub.f32 %v2728_v41, %v2789_v59 }
 0xb5f   :  { %v2792_v26 = vpop.xlane.xlu0 %2791 }
 0xb60   :  { %3458 = vpow2.f32 %v2844_v3  ;;  %v2846_v0 = vmul.f32 1.442695, %v2825_v21  ;;  %v2826_v46 = vsub.f32 %v6150_v16, %v2792_v26 }
 0xb61   :  { %v2795_v62 = vpop.xlane.xlu1 %2794 }
 0xb62   :  { %v6194_v12 = vpop.eup %3450  ;;  %3460 = vpow2.f32 %v2846_v0  ;;  %v2848_v35 = vmul.f32 1.442695, %v2826_v46  ;;  %v2827_v25 = vsub.f32 %v6153_v24, %v2795_v62 }
 0xb63   :  { %v2798_v2 = vpop.xlane.xlu0 %2797  ;;  %v2868_v32 = vsel %vm6774_vm5, %v6194_v12, 0.0  ;;  %vm6789_vm5 = vmmov %vm6730_vm0 }
 0xb64   :  { %v6199_v29 = vpop.eup %3452  ;;  %3462 = vpow2.f32 %v2848_v35  ;;  %v2850_v23 = vmul.f32 1.442695, %v2827_v25  ;;  %v2828_v1 = vsub.f32 %v6163_v17, %v2798_v2  ;;  %2869 = vadd.xlane.f32.xlu0 %v2868_v32 }
 0xb65   :  { %v2801_v44 = vpop.xlane.xlu1 %2800  ;;  %v2871_v43 = vsel %vm6775_vm14, %v6199_v29, 0.0  ;;  %vm6790_vm14 = vmmov %vm6730_vm0 }
 0xb66   :  { %v6204_v15 = vpop.eup %3454  ;;  %3464 = vpow2.f32 %v2850_v23  ;;  %v2852_v42 = vmul.f32 1.442695, %v2828_v1  ;;  %v2829_v16 = vsub.f32 %v6169_v20, %v2801_v44  ;;  %2872 = vadd.xlane.f32.xlu1 %v2871_v43 }
 0xb67   :  { %v2804_v33 = vpop.xlane.xlu0 %2803  ;;  %v2874_v4 = vsel %vm6730_vm0, %v6204_v15, 0.0  ;;  %vm3081_vm0 = vcmask 64512  }
 0xb68   :  { %v6209_v24 = vpop.eup %3456  ;;  %3466 = vpow2.f32 %v2852_v42  ;;  %v2854_v6 = vmul.f32 1.442695, %v2829_v16  ;;  %v2830_v41 = vsub.f32 %v6159_v51, %v2804_v33  ;;  %2875 = vadd.xlane.f32.xlu0 %v2874_v4 }
 0xb69   :  { %v2807_v36 = vpop.xlane.xlu1 %2806  ;;  %v2877_v45 = vsel %vm6776_vm12, %v6209_v24, 0.0  ;;  %vm3091_vm12 = vcmask 57344  }
 0xb6a   :  { %v6214_v7 = vpop.eup %3458  ;;  %3468 = vpow2.f32 %v2854_v6  ;;  %v2856_v17 = vmul.f32 1.442695, %v2830_v41  ;;  %v2831_v50 = vsub.f32 %v6165_v39, %v2807_v36  ;;  %2878 = vadd.xlane.f32.xlu1 %v2877_v45 }
 0xb6b   :  { %v2810_v20 = vpop.xlane.xlu0 %2809  ;;  %v2880_v38 = vsel %vm6777_vm15, %v6214_v7, 0.0 }
 0xb6c   :  { %v6219_v47 = vpop.eup %3460  ;;  %3470 = vpow2.f32 %v2856_v17  ;;  %v2858_v51 = vmul.f32 1.442695, %v2831_v50  ;;  %v2832_v53 = vsub.f32 %v6179_v55, %v2810_v20  ;;  %2881 = vadd.xlane.f32.xlu0 %v2880_v38 }
 0xb6d   :  { %v2813_v30 = vpop.xlane.xlu1 %2812  ;;  %v2883_v58 = vsel %vm6778_vm6, %v6219_v47, 0.0 }
 0xb6e   :  { %v6224_v8 = vpop.eup %3462  ;;  %3472 = vpow2.f32 %v2858_v51  ;;  %v2860_v39 = vmul.f32 1.442695, %v2832_v53  ;;  %v2833_v14 = vsub.f32 %v6185_v57, %v2813_v30  ;;  %2884 = vadd.xlane.f32.xlu1 %v2883_v58 }
 0xb6f   :  { %v2816_v49 = vpop.xlane.xlu0 %2815  ;;  %v2886_v61 = vsel %vm6779_vm11, %v6224_v8, 0.0 }
 0xb70   :  { %v6229_v28 = vpop.eup %3464  ;;  %3474 = vpow2.f32 %v2860_v39  ;;  %v2862_v55 = vmul.f32 1.442695, %v2833_v14  ;;  %v2834_v52 = vsub.f32 %v6175_v63, %v2816_v49  ;;  %2887 = vadd.xlane.f32.xlu0 %v2886_v61 }
 0xb71   :  { %v2819_v56 = vpop.xlane.xlu1 %2818  ;;  %v2889_v22 = vsel %vm6780_vm2, %v6229_v28, 0.0 }
 0xb72   :  { %v6234_v10 = vpop.eup %3466  ;;  %3476 = vpow2.f32 %v2862_v55  ;;  %v2864_v57 = vmul.f32 1.442695, %v2834_v52  ;;  %v2835_v11 = vsub.f32 %v6181_v48, %v2819_v56  ;;  %2890 = vadd.xlane.f32.xlu1 %v2889_v22 }
 0xb73   :  { %v2892_v60 = vsel %vm6781_vm7, %v6234_v10, 0.0 }
 0xb74   :  { %v6239_v31 = vpop.eup %3468  ;;  %3478 = vpow2.f32 %v2864_v57  ;;  %v2866_v13 = vmul.f32 1.442695, %v2835_v11  ;;  %2893 = vadd.xlane.f32.xlu0 %v2892_v60 }
 0xb75   :  { %v2895_v63 = vsel %vm6782_vm8, %v6239_v31, 0.0 }
 0xb76   :  { %v6243_v27 = vpop.eup %3470  ;;  %3480 = vpow2.f32 %v2866_v13  ;;  %2896 = vadd.xlane.f32.xlu1 %v2895_v63 }
 0xb77   :  { %v2898_v54 = vsel %vm6783_vm13, %v6243_v27, 0.0 }
 0xb78   :  { %v6247_v48 = vpop.eup %3472  ;;  %2899 = vadd.xlane.f32.xlu0 %v2898_v54 }
 0xb79   :  { %v2901_v37 = vsel %vm6784_vm4, %v6247_v48, 0.0 }
 0xb7a   :  { %v6251_v59 = vpop.eup %3474  ;;  %2902 = vadd.xlane.f32.xlu1 %v2901_v37 }
 0xb7b   :  { %v2904_v3 = vsel %vm6785_vm1, %v6251_v59, 0.0 }
 0xb7c   :  { %v6255_v21 = vpop.eup %3476  ;;  %2905 = vadd.xlane.f32.xlu0 %v2904_v3 }
 0xb7d   :  { %v2907_v26 = vsel %vm6786_vm9, %v6255_v21, 0.0 }
 0xb7e   :  { %v6259_v0 = vpop.eup %3478  ;;  %2908 = vadd.xlane.f32.xlu1 %v2907_v26 }
 0xb7f   :  { %v2910_v46 = vsel %vm6787_vm3, %v6259_v0, 0.0 }
 0xb80   :  { %v6263_v62 = vpop.eup %3480  ;;  %2911 = vadd.xlane.f32.xlu0 %v2910_v46 }
 0xb81   :  { %v2913_v35 = vsel %vm6788_vm10, %v6263_v62, 0.0 }
 0xb82   :  { %2914 = vadd.xlane.f32.xlu1 %v2913_v35 }
 0xbf1   :  { %v2870_v25 = vpop.xlane.xlu0 %2869 }
 0xbf2   :  { %3482 = vrcp.f32 %v2870_v25 }
 0xbf3   :  { %v2873_v2 = vpop.xlane.xlu1 %2872 }
 0xbf4   :  { %3484 = vrcp.f32 %v2873_v2 }
 0xbf5   :  { %v2876_v32 = vpop.xlane.xlu0 %2875 }
 0xbf6   :  { %3486 = vrcp.f32 %v2876_v32 }
 0xbf7   :  { %v2879_v23 = vpop.xlane.xlu1 %2878 }
 0xbf8   :  { %3488 = vrcp.f32 %v2879_v23 }
 0xbf9   :  { %v2882_v1 = vpop.xlane.xlu0 %2881 }
 0xbfa   :  { %3490 = vrcp.f32 %v2882_v1 }
 0xbfb   :  { %v2885_v44 = vpop.xlane.xlu1 %2884 }
 0xbfc   :  { %v3483_v43 = vpop.eup %3482  ;;  %3492 = vrcp.f32 %v2885_v44 }
 0xbfd   :  { %v2888_v42 = vpop.xlane.xlu0 %2887  ;;  %v2932_v4 = vmul.f32 %v3483_v43, %v6194_v12 }
 0xbfe   :  { %v3485_v16 = vpop.eup %3484  ;;  %3494 = vrcp.f32 %v2888_v42 }
 0xbff   :  { %v2891_v33 = vpop.xlane.xlu1 %2890  ;;  %v2933_v6 = vmul.f32 %v3485_v16, %v6199_v29 }
 0xc00   :  { %v3487_v41 = vpop.eup %3486  ;;  %3496 = vrcp.f32 %v2891_v33 }
 0xc01   :  { %v2894_v36 = vpop.xlane.xlu0 %2893  ;;  %v2948_v45 = vpack.c.bf16 %v2933_v6, %v2932_v4  ;;  %v2934_v20 = vmul.f32 %v3487_v41, %v6204_v15 }
 0xc02   :  { %v3489_v17 = vpop.eup %3488  ;;  %3498 = vrcp.f32 %v2894_v36 }
 0xc03   :  { %3322 = vmatprep.subr.bf16.mxu0 %v2948_v45  ;;  %3354 = vmatprep.subr.bf16.mxu1 %v2948_v45  ;;  %v2897_v50 = vpop.xlane.xlu1 %2896  ;;  %v2935_v38 = vmul.f32 %v3489_v17, %v6209_v24 }
 0xc04   :  { %v3491_v51 = vpop.eup %3490  ;;  %3500 = vrcp.f32 %v2897_v50  ;;  %3323 = vmatpush3.bf16.msra.mxu0 %v2948_v45  ;;  %3362 = vmatpush3.bf16.msra.mxu1 %v2948_v45 }
 0xc05   :  { %v2900_v12 = vpop.xlane.xlu0 %2899  ;;  %v2949_v53 = vpack.c.bf16 %v2935_v38, %v2934_v20  ;;  %v2936_v58 = vmul.f32 %v3491_v51, %v6214_v7 }
 0xc06   :  { %v3493_v29 = vpop.eup %3492  ;;  %3502 = vrcp.f32 %v2900_v12 }
 0xc07   :  { %3324 = vmatprep.subr.bf16.mxu0 %v2949_v53  ;;  %3355 = vmatprep.subr.bf16.mxu1 %v2949_v53  ;;  %v2903_v30 = vpop.xlane.xlu1 %2902  ;;  %v2937_v39 = vmul.f32 %v3493_v29, %v6219_v47 }
 0xc08   :  { %v3495_v14 = vpop.eup %3494  ;;  %3504 = vrcp.f32 %v2903_v30  ;;  %3325 = vmatpush3.bf16.msra.mxu0 %v2949_v53  ;;  %3363 = vmatpush3.bf16.msra.mxu1 %v2949_v53 }
 0xc09   :  { %v2906_v15 = vpop.xlane.xlu0 %2905  ;;  %v2950_v24 = vpack.c.bf16 %v2937_v39, %v2936_v58  ;;  %v2938_v55 = vmul.f32 %v3495_v14, %v6224_v8 }
 0xc0a   :  { %v3497_v49 = vpop.eup %3496  ;;  %3506 = vrcp.f32 %v2906_v15 }
 0xc0b   :  { %3326 = vmatprep.subr.bf16.mxu0 %v2950_v24  ;;  %3356 = vmatprep.subr.bf16.mxu1 %v2950_v24  ;;  %v2909_v61 = vpop.xlane.xlu1 %2908  ;;  %v2939_v52 = vmul.f32 %v3497_v49, %v6229_v28 }
 0xc0c   :  { %v3499_v56 = vpop.eup %3498  ;;  %3508 = vrcp.f32 %v2909_v61  ;;  %3327 = vmatpush3.bf16.msra.mxu0 %v2950_v24  ;;  %3364 = vmatpush3.bf16.msra.mxu1 %v2950_v24  ;;  %v6791_v24 = vld [vmem:[#allocation13_spill] sm:$0xff]  ;;  %v6792_v61 = vld [vmem:[#allocation14_spill] sm:$0xff] }
 0xc0d   :  { %v2912_v7 = vpop.xlane.xlu0 %2911  ;;  %v2951_v47 = vpack.c.bf16 %v2939_v52, %v2938_v55  ;;  %v2940_v11 = vmul.f32 %v3499_v56, %v6234_v10 }
 0xc0e   :  { %v3501_v22 = vpop.eup %3500  ;;  %3510 = vrcp.f32 %v2912_v7 }
 0xc0f   :  { %3328 = vmatprep.subr.bf16.mxu0 %v2951_v47  ;;  %3357 = vmatprep.subr.bf16.mxu1 %v2951_v47  ;;  %v2915_v57 = vpop.xlane.xlu1 %2914  ;;  %v2941_v60 = vmul.f32 %v3501_v22, %v6239_v31 }
 0xc10   :  { %v3503_v13 = vpop.eup %3502  ;;  %3512 = vrcp.f32 %v2915_v57  ;;  %3329 = vmatpush3.bf16.msra.mxu0 %v2951_v47  ;;  %3365 = vmatpush3.bf16.msra.mxu1 %v2951_v47 }
 0xc11   :  { %v2952_v8 = vpack.c.bf16 %v2941_v60, %v2940_v11  ;;  %v2942_v63 = vmul.f32 %v3503_v13, %v6243_v27 }
 0xc12   :  { %v3505_v28 = vpop.eup %3504 }
 0xc13   :  { %3330 = vmatprep.subr.bf16.mxu0 %v2952_v8  ;;  %3358 = vmatprep.subr.bf16.mxu1 %v2952_v8  ;;  %v2943_v54 = vmul.f32 %v3505_v28, %v6247_v48 }
 0xc14   :  { %v3507_v37 = vpop.eup %3506  ;;  %3331 = vmatpush3.bf16.msra.mxu0 %v2952_v8  ;;  %3366 = vmatpush3.bf16.msra.mxu1 %v2952_v8 }
 0xc15   :  { %v2953_v3 = vpack.c.bf16 %v2943_v54, %v2942_v63  ;;  %v2944_v10 = vmul.f32 %v3507_v37, %v6251_v59 }
 0xc16   :  { %v3509_v26 = vpop.eup %3508 }
 0xc17   :  { %3332 = vmatprep.subr.bf16.mxu0 %v2953_v3  ;;  %3359 = vmatprep.subr.bf16.mxu1 %v2953_v3  ;;  %v2945_v31 = vmul.f32 %v3509_v26, %v6255_v21 }
 0xc18   :  { %v3511_v46 = vpop.eup %3510  ;;  %3333 = vmatpush3.bf16.msra.mxu0 %v2953_v3  ;;  %3367 = vmatpush3.bf16.msra.mxu1 %v2953_v3 }
 0xc19   :  { %v2954_v35 = vpack.c.bf16 %v2945_v31, %v2944_v10  ;;  %v2946_v27 = vmul.f32 %v3511_v46, %v6259_v0 }
 0xc1a   :  { %v3513_v25 = vpop.eup %3512 }
 0xc1b   :  { %3334 = vmatprep.subr.bf16.mxu0 %v2954_v35  ;;  %3360 = vmatprep.subr.bf16.mxu1 %v2954_v35  ;;  %v2947_v48 = vmul.f32 %v3513_v25, %v6263_v62 }
 0xc1c   :  { %3335 = vmatpush3.bf16.msra.mxu0 %v2954_v35  ;;  %3368 = vmatpush3.bf16.msra.mxu1 %v2954_v35 }
 0xc1d   :  { %v2955_v2 = vpack.c.bf16 %v2947_v48, %v2946_v27 }
 0xc1f   :  { %3336 = vmatprep.subr.bf16.mxu0 %v2955_v2  ;;  %3361 = vmatprep.subr.bf16.mxu1 %v2955_v2 }
 0xc20   :  { %3337 = vmatpush3.bf16.msra.mxu0 %v2955_v2  ;;  %3369 = vmatpush3.bf16.msra.mxu1 %v2955_v2 }
 0xc23   :  { %3339 = vmatmul.mubr.bf16.vlgmr.msra.gmra.mrb[16].mxu0 %v5861_v34  ;;  %3347 = vmatmul.mubr.bf16.vlgmr.msra.gmra.mrb[32].mxu1 %v5969_v40 }
 0xc24   :  { %3342 = vmatprep.mubr.bf16.mxu0 %v5935_v18  ;;  %3350 = vmatprep.mubr.bf16.mxu1 %v5980_v5 }
 0xc2b   :  { %3343 = vmatmul.mubr.bf16.gmra.mrb[20].mxu0 %v5947_v19  ;;  %3351 = vmatmul.mubr.bf16.gmra.mrb[36].mxu1 %v5991_v9 }
 0xcf6   :  { %v3340_v59 = vpop.f32.mrb[16].mxu0  ;;  %v3348_v21 = vpop.f32.mrb[32].mxu1 }
 0xcf7   :  { %v2990_v0 = vpop.f32.mrb[17].mxu0  ;;  %v3014_v62 = vpop.f32.mrb[33].mxu1 }
 0xcf8   :  { %v3341_v32 = vpop.f32.mrb[18].mxu0  ;;  %v3349_v23 = vpop.f32.mrb[34].mxu1 }
 0xcf9   :  { %v2992_v1 = vpop.f32.mrb[19].mxu0  ;;  %v3016_v44 = vpop.f32.mrb[35].mxu1 }
 0xcfe   :  { %v3344_v43 = vpop.f32.mrb[20].mxu0  ;;  %v3352_v34 = vpop.f32.mrb[36].mxu1 }
 0xcff   :  { %v3002_v42 = vpop.f32.mrb[21].mxu0  ;;  %v3026_v40 = vpop.f32.mrb[37].mxu1 }
 0xd00   :  { %v3345_v16 = vpop.f32.mrb[22].mxu0  ;;  %v3353_v18 = vpop.f32.mrb[38].mxu1 }
 0xd01   :  { %v3004_v33 = vpop.f32.mrb[23].mxu0  ;;  %v3028_v5 = vpop.f32.mrb[39].mxu1  ;;  %v3038_v19 = vsel %vm6789_vm5, %v3353_v18, -inf }
 0xd02   :  { %3039 = vmax.xlane.f32.xlu0 %v3038_v19 }
 0xd8f   :  { %v3040_v9 = vpop.xlane.xlu0 %3039 }
 0xd90   :  { %v3041_v4 = vsub.f32 %v3353_v18, %v3040_v9 }
 0xd92   :  { %v3042_v6 = vmul.f32 1.442695, %v3041_v4 }
 0xd94   :  { %3514 = vpow2.f32 %v3042_v6 }
 0xd9e   :  { %v3515_v41 = vpop.eup %3514 }
 0xd9f   :  { %v3044_v36 = vsel %vm6790_vm14, %v3515_v41, 0.0 }
 0xda0   :  { %3045 = vadd.xlane.f32.xlu1 %v3044_v36 }
 0xe2d   :  { %v3046_v45 = vpop.xlane.xlu1 %3045 }
 0xe2e   :  { %3516 = vrcp.f32 %v3046_v45 }
 0xe38   :  { %v3517_v17 = vpop.eup %3516 }
 0xe39   :  { %v3048_v50 = vmul.f32 %v3517_v17, %v3515_v41 }
 0xe3b   :  { %3049 = vxpose.xlu0.b32.start.end [1/1] (short) (narrow) %v3048_v50, 16 }
 0xebb   :  { %v3065_v20 = vpop.trf.xlu0 }
 0xebc   :  { %v3082_v51 = vsel %vm3081_vm0, %v3065_v20, -inf }
 0xebf   :  { %v3066_v38 = vpop.trf.xlu0 }
 0xec0   :  { %v3083_v12 = vsel %vm3081_vm0, %v3066_v38, -inf }
 0xec1   :  { %v3084_v53 = vmax.f32 %v3082_v51, %v3083_v12 }
 0xec3   :  { %v3085_v29 = vrot.slane %v3084_v53, 4 }
 0xec5   :  { %v3086_v30 = vmax.f32 %v3084_v53, %v3085_v29 }
 0xec7   :  { %v3087_v58 = vrot.slane %v3086_v30, 2 }
 0xec9   :  { %v3088_v39 = vmax.f32 %v3086_v30, %v3087_v58 }
 0xecb   :  { %v3089_v14 = vrot.slane %v3088_v39, 1 }
 0xecd   :  { %v3090_v15 = vmax.f32 %v3088_v39, %v3089_v14 }
 0xecf   :  { %vm3093_vm15 = vcmp.eq.f32.partialorder %v3065_v20, %v3090_v15  ;;  %vm3094_vm6 = vcmp.eq.f32.partialorder %v3066_v38, %v3090_v15  ;;  %3092 = vst.msk [vmem:[#allocation7] sm:$0x1] %vm3091_vm12, %v3090_v15 }
 0xed0   :  { %v3095_v49 = vsel %vm3093_vm15, %v6791_v24, 16  ;;  %v3096_v55 = vsel %vm3094_vm6, %v6792_v61, 16 }
 0xed1   :  { %3529 = shalt.err (!%p3526_p4)
}
 0xed2   :  { %s3530_s25 = scalar_lea.hbm %s6326_s3, 16 }
 0xed3   :  { %p3531_p5 = scmp.ne.s32.totalorder %s6326_s3, %s3530_s25  ;;  %p3534_p6 = scmp.lt.u32.totalorder %s3530_s25, %s6326_s3 }
 0xed5   :  { %p3536_p7 = pnand %p3534_p6, %p3531_p5 }
 0xed7   :  { %3539 = shalt.err (!%p3536_p7)
}
 0xed8   :  { %3120 = dma.vmem_to_hbm [thread:$0]  %s3118_s21, 16, %s6326_s3, [#allocation8]   ;;  %v3097_v52 = vsel %vm3081_vm0, %v3095_v49, 2147483647  ;;  %v3098_v56 = vsel %vm3081_vm0, %v3096_v55, 2147483647 }
 0xed9   :  { %vm3099_vm11 = vcmp.lt.s32.totalorder %v3097_v52, %v3098_v56  ;;  %s3569_s6 = smov [#allocation9]  }
 0xeda   :  { %v3100_v7 = vsel %vm3099_vm11, %v3097_v52, %v3098_v56  ;;  %s3127_s7 = sshll.u32 %s3569_s6, 4  ;;  %s3128_s7 = int_to_ptr.vmem [resolvable:$true] %s3127_s7 }
 0xedb   :  { %v3101_v47 = vrot.slane %v3100_v7, 4  ;;  %s3540_s3 = scalar_lea.vmem %s3128_s7, 16  ;;  %s3544_s8 = scalar_lea.vmem %s3128_s7, 32 }
 0xedc   :  { %p3541_p8 = scmp.ne.s32.totalorder %s3128_s7, %s3540_s3  ;;  %p3545_p9 = scmp.lt.s32.totalorder %s3128_s7, %s3128_s7 }
 0xedd   :  { %vm3102_vm2 = vcmp.lt.s32.totalorder %v3100_v7, %v3101_v47  ;;  %p3546_p10 = scmp.lt.s32.totalorder %s3544_s8, %s3540_s3 }
 0xede   :  { %v3103_v22 = vsel %vm3102_vm2, %v3100_v7, %v3101_v47 }
 0xedf   :  { %v3104_v57 = vrot.slane %v3103_v22, 2  ;;  %p3547_p11 = por %p3546_p10, %p3545_p9 }
 0xee1   :  { %vm3105_vm7 = vcmp.lt.s32.totalorder %v3103_v22, %v3104_v57  ;;  %p3548_p12 = pnand %p3547_p11, %p3541_p8 }
 0xee2   :  { %v3106_v11 = vsel %vm3105_vm7, %v3103_v22, %v3104_v57 }
 0xee3   :  { %v3107_v60 = vrot.slane %v3106_v11, 1 }
 0xee5   :  { %vm3108_vm8 = vcmp.lt.s32.totalorder %v3106_v11, %v3107_v60 }
 0xee6   :  { %v3109_v13 = vsel %vm3108_vm8, %v3106_v11, %v3107_v60 }
 0xee7   :  { %3110 = vst.msk [vmem:[#allocation9] sm:$0x1] %vm3091_vm12, %v3109_v13 }
 0xee8   :  { %3551 = shalt.err (!%p3548_p12)
}
 0xee9   :  { %s3552_s11 = scalar_lea.hbm %s6327_s4, 16 }
 0xeea   :  { %p3553_p13 = scmp.ne.s32.totalorder %s6327_s4, %s3552_s11  ;;  %p3556_p0 = scmp.lt.u32.totalorder %s3552_s11, %s6327_s4 }
 0xeec   :  { %p3558_p1 = pnand %p3556_p0, %p3553_p13 }
 0xeee   :  { %3561 = shalt.err (!%p3558_p1)
}
 0xeef   :  { %3130 = dma.vmem_to_hbm [thread:$0]  %s3128_s7, 16, %s6327_s4, [#allocation10]  }
 0xef0   :  { %3562 = dma.done.wait [#allocation8], 16  }
 0xef1   :  { %3563 = vsyncadd [#allocation8], 4294967280 }
 0xef2   :  { %3564 = dma.done.wait [#allocation10], 16  }
 0xef3   :  { %3565 = vsyncadd [#allocation10], 4294967280 }
 0xef4   :  { %3137 = vsyncpa [#allocation8], 1 }
 0xef5   :  { %3138 = vsyncpa [#allocation10], 1 }

</bundles_post_ra>
